<compile_context>
chip_gen: v6e
topology: v6e:2x2x1
jax: 0.10.0
libtpu: 0.0.40
codegen_flags: <defaults>
</compile_context>

<pallas_src>
import functools
import math

import numpy as np

import jax
import jax.numpy as jnp
from jax import lax
from jax.experimental import pallas as pl
from jax.experimental.pallas import tpu as pltpu

# ----------------------------- model config ---------------------------------
CFG = dict(
    vocab=384,
    d_model=128,
    d_kv=32,
    num_heads=4,
    d_ff=256,
    rel_buckets=32,
    rel_max_dist=128,
    pad_token_id=0,
    decoder_start_token_id=0,
    layer_norm_eps=1e-6,
)
NEG = -1e9  # additive mask value (stands in for torch.finfo(dtype).min)


# ----------------------------- in-kernel helpers ------------------------------
def _rms(x, w, eps):
    # T5LayerNorm: no mean subtraction, no bias. f32 math.
    var = jnp.mean(x * x, axis=-1, keepdims=True)
    return x * lax.rsqrt(var + eps) * w


def _bf(x):
    return x.astype(jnp.bfloat16)


def _embed(ids_ref, emb_ref, n_rows):
    # One-hot matmul gather: avoids the XLA gather glue op; emb is bf16.
    v = emb_ref.shape[0]
    ids = ids_ref[...]                                           # (N, 1) int32
    col = lax.broadcasted_iota(jnp.int32, (n_rows, v), 1)
    onehot = (col == ids).astype(jnp.bfloat16)
    return jnp.dot(onehot, emb_ref[...], preferred_element_type=jnp.float32)


def _mha_into(ctx_ref, q, k, v, bias, keymask, causal, *, B, Lq, Lk, H, Dh):
    """Per-head softmax attention; writes head contexts into ctx_ref (B*Lq, H*Dh).

    q: (B*Lq, H*Dh) f32; k, v: (B*Lk, H*Dh) f32; bias: (H, Lq, Lk) f32 or None;
    keymask: (B, Lk) f32 in {0,1}. Masks are built in-kernel (no HBM masks).
    """
    if causal:
        row = lax.broadcasted_iota(jnp.int32, (Lq, Lk), 0)
        col = lax.broadcasted_iota(jnp.int32, (Lq, Lk), 1)
        causal_keep = (col <= row).astype(jnp.float32)
    for b in range(B):                                  # static, B is tiny
        keep = jnp.broadcast_to(keymask[b:b + 1, :], (Lq, Lk))
        if causal:
            keep = keep * causal_keep
        addm = (1.0 - keep) * NEG                       # (Lq, Lk) additive mask
        qb = q[b * Lq:(b + 1) * Lq, :]
        kb = k[b * Lk:(b + 1) * Lk, :]
        vb = v[b * Lk:(b + 1) * Lk, :]
        for hh in range(H):                             # static unroll over heads
            sl = slice(hh * Dh, (hh + 1) * Dh)
            # T5 attention: no 1/sqrt(d) scaling; additive position bias + mask.
            s = lax.dot_general(_bf(qb[:, sl]), _bf(kb[:, sl]),
                                (((1,), (1,)), ((), ())),
                                preferred_element_type=jnp.float32)
            if bias is not None:
                s = s + bias[hh]
            s = s + addm
            m = jnp.max(s, axis=-1, keepdims=True)
            p = jnp.exp(s - m)
            denom = jnp.sum(p, axis=-1, keepdims=True)
            p = p * pl.reciprocal(denom, approx=True)
            ctx_ref[b * Lq:(b + 1) * Lq, sl] = jnp.dot(
                _bf(p), _bf(vb[:, sl]), preferred_element_type=jnp.float32)


# --------------------------- fused encoder kernel -----------------------------
def _encoder_kernel(ids_ref, km_ref, emb_ref, bias_ref,
                    ln1_ref, wqkv_ref, wo_ref,
                    ln2_ref, wi_ref, wof_ref, lnf_ref,
                    o_ref, ctx_ref, *, B, L, H, Dh, eps):
    N, _ = o_ref.shape
    inner = H * Dh

    x = _embed(ids_ref, emb_ref, N)                              # (N, D) f32
    keymask = (km_ref[...] != 0).astype(jnp.float32)             # (B, L)

    # ---- self-attention block (fused QKV, single output projection) ----
    h = _rms(x, ln1_ref[...], eps)
    qkv = jnp.dot(_bf(h), wqkv_ref[...], preferred_element_type=jnp.float32)
    q = qkv[:, :inner]
    k = qkv[:, inner:2 * inner]
    v = qkv[:, 2 * inner:]
    _mha_into(ctx_ref, q, k, v, bias_ref[...], keymask, False,
              B=B, Lq=L, Lk=L, H=H, Dh=Dh)
    x = x + jnp.dot(_bf(ctx_ref[...]), wo_ref[...],
                    preferred_element_type=jnp.float32)

    # ---- FFN block ----
    h = _rms(x, ln2_ref[...], eps)
    h1 = jnp.maximum(jnp.dot(_bf(h), wi_ref[...],
                             preferred_element_type=jnp.float32), 0.0)
    x = x + jnp.dot(_bf(h1), wof_ref[...], preferred_element_type=jnp.float32)

    # ---- encoder final RMSNorm (encoder output) ----
    o_ref[...] = _rms(x, lnf_ref[...], eps)


# --------------------------- fused decoder kernel -----------------------------
def _decoder_kernel(ids_ref, dkm_ref, ekm_ref, ench_ref, emb_ref, bias_ref,
                    ln0_ref, swqkv_ref, swo_ref,
                    ln1_ref, cwqkv_ref, cwo_ref,
                    ln2_ref, wi_ref, wof_ref, lnf_ref,
                    o_ref, ctx_ref, *, B, Ld, Le, H, Dh, eps):
    N, _ = o_ref.shape
    inner = H * Dh

    y = _embed(ids_ref, emb_ref, N)                              # (N, D) f32
    dec_keymask = (dkm_ref[...] != 0).astype(jnp.float32)        # (B, Ld)
    enc_keymask = (ekm_ref[...] != 0).astype(jnp.float32)        # (B, Le)

    # ---- causal self-attention ----
    h = _rms(y, ln0_ref[...], eps)
    qkv = jnp.dot(_bf(h), swqkv_ref[...], preferred_element_type=jnp.float32)
    q = qkv[:, :inner]
    k = qkv[:, inner:2 * inner]
    v = qkv[:, 2 * inner:]
    _mha_into(ctx_ref, q, k, v, bias_ref[...], dec_keymask, True,
              B=B, Lq=Ld, Lk=Ld, H=H, Dh=Dh)
    y = y + jnp.dot(_bf(ctx_ref[...]), swo_ref[...],
                    preferred_element_type=jnp.float32)

    # ---- cross-attention (encoder keys/values, no position bias) ----
    h = _rms(y, ln1_ref[...], eps)
    q = jnp.dot(_bf(h), cwqkv_ref[:, :inner],
                preferred_element_type=jnp.float32)              # (N, inner)
    enc_h = ench_ref[...]                                        # (B*Le, D), already final-LN'd
    kv = jnp.dot(_bf(enc_h), cwqkv_ref[:, inner:],
                 preferred_element_type=jnp.float32)             # (B*Le, 2*inner)
    k = kv[:, :inner]
    v = kv[:, inner:]
    _mha_into(ctx_ref, q, k, v, None, enc_keymask, False,
              B=B, Lq=Ld, Lk=Le, H=H, Dh=Dh)
    y = y + jnp.dot(_bf(ctx_ref[...]), cwo_ref[...],
                    preferred_element_type=jnp.float32)

    # ---- FFN block ----
    h = _rms(y, ln2_ref[...], eps)
    h1 = jnp.maximum(jnp.dot(_bf(h), wi_ref[...],
                             preferred_element_type=jnp.float32), 0.0)
    y = y + jnp.dot(_bf(h1), wof_ref[...], preferred_element_type=jnp.float32)

    # ---- decoder final RMSNorm ----
    o_ref[...] = _rms(y, lnf_ref[...], eps)


# ----------------- fused tied LM head + masked cross-entropy ------------------
def _head_ce_kernel(x_ref, emb_ref, labels_ref, loss_ref, cnt_ref, *, scale):
    x = x_ref[...]                                               # (tm, D), already final-LN'd
    h = _bf(x * scale)
    # Tied head: contract against emb's last dim (no emb.T materialization).
    logits = lax.dot_general(h, emb_ref[...], (((1,), (1,)), ((), ())),
                             preferred_element_type=jnp.float32)  # (tm, V)
    labels = labels_ref[...]                                     # (tm, 1) int32 (-100 = ignore)
    m = jnp.max(logits, axis=-1, keepdims=True)
    lse = jnp.log(jnp.sum(jnp.exp(logits - m), axis=-1, keepdims=True)) + m
    col = lax.broadcasted_iota(jnp.int32, logits.shape, 1)
    onehot = (col == labels).astype(jnp.float32)
    correct = jnp.sum(onehot * logits, axis=-1, keepdims=True)
    valid = (labels != -100).astype(jnp.float32)
    per_tok = (lse - correct) * valid                            # (tm, 1)
    loss_ref[...] = jnp.broadcast_to(
        jnp.sum(per_tok, axis=0, keepdims=True), (1, 128))
    cnt_ref[...] = jnp.broadcast_to(
        jnp.sum(valid, axis=0, keepdims=True), (1, 128))


# ------------------------------ wrappers --------------------------------------
def _full_spec(shape):
    return pl.BlockSpec(shape, lambda i, _s=shape: (0,) * len(_s))


def _dual_core_chip():
    # 2-way parallel row split only pays on dual-TensorCore chips (v7x);
    # on single-TC v5e/v6e an extra grid step is pure overhead.
    try:
        kind = jax.devices()[0].device_kind.lower()
    except Exception:
        return False
    return ("v7" in kind) or ("7x" in kind)


def encoder_forward(params, input_ids, input_masks, enc_bias):
    B, Le = input_ids.shape
    D, H, Dh, F, V = (CFG["d_model"], CFG["num_heads"], CFG["d_kv"],
                      CFG["d_ff"], CFG["vocab"])
    inner = H * Dh
    Ne = B * Le
    e = params["enc"]
    kern = functools.partial(_encoder_kernel, B=B, L=Le, H=H, Dh=Dh,
                             eps=CFG["layer_norm_eps"])
    return pl.pallas_call(
        kern,
        grid=(1,),
        in_specs=[
            _full_spec((Ne, 1)),            # token ids
            _full_spec((B, Le)),            # key mask (int)
            _full_spec((V, D)),             # embedding (bf16)
            _full_spec((H, Le, Le)),        # relative-position bias
            _full_spec((1, D)), _full_spec((D, 3 * inner)), _full_spec((inner, D)),
            _full_spec((1, D)), _full_spec((D, F)), _full_spec((F, D)),
            _full_spec((1, D)),             # encoder final LN
        ],
        out_specs=_full_spec((Ne, D)),
        out_shape=jax.ShapeDtypeStruct((Ne, D), jnp.float32),
        scratch_shapes=[pltpu.VMEM((Ne, inner), jnp.float32)],
    )(input_ids.reshape(Ne, 1).astype(jnp.int32),
      input_masks.astype(jnp.int32),
      params["emb"], enc_bias,
      e["ln1"].reshape(1, D), e["attn_wqkv"], e["attn_wo"],
      e["ln2"].reshape(1, D), e["ffn_wi"], e["ffn_wo"],
      params["enc_final_ln"].reshape(1, D))


def decoder_forward(params, dec_in_ids, output_masks, input_masks, enc_h, dec_bias):
    B, Ld = dec_in_ids.shape
    Le = input_masks.shape[1]
    D, H, Dh, F, V = (CFG["d_model"], CFG["num_heads"], CFG["d_kv"],
                      CFG["d_ff"], CFG["vocab"])
    inner = H * Dh
    Nd = B * Ld
    Ne = B * Le
    d = params["dec"]
    kern = functools.partial(_decoder_kernel, B=B, Ld=Ld, Le=Le, H=H, Dh=Dh,
                             eps=CFG["layer_norm_eps"])
    return pl.pallas_call(
        kern,
        grid=(1,),
        in_specs=[
            _full_spec((Nd, 1)),            # decoder input ids
            _full_spec((B, Ld)),            # decoder key mask
            _full_spec((B, Le)),            # encoder key mask (for cross-attn)
            _full_spec((Ne, D)),            # encoder hidden states (final-LN'd)
            _full_spec((V, D)),             # embedding (bf16)
            _full_spec((H, Ld, Ld)),        # decoder relative-position bias
            _full_spec((1, D)), _full_spec((D, 3 * inner)), _full_spec((inner, D)),
            _full_spec((1, D)), _full_spec((D, 3 * inner)), _full_spec((inner, D)),
            _full_spec((1, D)), _full_spec((D, F)), _full_spec((F, D)),
            _full_spec((1, D)),             # decoder final LN
        ],
        out_specs=_full_spec((Nd, D)),
        out_shape=jax.ShapeDtypeStruct((Nd, D), jnp.float32),
        scratch_shapes=[pltpu.VMEM((Nd, inner), jnp.float32)],
    )(dec_in_ids.reshape(Nd, 1).astype(jnp.int32),
      output_masks.astype(jnp.int32),
      input_masks.astype(jnp.int32),
      enc_h, params["emb"], dec_bias,
      d["ln0"].reshape(1, D), d["self_wqkv"], d["self_wo"],
      d["ln1"].reshape(1, D), d["cross_wqkv"], d["cross_wo"],
      d["ln2"].reshape(1, D), d["ffn_wi"], d["ffn_wo"],
      params["dec_final_ln"].reshape(1, D))


def lm_head_ce(dec_h, emb, labels):
    N, D = dec_h.shape
    V = emb.shape[0]
    # Row-parallel split only where there is a second TensorCore to use it.
    G = 2 if (_dual_core_chip() and N % 2 == 0 and (N // 2) % 8 == 0) else 1
    tm = N // G
    kern = functools.partial(_head_ce_kernel, scale=D ** -0.5)
    loss_parts, cnt_parts = pl.pallas_call(
        kern,
        grid=(G,),
        in_specs=[
            pl.BlockSpec((tm, D), lambda i: (i, 0)),
            pl.BlockSpec((V, D), lambda i: (0, 0)),
            pl.BlockSpec((tm, 1), lambda i: (i, 0)),
        ],
        out_specs=(
            pl.BlockSpec((1, 128), lambda i: (0, i)),
            pl.BlockSpec((1, 128), lambda i: (0, i)),
        ),
        out_shape=(
            jax.ShapeDtypeStruct((1, G * 128), jnp.float32),
            jax.ShapeDtypeStruct((1, G * 128), jnp.float32),
        ),
        compiler_params=pltpu.CompilerParams(dimension_semantics=("parallel",)),
    )(dec_h, emb, labels.reshape(N, 1).astype(jnp.int32))
    loss_sum = loss_parts.reshape(G, 128)[:, 0].sum()
    cnt = cnt_parts.reshape(G, 128)[:, 0].sum()
    # Matches nn.CrossEntropyLoss(ignore_index=-100) mean reduction; NaN when
    # every target is ignored (same as PyTorch).
    return loss_sum / cnt


# ----------------------------- T5 glue (JAX/numpy) ----------------------------
def _relative_position_bucket_np(rel_pos, bidirectional, num_buckets, max_distance):
    rel_buckets = np.zeros_like(rel_pos)
    if bidirectional:
        num_buckets = num_buckets // 2
        rel_buckets = rel_buckets + (rel_pos > 0).astype(np.int32) * num_buckets
        rel_pos = np.abs(rel_pos)
    else:
        rel_pos = -np.minimum(rel_pos, 0)
    max_exact = num_buckets // 2
    is_small = rel_pos < max_exact
    rp_f = np.maximum(rel_pos, 1).astype(np.float32)
    rel_if_large = max_exact + (
        np.log(rp_f / max_exact)
        / math.log(max_distance / max_exact)
        * (num_buckets - max_exact)
    ).astype(np.int32)
    rel_if_large = np.minimum(rel_if_large, num_buckets - 1)
    return rel_buckets + np.where(is_small, rel_pos, rel_if_large)


def compute_position_bias(q_len, k_len, table, bidirectional):
    # Bucket indices are static (numpy, trace-time constants); only the tiny
    # (rel_buckets, H) table gather + transpose remain as runtime XLA ops.
    ctx = np.arange(q_len, dtype=np.int32)[:, None]
    mem = np.arange(k_len, dtype=np.int32)[None, :]
    buckets = _relative_position_bucket_np(
        mem - ctx, bidirectional, CFG["rel_buckets"], CFG["rel_max_dist"])
    values = table[buckets]                        # (q, k, H)
    return jnp.transpose(values, (2, 0, 1))        # (H, q, k)


def shift_right(labels):
    shifted = jnp.zeros_like(labels)
    shifted = shifted.at[:, 1:].set(labels[:, :-1])
    shifted = shifted.at[:, 0].set(CFG["decoder_start_token_id"])
    return jnp.where(shifted == -100, CFG["pad_token_id"], shifted)


def t5_loss(params, input_ids, input_masks, output_ids, output_masks):
    # output_ids[output_ids == pad] = -100  (PyTorch in-place mask)
    labels = jnp.where(output_ids == CFG["pad_token_id"], -100, output_ids)
    dec_in_ids = shift_right(labels)

    Le = input_ids.shape[1]
    Ld = output_ids.shape[1]
    enc_bias = compute_position_bias(Le, Le, params["enc_rel_bias"], True)   # (H,Le,Le)
    dec_bias = compute_position_bias(Ld, Ld, params["dec_rel_bias"], False)  # (H,Ld,Ld)

    enc_h = encoder_forward(params, input_ids, input_masks, enc_bias)        # (B*Le, D)
    dec_h = decoder_forward(params, dec_in_ids, output_masks, input_masks,
                            enc_h, dec_bias)                                 # (B*Ld, D)
    return lm_head_ce(dec_h, params["emb"], labels)


# ----------------------------- parameters ------------------------------------
def init_params(key):
    D, Dh, H, F, V = (CFG["d_model"], CFG["d_kv"], CFG["num_heads"],
                      CFG["d_ff"], CFG["vocab"])
    inner = H * Dh
    keys = iter(jax.random.split(key, 16))

    def nrm(shape, scale=0.02, dtype=jnp.bfloat16):
        return (scale * jax.random.normal(next(keys), shape, jnp.float32)).astype(dtype)

    enc = dict(
        ln1=jnp.ones((D,), jnp.float32), ln2=jnp.ones((D,), jnp.float32),
        attn_wqkv=nrm((D, 3 * inner)), attn_wo=nrm((inner, D)),
        ffn_wi=nrm((D, F)), ffn_wo=nrm((F, D)),
    )
    dec = dict(
        ln0=jnp.ones((D,), jnp.float32), ln1=jnp.ones((D,), jnp.float32),
        ln2=jnp.ones((D,), jnp.float32),
        self_wqkv=nrm((D, 3 * inner)), self_wo=nrm((inner, D)),
        cross_wqkv=nrm((D, 3 * inner)), cross_wo=nrm((inner, D)),
        ffn_wi=nrm((D, F)), ffn_wo=nrm((F, D)),
    )
    return dict(
        emb=nrm((V, D), 1.0),                                   # bf16, tied head
        enc_rel_bias=nrm((CFG["rel_buckets"], H), 0.02, jnp.float32),
        dec_rel_bias=nrm((CFG["rel_buckets"], H), 0.02, jnp.float32),
        enc=enc, enc_final_ln=jnp.ones((D,), jnp.float32),
        dec=dec, dec_final_ln=jnp.ones((D,), jnp.float32),
    )


# ----------------------------- main -------------------------------------------
if __name__ == "__main__":
    key = jax.random.PRNGKey(0)
    kp, ki, ko = jax.random.split(key, 3)
    params = init_params(kp)

    B, Le, Ld = 2, 16, 8
    input_ids = jax.random.randint(ki, (B, Le), 1, CFG["vocab"], dtype=jnp.int32)
    input_masks = jnp.ones((B, Le), jnp.int32).at[1, 12:].set(0)
    input_ids = jnp.where(input_masks == 0, CFG["pad_token_id"], input_ids)

    output_ids = jax.random.randint(ko, (B, Ld), 1, CFG["vocab"], dtype=jnp.int32)
    output_masks = jnp.ones((B, Ld), jnp.int32).at[1, 6:].set(0)
    output_ids = jnp.where(output_masks == 0, CFG["pad_token_id"], output_ids)

    loss_fn = jax.jit(t5_loss)
    loss = loss_fn(params, input_ids, input_masks, output_ids, output_masks)
    loss = jax.block_until_ready(loss)
    assert loss.shape == () and bool(jnp.isfinite(loss))
    print("KERNEL_OK")
</pallas_src>

<mosaic_0001>
module attributes {stable_mosaic.version = 11 : i64} {
  func.func @_encoder_kernel(%arg0: i32, %arg1: memref<32x1xi32, #tpu.memory_space<vmem>>, %arg2: memref<2x16xi32, #tpu.memory_space<vmem>>, %arg3: memref<384x128xbf16, #tpu.memory_space<vmem>>, %arg4: memref<4x16x16xf32, #tpu.memory_space<vmem>>, %arg5: memref<1x128xf32, #tpu.memory_space<vmem>>, %arg6: memref<128x384xbf16, #tpu.memory_space<vmem>>, %arg7: memref<128x128xbf16, #tpu.memory_space<vmem>>, %arg8: memref<1x128xf32, #tpu.memory_space<vmem>>, %arg9: memref<128x256xbf16, #tpu.memory_space<vmem>>, %arg10: memref<256x128xbf16, #tpu.memory_space<vmem>>, %arg11: memref<1x128xf32, #tpu.memory_space<vmem>>, %arg12: memref<32x128xf32, #tpu.memory_space<vmem>>, %arg13: memref<32x128xf32, #tpu.memory_space<vmem>>) attributes {dimension_semantics = [#tpu.dimension_semantics<arbitrary>], iteration_bounds = array<i64: 1>, scalar_prefetch = 0 : i64, scratch_operands = 1 : i64, tpu.core_type = #tpu.core_type<tc>, window_params = [{pipeline_mode = #tpu.pipeline_mode<synchronous>, transform_indices = @transform_0, window_bounds = array<i64: 32, 1>}, {pipeline_mode = #tpu.pipeline_mode<synchronous>, transform_indices = @transform_1, window_bounds = array<i64: 2, 16>}, {pipeline_mode = #tpu.pipeline_mode<synchronous>, transform_indices = @transform_2, window_bounds = array<i64: 384, 128>}, {pipeline_mode = #tpu.pipeline_mode<synchronous>, transform_indices = @transform_3, window_bounds = array<i64: 4, 16, 16>}, {pipeline_mode = #tpu.pipeline_mode<synchronous>, transform_indices = @transform_4, window_bounds = array<i64: 1, 128>}, {pipeline_mode = #tpu.pipeline_mode<synchronous>, transform_indices = @transform_5, window_bounds = array<i64: 128, 384>}, {pipeline_mode = #tpu.pipeline_mode<synchronous>, transform_indices = @transform_6, window_bounds = array<i64: 128, 128>}, {pipeline_mode = #tpu.pipeline_mode<synchronous>, transform_indices = @transform_7, window_bounds = array<i64: 1, 128>}, {pipeline_mode = #tpu.pipeline_mode<synchronous>, transform_indices = @transform_8, window_bounds = array<i64: 128, 256>}, {pipeline_mode = #tpu.pipeline_mode<synchronous>, transform_indices = @transform_9, window_bounds = array<i64: 256, 128>}, {pipeline_mode = #tpu.pipeline_mode<synchronous>, transform_indices = @transform_10, window_bounds = array<i64: 1, 128>}, {pipeline_mode = #tpu.pipeline_mode<synchronous>, transform_indices = @transform_11, window_bounds = array<i64: 32, 128>}]} {
    %c0 = arith.constant 0 : index
    %c0_0 = arith.constant 0 : index
    %0 = vector.load %arg1[%c0, %c0_0] : memref<32x1xi32, #tpu.memory_space<vmem>>, vector<32x1xi32>
    %1 = tpu.iota {dimensions = array<i32: 1>} : vector<32x384xi32>
    %2 = vector.broadcast %0 : vector<32x1xi32> to vector<32x384xi32>
    %3 = arith.cmpi eq, %1, %2 : vector<32x384xi32>
    %4 = arith.extui %3 : vector<32x384xi1> to vector<32x384xi32>
    %5 = arith.sitofp %4 : vector<32x384xi32> to vector<32x384xf32>
    %6 = arith.truncf %5 : vector<32x384xf32> to vector<32x384xbf16>
    %c0_1 = arith.constant 0 : index
    %c0_2 = arith.constant 0 : index
    %7 = vector.load %arg3[%c0_1, %c0_2] : memref<384x128xbf16, #tpu.memory_space<vmem>>, vector<384x128xbf16>
    %cst = arith.constant dense<0.000000e+00> : vector<32x128xf32>
    %8 = tpu.matmul %6, %7, %cst {dimension_numbers = #tpu.dot_dimension_numbers<[1], [0], [0], [1], [0, 0, 1, 1], [], []>} : vector<32x384xbf16>, vector<384x128xbf16>, vector<32x128xf32> -> vector<32x128xf32>
    %c0_3 = arith.constant 0 : index
    %c0_4 = arith.constant 0 : index
    %9 = vector.load %arg2[%c0_3, %c0_4] : memref<2x16xi32, #tpu.memory_space<vmem>>, vector<2x16xi32>
    %c0_i32 = arith.constant 0 : i32
    %10 = vector.broadcast %c0_i32 : i32 to vector<2x16xi32>
    %11 = arith.cmpi ne, %9, %10 : vector<2x16xi32>
    %12 = arith.extui %11 : vector<2x16xi1> to vector<2x16xi32>
    %13 = arith.sitofp %12 : vector<2x16xi32> to vector<2x16xf32>
    %c0_5 = arith.constant 0 : index
    %c0_6 = arith.constant 0 : index
    %14 = vector.load %arg5[%c0_5, %c0_6] : memref<1x128xf32, #tpu.memory_space<vmem>>, vector<1x128xf32>
    %15 = arith.mulf %8, %8 : vector<32x128xf32>
    %cst_7 = arith.constant dense<0.000000e+00> : vector<32xf32>
    %16 = vector.multi_reduction <add>, %15, %cst_7 [1] : vector<32x128xf32> to vector<32xf32>
    %17 = vector.shape_cast %16 : vector<32xf32> to vector<32x1xf32>
    %cst_8 = arith.constant 1.280000e+02 : f32
    %18 = vector.broadcast %cst_8 : f32 to vector<32x1xf32>
    %19 = arith.divf %17, %18 : vector<32x1xf32>
    %cst_9 = arith.constant 9.99999997E-7 : f32
    %20 = vector.broadcast %cst_9 : f32 to vector<32x1xf32>
    %21 = arith.addf %19, %20 : vector<32x1xf32>
    %22 = math.rsqrt %21 : vector<32x1xf32>
    %23 = vector.broadcast %22 : vector<32x1xf32> to vector<32x128xf32>
    %24 = arith.mulf %8, %23 : vector<32x128xf32>
    %25 = vector.broadcast %14 : vector<1x128xf32> to vector<32x128xf32>
    %26 = arith.mulf %24, %25 : vector<32x128xf32>
    %27 = arith.truncf %26 : vector<32x128xf32> to vector<32x128xbf16>
    %c0_10 = arith.constant 0 : index
    %c0_11 = arith.constant 0 : index
    %28 = vector.load %arg6[%c0_10, %c0_11] : memref<128x384xbf16, #tpu.memory_space<vmem>>, vector<128x384xbf16>
    %cst_12 = arith.constant dense<0.000000e+00> : vector<32x384xf32>
    %29 = tpu.matmul %27, %28, %cst_12 {dimension_numbers = #tpu.dot_dimension_numbers<[1], [0], [0], [1], [0, 0, 1, 1], [], []>} : vector<32x128xbf16>, vector<128x384xbf16>, vector<32x384xf32> -> vector<32x384xf32>
    %30 = vector.extract_strided_slice %29 {offsets = [0, 0], sizes = [32, 128], strides = [1, 1]} : vector<32x384xf32> to vector<32x128xf32>
    %31 = vector.extract_strided_slice %29 {offsets = [0, 128], sizes = [32, 128], strides = [1, 1]} : vector<32x384xf32> to vector<32x128xf32>
    %32 = vector.extract_strided_slice %29 {offsets = [0, 256], sizes = [32, 128], strides = [1, 1]} : vector<32x384xf32> to vector<32x128xf32>
    %c0_13 = arith.constant 0 : index
    %c0_14 = arith.constant 0 : index
    %c0_15 = arith.constant 0 : index
    %33 = vector.load %arg4[%c0_13, %c0_14, %c0_15] : memref<4x16x16xf32, #tpu.memory_space<vmem>>, vector<4x16x16xf32>
    %34 = vector.extract_strided_slice %13 {offsets = [0, 0], sizes = [1, 16], strides = [1, 1]} : vector<2x16xf32> to vector<1x16xf32>
    %35 = vector.shape_cast %34 : vector<1x16xf32> to vector<1x16xf32>
    %36 = vector.broadcast %35 : vector<1x16xf32> to vector<16x16xf32>
    %cst_16 = arith.constant 1.000000e+00 : f32
    %37 = vector.broadcast %cst_16 : f32 to vector<16x16xf32>
    %38 = arith.subf %37, %36 : vector<16x16xf32>
    %cst_17 = arith.constant -1.000000e+09 : f32
    %39 = vector.broadcast %cst_17 : f32 to vector<16x16xf32>
    %40 = arith.mulf %38, %39 : vector<16x16xf32>
    %41 = vector.extract_strided_slice %30 {offsets = [0, 0], sizes = [16, 128], strides = [1, 1]} : vector<32x128xf32> to vector<16x128xf32>
    %42 = vector.extract_strided_slice %31 {offsets = [0, 0], sizes = [16, 128], strides = [1, 1]} : vector<32x128xf32> to vector<16x128xf32>
    %43 = vector.extract_strided_slice %32 {offsets = [0, 0], sizes = [16, 128], strides = [1, 1]} : vector<32x128xf32> to vector<16x128xf32>
    %44 = vector.extract_strided_slice %41 {offsets = [0, 0], sizes = [16, 32], strides = [1, 1]} : vector<16x128xf32> to vector<16x32xf32>
    %45 = arith.truncf %44 : vector<16x32xf32> to vector<16x32xbf16>
    %46 = vector.extract_strided_slice %42 {offsets = [0, 0], sizes = [16, 32], strides = [1, 1]} : vector<16x128xf32> to vector<16x32xf32>
    %47 = arith.truncf %46 : vector<16x32xf32> to vector<16x32xbf16>
    %cst_18 = arith.constant dense<0.000000e+00> : vector<16x16xf32>
    %48 = tpu.matmul %45, %47, %cst_18 {dimension_numbers = #tpu.dot_dimension_numbers<[1], [1], [0], [0], [0, 0, 1, 0], [], []>} : vector<16x32xbf16>, vector<16x32xbf16>, vector<16x16xf32> -> vector<16x16xf32>
    %49 = vector.extract_strided_slice %33 {offsets = [0, 0, 0], sizes = [1, 16, 16], strides = [1, 1, 1]} : vector<4x16x16xf32> to vector<1x16x16xf32>
    %50 = vector.shape_cast %49 : vector<1x16x16xf32> to vector<16x16xf32>
    %51 = arith.addf %48, %50 : vector<16x16xf32>
    %52 = arith.addf %51, %40 : vector<16x16xf32>
    %cst_19 = arith.constant dense<0xFF800000> : vector<16xf32>
    %53 = vector.multi_reduction <maximumf>, %52, %cst_19 [1] : vector<16x16xf32> to vector<16xf32>
    %54 = vector.shape_cast %53 : vector<16xf32> to vector<16x1xf32>
    %55 = vector.broadcast %54 : vector<16x1xf32> to vector<16x16xf32>
    %56 = arith.subf %52, %55 : vector<16x16xf32>
    %57 = math.exp %56 : vector<16x16xf32>
    %cst_20 = arith.constant dense<0.000000e+00> : vector<16xf32>
    %58 = vector.multi_reduction <add>, %57, %cst_20 [1] : vector<16x16xf32> to vector<16xf32>
    %59 = vector.shape_cast %58 : vector<16xf32> to vector<16x1xf32>
    %60 = tpu.reciprocal %59 {approx = true} : vector<16x1xf32> -> vector<16x1xf32>
    %61 = vector.broadcast %60 : vector<16x1xf32> to vector<16x16xf32>
    %62 = arith.mulf %57, %61 : vector<16x16xf32>
    %63 = arith.truncf %62 : vector<16x16xf32> to vector<16x16xbf16>
    %64 = vector.extract_strided_slice %43 {offsets = [0, 0], sizes = [16, 32], strides = [1, 1]} : vector<16x128xf32> to vector<16x32xf32>
    %65 = arith.truncf %64 : vector<16x32xf32> to vector<16x32xbf16>
    %cst_21 = arith.constant dense<0.000000e+00> : vector<16x32xf32>
    %66 = tpu.matmul %63, %65, %cst_21 {dimension_numbers = #tpu.dot_dimension_numbers<[1], [0], [0], [1], [0, 0, 1, 1], [], []>} : vector<16x16xbf16>, vector<16x32xbf16>, vector<16x32xf32> -> vector<16x32xf32>
    %c0_22 = arith.constant 0 : index
    %c0_23 = arith.constant 0 : index
    %67 = vector.load %arg13[%c0_22, %c0_23] : memref<32x128xf32, #tpu.memory_space<vmem>>, vector<16x32xf32>
    tpu.vector_store %arg13[%c0_22, %c0_23], %66 {strides = array<i32>} : memref<32x128xf32, #tpu.memory_space<vmem>>, vector<16x32xf32>,
    %68 = vector.extract_strided_slice %41 {offsets = [0, 32], sizes = [16, 32], strides = [1, 1]} : vector<16x128xf32> to vector<16x32xf32>
    %69 = arith.truncf %68 : vector<16x32xf32> to vector<16x32xbf16>
    %70 = vector.extract_strided_slice %42 {offsets = [0, 32], sizes = [16, 32], strides = [1, 1]} : vector<16x128xf32> to vector<16x32xf32>
    %71 = arith.truncf %70 : vector<16x32xf32> to vector<16x32xbf16>
    %cst_24 = arith.constant dense<0.000000e+00> : vector<16x16xf32>
    %72 = tpu.matmul %69, %71, %cst_24 {dimension_numbers = #tpu.dot_dimension_numbers<[1], [1], [0], [0], [0, 0, 1, 0], [], []>} : vector<16x32xbf16>, vector<16x32xbf16>, vector<16x16xf32> -> vector<16x16xf32>
    %73 = vector.extract_strided_slice %33 {offsets = [1, 0, 0], sizes = [1, 16, 16], strides = [1, 1, 1]} : vector<4x16x16xf32> to vector<1x16x16xf32>
    %74 = vector.shape_cast %73 : vector<1x16x16xf32> to vector<16x16xf32>
    %75 = arith.addf %72, %74 : vector<16x16xf32>
    %76 = arith.addf %75, %40 : vector<16x16xf32>
    %cst_25 = arith.constant dense<0xFF800000> : vector<16xf32>
    %77 = vector.multi_reduction <maximumf>, %76, %cst_25 [1] : vector<16x16xf32> to vector<16xf32>
    %78 = vector.shape_cast %77 : vector<16xf32> to vector<16x1xf32>
    %79 = vector.broadcast %78 : vector<16x1xf32> to vector<16x16xf32>
    %80 = arith.subf %76, %79 : vector<16x16xf32>
    %81 = math.exp %80 : vector<16x16xf32>
    %cst_26 = arith.constant dense<0.000000e+00> : vector<16xf32>
    %82 = vector.multi_reduction <add>, %81, %cst_26 [1] : vector<16x16xf32> to vector<16xf32>
    %83 = vector.shape_cast %82 : vector<16xf32> to vector<16x1xf32>
    %84 = tpu.reciprocal %83 {approx = true} : vector<16x1xf32> -> vector<16x1xf32>
    %85 = vector.broadcast %84 : vector<16x1xf32> to vector<16x16xf32>
    %86 = arith.mulf %81, %85 : vector<16x16xf32>
    %87 = arith.truncf %86 : vector<16x16xf32> to vector<16x16xbf16>
    %88 = vector.extract_strided_slice %43 {offsets = [0, 32], sizes = [16, 32], strides = [1, 1]} : vector<16x128xf32> to vector<16x32xf32>
    %89 = arith.truncf %88 : vector<16x32xf32> to vector<16x32xbf16>
    %cst_27 = arith.constant dense<0.000000e+00> : vector<16x32xf32>
    %90 = tpu.matmul %87, %89, %cst_27 {dimension_numbers = #tpu.dot_dimension_numbers<[1], [0], [0], [1], [0, 0, 1, 1], [], []>} : vector<16x16xbf16>, vector<16x32xbf16>, vector<16x32xf32> -> vector<16x32xf32>
    %c0_28 = arith.constant 0 : index
    %c32 = arith.constant 32 : index
    %91 = vector.load %arg13[%c0_28, %c32] : memref<32x128xf32, #tpu.memory_space<vmem>>, vector<16x32xf32>
    tpu.vector_store %arg13[%c0_28, %c32], %90 {strides = array<i32>} : memref<32x128xf32, #tpu.memory_space<vmem>>, vector<16x32xf32>,
    %92 = vector.extract_strided_slice %41 {offsets = [0, 64], sizes = [16, 32], strides = [1, 1]} : vector<16x128xf32> to vector<16x32xf32>
    %93 = arith.truncf %92 : vector<16x32xf32> to vector<16x32xbf16>
    %94 = vector.extract_strided_slice %42 {offsets = [0, 64], sizes = [16, 32], strides = [1, 1]} : vector<16x128xf32> to vector<16x32xf32>
    %95 = arith.truncf %94 : vector<16x32xf32> to vector<16x32xbf16>
    %cst_29 = arith.constant dense<0.000000e+00> : vector<16x16xf32>
    %96 = tpu.matmul %93, %95, %cst_29 {dimension_numbers = #tpu.dot_dimension_numbers<[1], [1], [0], [0], [0, 0, 1, 0], [], []>} : vector<16x32xbf16>, vector<16x32xbf16>, vector<16x16xf32> -> vector<16x16xf32>
    %97 = vector.extract_strided_slice %33 {offsets = [2, 0, 0], sizes = [1, 16, 16], strides = [1, 1, 1]} : vector<4x16x16xf32> to vector<1x16x16xf32>
    %98 = vector.shape_cast %97 : vector<1x16x16xf32> to vector<16x16xf32>
    %99 = arith.addf %96, %98 : vector<16x16xf32>
    %100 = arith.addf %99, %40 : vector<16x16xf32>
    %cst_30 = arith.constant dense<0xFF800000> : vector<16xf32>
    %101 = vector.multi_reduction <maximumf>, %100, %cst_30 [1] : vector<16x16xf32> to vector<16xf32>
    %102 = vector.shape_cast %101 : vector<16xf32> to vector<16x1xf32>
    %103 = vector.broadcast %102 : vector<16x1xf32> to vector<16x16xf32>
    %104 = arith.subf %100, %103 : vector<16x16xf32>
    %105 = math.exp %104 : vector<16x16xf32>
    %cst_31 = arith.constant dense<0.000000e+00> : vector<16xf32>
    %106 = vector.multi_reduction <add>, %105, %cst_31 [1] : vector<16x16xf32> to vector<16xf32>
    %107 = vector.shape_cast %106 : vector<16xf32> to vector<16x1xf32>
    %108 = tpu.reciprocal %107 {approx = true} : vector<16x1xf32> -> vector<16x1xf32>
    %109 = vector.broadcast %108 : vector<16x1xf32> to vector<16x16xf32>
    %110 = arith.mulf %105, %109 : vector<16x16xf32>
    %111 = arith.truncf %110 : vector<16x16xf32> to vector<16x16xbf16>
    %112 = vector.extract_strided_slice %43 {offsets = [0, 64], sizes = [16, 32], strides = [1, 1]} : vector<16x128xf32> to vector<16x32xf32>
    %113 = arith.truncf %112 : vector<16x32xf32> to vector<16x32xbf16>
    %cst_32 = arith.constant dense<0.000000e+00> : vector<16x32xf32>
    %114 = tpu.matmul %111, %113, %cst_32 {dimension_numbers = #tpu.dot_dimension_numbers<[1], [0], [0], [1], [0, 0, 1, 1], [], []>} : vector<16x16xbf16>, vector<16x32xbf16>, vector<16x32xf32> -> vector<16x32xf32>
    %c0_33 = arith.constant 0 : index
    %c64 = arith.constant 64 : index
    %115 = vector.load %arg13[%c0_33, %c64] : memref<32x128xf32, #tpu.memory_space<vmem>>, vector<16x32xf32>
    tpu.vector_store %arg13[%c0_33, %c64], %114 {strides = array<i32>} : memref<32x128xf32, #tpu.memory_space<vmem>>, vector<16x32xf32>,
    %116 = vector.extract_strided_slice %41 {offsets = [0, 96], sizes = [16, 32], strides = [1, 1]} : vector<16x128xf32> to vector<16x32xf32>
    %117 = arith.truncf %116 : vector<16x32xf32> to vector<16x32xbf16>
    %118 = vector.extract_strided_slice %42 {offsets = [0, 96], sizes = [16, 32], strides = [1, 1]} : vector<16x128xf32> to vector<16x32xf32>
    %119 = arith.truncf %118 : vector<16x32xf32> to vector<16x32xbf16>
    %cst_34 = arith.constant dense<0.000000e+00> : vector<16x16xf32>
    %120 = tpu.matmul %117, %119, %cst_34 {dimension_numbers = #tpu.dot_dimension_numbers<[1], [1], [0], [0], [0, 0, 1, 0], [], []>} : vector<16x32xbf16>, vector<16x32xbf16>, vector<16x16xf32> -> vector<16x16xf32>
    %121 = vector.extract_strided_slice %33 {offsets = [3, 0, 0], sizes = [1, 16, 16], strides = [1, 1, 1]} : vector<4x16x16xf32> to vector<1x16x16xf32>
    %122 = vector.shape_cast %121 : vector<1x16x16xf32> to vector<16x16xf32>
    %123 = arith.addf %120, %122 : vector<16x16xf32>
    %124 = arith.addf %123, %40 : vector<16x16xf32>
    %cst_35 = arith.constant dense<0xFF800000> : vector<16xf32>
    %125 = vector.multi_reduction <maximumf>, %124, %cst_35 [1] : vector<16x16xf32> to vector<16xf32>
    %126 = vector.shape_cast %125 : vector<16xf32> to vector<16x1xf32>
    %127 = vector.broadcast %126 : vector<16x1xf32> to vector<16x16xf32>
    %128 = arith.subf %124, %127 : vector<16x16xf32>
    %129 = math.exp %128 : vector<16x16xf32>
    %cst_36 = arith.constant dense<0.000000e+00> : vector<16xf32>
    %130 = vector.multi_reduction <add>, %129, %cst_36 [1] : vector<16x16xf32> to vector<16xf32>
    %131 = vector.shape_cast %130 : vector<16xf32> to vector<16x1xf32>
    %132 = tpu.reciprocal %131 {approx = true} : vector<16x1xf32> -> vector<16x1xf32>
    %133 = vector.broadcast %132 : vector<16x1xf32> to vector<16x16xf32>
    %134 = arith.mulf %129, %133 : vector<16x16xf32>
    %135 = arith.truncf %134 : vector<16x16xf32> to vector<16x16xbf16>
    %136 = vector.extract_strided_slice %43 {offsets = [0, 96], sizes = [16, 32], strides = [1, 1]} : vector<16x128xf32> to vector<16x32xf32>
    %137 = arith.truncf %136 : vector<16x32xf32> to vector<16x32xbf16>
    %cst_37 = arith.constant dense<0.000000e+00> : vector<16x32xf32>
    %138 = tpu.matmul %135, %137, %cst_37 {dimension_numbers = #tpu.dot_dimension_numbers<[1], [0], [0], [1], [0, 0, 1, 1], [], []>} : vector<16x16xbf16>, vector<16x32xbf16>, vector<16x32xf32> -> vector<16x32xf32>
    %c0_38 = arith.constant 0 : index
    %c96 = arith.constant 96 : index
    %139 = vector.load %arg13[%c0_38, %c96] : memref<32x128xf32, #tpu.memory_space<vmem>>, vector<16x32xf32>
    tpu.vector_store %arg13[%c0_38, %c96], %138 {strides = array<i32>} : memref<32x128xf32, #tpu.memory_space<vmem>>, vector<16x32xf32>,
    %140 = vector.extract_strided_slice %13 {offsets = [1, 0], sizes = [1, 16], strides = [1, 1]} : vector<2x16xf32> to vector<1x16xf32>
    %141 = vector.shape_cast %140 : vector<1x16xf32> to vector<1x16xf32>
    %142 = vector.broadcast %141 : vector<1x16xf32> to vector<16x16xf32>
    %cst_39 = arith.constant 1.000000e+00 : f32
    %143 = vector.broadcast %cst_39 : f32 to vector<16x16xf32>
    %144 = arith.subf %143, %142 : vector<16x16xf32>
    %cst_40 = arith.constant -1.000000e+09 : f32
    %145 = vector.broadcast %cst_40 : f32 to vector<16x16xf32>
    %146 = arith.mulf %144, %145 : vector<16x16xf32>
    %147 = vector.extract_strided_slice %30 {offsets = [16, 0], sizes = [16, 128], strides = [1, 1]} : vector<32x128xf32> to vector<16x128xf32>
    %148 = vector.extract_strided_slice %31 {offsets = [16, 0], sizes = [16, 128], strides = [1, 1]} : vector<32x128xf32> to vector<16x128xf32>
    %149 = vector.extract_strided_slice %32 {offsets = [16, 0], sizes = [16, 128], strides = [1, 1]} : vector<32x128xf32> to vector<16x128xf32>
    %150 = vector.extract_strided_slice %147 {offsets = [0, 0], sizes = [16, 32], strides = [1, 1]} : vector<16x128xf32> to vector<16x32xf32>
    %151 = arith.truncf %150 : vector<16x32xf32> to vector<16x32xbf16>
    %152 = vector.extract_strided_slice %148 {offsets = [0, 0], sizes = [16, 32], strides = [1, 1]} : vector<16x128xf32> to vector<16x32xf32>
    %153 = arith.truncf %152 : vector<16x32xf32> to vector<16x32xbf16>
    %cst_41 = arith.constant dense<0.000000e+00> : vector<16x16xf32>
    %154 = tpu.matmul %151, %153, %cst_41 {dimension_numbers = #tpu.dot_dimension_numbers<[1], [1], [0], [0], [0, 0, 1, 0], [], []>} : vector<16x32xbf16>, vector<16x32xbf16>, vector<16x16xf32> -> vector<16x16xf32>
    %155 = vector.extract_strided_slice %33 {offsets = [0, 0, 0], sizes = [1, 16, 16], strides = [1, 1, 1]} : vector<4x16x16xf32> to vector<1x16x16xf32>
    %156 = vector.shape_cast %155 : vector<1x16x16xf32> to vector<16x16xf32>
    %157 = arith.addf %154, %156 : vector<16x16xf32>
    %158 = arith.addf %157, %146 : vector<16x16xf32>
    %cst_42 = arith.constant dense<0xFF800000> : vector<16xf32>
    %159 = vector.multi_reduction <maximumf>, %158, %cst_42 [1] : vector<16x16xf32> to vector<16xf32>
    %160 = vector.shape_cast %159 : vector<16xf32> to vector<16x1xf32>
    %161 = vector.broadcast %160 : vector<16x1xf32> to vector<16x16xf32>
    %162 = arith.subf %158, %161 : vector<16x16xf32>
    %163 = math.exp %162 : vector<16x16xf32>
    %cst_43 = arith.constant dense<0.000000e+00> : vector<16xf32>
    %164 = vector.multi_reduction <add>, %163, %cst_43 [1] : vector<16x16xf32> to vector<16xf32>
    %165 = vector.shape_cast %164 : vector<16xf32> to vector<16x1xf32>
    %166 = tpu.reciprocal %165 {approx = true} : vector<16x1xf32> -> vector<16x1xf32>
    %167 = vector.broadcast %166 : vector<16x1xf32> to vector<16x16xf32>
    %168 = arith.mulf %163, %167 : vector<16x16xf32>
    %169 = arith.truncf %168 : vector<16x16xf32> to vector<16x16xbf16>
    %170 = vector.extract_strided_slice %149 {offsets = [0, 0], sizes = [16, 32], strides = [1, 1]} : vector<16x128xf32> to vector<16x32xf32>
    %171 = arith.truncf %170 : vector<16x32xf32> to vector<16x32xbf16>
    %cst_44 = arith.constant dense<0.000000e+00> : vector<16x32xf32>
    %172 = tpu.matmul %169, %171, %cst_44 {dimension_numbers = #tpu.dot_dimension_numbers<[1], [0], [0], [1], [0, 0, 1, 1], [], []>} : vector<16x16xbf16>, vector<16x32xbf16>, vector<16x32xf32> -> vector<16x32xf32>
    %c16 = arith.constant 16 : index
    %c0_45 = arith.constant 0 : index
    %173 = vector.load %arg13[%c16, %c0_45] : memref<32x128xf32, #tpu.memory_space<vmem>>, vector<16x32xf32>
    tpu.vector_store %arg13[%c16, %c0_45], %172 {strides = array<i32>} : memref<32x128xf32, #tpu.memory_space<vmem>>, vector<16x32xf32>,
    %174 = vector.extract_strided_slice %147 {offsets = [0, 32], sizes = [16, 32], strides = [1, 1]} : vector<16x128xf32> to vector<16x32xf32>
    %175 = arith.truncf %174 : vector<16x32xf32> to vector<16x32xbf16>
    %176 = vector.extract_strided_slice %148 {offsets = [0, 32], sizes = [16, 32], strides = [1, 1]} : vector<16x128xf32> to vector<16x32xf32>
    %177 = arith.truncf %176 : vector<16x32xf32> to vector<16x32xbf16>
    %cst_46 = arith.constant dense<0.000000e+00> : vector<16x16xf32>
    %178 = tpu.matmul %175, %177, %cst_46 {dimension_numbers = #tpu.dot_dimension_numbers<[1], [1], [0], [0], [0, 0, 1, 0], [], []>} : vector<16x32xbf16>, vector<16x32xbf16>, vector<16x16xf32> -> vector<16x16xf32>
    %179 = vector.extract_strided_slice %33 {offsets = [1, 0, 0], sizes = [1, 16, 16], strides = [1, 1, 1]} : vector<4x16x16xf32> to vector<1x16x16xf32>
    %180 = vector.shape_cast %179 : vector<1x16x16xf32> to vector<16x16xf32>
    %181 = arith.addf %178, %180 : vector<16x16xf32>
    %182 = arith.addf %181, %146 : vector<16x16xf32>
    %cst_47 = arith.constant dense<0xFF800000> : vector<16xf32>
    %183 = vector.multi_reduction <maximumf>, %182, %cst_47 [1] : vector<16x16xf32> to vector<16xf32>
    %184 = vector.shape_cast %183 : vector<16xf32> to vector<16x1xf32>
    %185 = vector.broadcast %184 : vector<16x1xf32> to vector<16x16xf32>
    %186 = arith.subf %182, %185 : vector<16x16xf32>
    %187 = math.exp %186 : vector<16x16xf32>
    %cst_48 = arith.constant dense<0.000000e+00> : vector<16xf32>
    %188 = vector.multi_reduction <add>, %187, %cst_48 [1] : vector<16x16xf32> to vector<16xf32>
    %189 = vector.shape_cast %188 : vector<16xf32> to vector<16x1xf32>
    %190 = tpu.reciprocal %189 {approx = true} : vector<16x1xf32> -> vector<16x1xf32>
    %191 = vector.broadcast %190 : vector<16x1xf32> to vector<16x16xf32>
    %192 = arith.mulf %187, %191 : vector<16x16xf32>
    %193 = arith.truncf %192 : vector<16x16xf32> to vector<16x16xbf16>
    %194 = vector.extract_strided_slice %149 {offsets = [0, 32], sizes = [16, 32], strides = [1, 1]} : vector<16x128xf32> to vector<16x32xf32>
    %195 = arith.truncf %194 : vector<16x32xf32> to vector<16x32xbf16>
    %cst_49 = arith.constant dense<0.000000e+00> : vector<16x32xf32>
    %196 = tpu.matmul %193, %195, %cst_49 {dimension_numbers = #tpu.dot_dimension_numbers<[1], [0], [0], [1], [0, 0, 1, 1], [], []>} : vector<16x16xbf16>, vector<16x32xbf16>, vector<16x32xf32> -> vector<16x32xf32>
    %c16_50 = arith.constant 16 : index
    %c32_51 = arith.constant 32 : index
    %197 = vector.load %arg13[%c16_50, %c32_51] : memref<32x128xf32, #tpu.memory_space<vmem>>, vector<16x32xf32>
    tpu.vector_store %arg13[%c16_50, %c32_51], %196 {strides = array<i32>} : memref<32x128xf32, #tpu.memory_space<vmem>>, vector<16x32xf32>,
    %198 = vector.extract_strided_slice %147 {offsets = [0, 64], sizes = [16, 32], strides = [1, 1]} : vector<16x128xf32> to vector<16x32xf32>
    %199 = arith.truncf %198 : vector<16x32xf32> to vector<16x32xbf16>
    %200 = vector.extract_strided_slice %148 {offsets = [0, 64], sizes = [16, 32], strides = [1, 1]} : vector<16x128xf32> to vector<16x32xf32>
    %201 = arith.truncf %200 : vector<16x32xf32> to vector<16x32xbf16>
    %cst_52 = arith.constant dense<0.000000e+00> : vector<16x16xf32>
    %202 = tpu.matmul %199, %201, %cst_52 {dimension_numbers = #tpu.dot_dimension_numbers<[1], [1], [0], [0], [0, 0, 1, 0], [], []>} : vector<16x32xbf16>, vector<16x32xbf16>, vector<16x16xf32> -> vector<16x16xf32>
    %203 = vector.extract_strided_slice %33 {offsets = [2, 0, 0], sizes = [1, 16, 16], strides = [1, 1, 1]} : vector<4x16x16xf32> to vector<1x16x16xf32>
    %204 = vector.shape_cast %203 : vector<1x16x16xf32> to vector<16x16xf32>
    %205 = arith.addf %202, %204 : vector<16x16xf32>
    %206 = arith.addf %205, %146 : vector<16x16xf32>
    %cst_53 = arith.constant dense<0xFF800000> : vector<16xf32>
    %207 = vector.multi_reduction <maximumf>, %206, %cst_53 [1] : vector<16x16xf32> to vector<16xf32>
    %208 = vector.shape_cast %207 : vector<16xf32> to vector<16x1xf32>
    %209 = vector.broadcast %208 : vector<16x1xf32> to vector<16x16xf32>
    %210 = arith.subf %206, %209 : vector<16x16xf32>
    %211 = math.exp %210 : vector<16x16xf32>
    %cst_54 = arith.constant dense<0.000000e+00> : vector<16xf32>
    %212 = vector.multi_reduction <add>, %211, %cst_54 [1] : vector<16x16xf32> to vector<16xf32>
    %213 = vector.shape_cast %212 : vector<16xf32> to vector<16x1xf32>
    %214 = tpu.reciprocal %213 {approx = true} : vector<16x1xf32> -> vector<16x1xf32>
    %215 = vector.broadcast %214 : vector<16x1xf32> to vector<16x16xf32>
    %216 = arith.mulf %211, %215 : vector<16x16xf32>
    %217 = arith.truncf %216 : vector<16x16xf32> to vector<16x16xbf16>
    %218 = vector.extract_strided_slice %149 {offsets = [0, 64], sizes = [16, 32], strides = [1, 1]} : vector<16x128xf32> to vector<16x32xf32>
    %219 = arith.truncf %218 : vector<16x32xf32> to vector<16x32xbf16>
    %cst_55 = arith.constant dense<0.000000e+00> : vector<16x32xf32>
    %220 = tpu.matmul %217, %219, %cst_55 {dimension_numbers = #tpu.dot_dimension_numbers<[1], [0], [0], [1], [0, 0, 1, 1], [], []>} : vector<16x16xbf16>, vector<16x32xbf16>, vector<16x32xf32> -> vector<16x32xf32>
    %c16_56 = arith.constant 16 : index
    %c64_57 = arith.constant 64 : index
    %221 = vector.load %arg13[%c16_56, %c64_57] : memref<32x128xf32, #tpu.memory_space<vmem>>, vector<16x32xf32>
    tpu.vector_store %arg13[%c16_56, %c64_57], %220 {strides = array<i32>} : memref<32x128xf32, #tpu.memory_space<vmem>>, vector<16x32xf32>,
    %222 = vector.extract_strided_slice %147 {offsets = [0, 96], sizes = [16, 32], strides = [1, 1]} : vector<16x128xf32> to vector<16x32xf32>
    %223 = arith.truncf %222 : vector<16x32xf32> to vector<16x32xbf16>
    %224 = vector.extract_strided_slice %148 {offsets = [0, 96], sizes = [16, 32], strides = [1, 1]} : vector<16x128xf32> to vector<16x32xf32>
    %225 = arith.truncf %224 : vector<16x32xf32> to vector<16x32xbf16>
    %cst_58 = arith.constant dense<0.000000e+00> : vector<16x16xf32>
    %226 = tpu.matmul %223, %225, %cst_58 {dimension_numbers = #tpu.dot_dimension_numbers<[1], [1], [0], [0], [0, 0, 1, 0], [], []>} : vector<16x32xbf16>, vector<16x32xbf16>, vector<16x16xf32> -> vector<16x16xf32>
    %227 = vector.extract_strided_slice %33 {offsets = [3, 0, 0], sizes = [1, 16, 16], strides = [1, 1, 1]} : vector<4x16x16xf32> to vector<1x16x16xf32>
    %228 = vector.shape_cast %227 : vector<1x16x16xf32> to vector<16x16xf32>
    %229 = arith.addf %226, %228 : vector<16x16xf32>
    %230 = arith.addf %229, %146 : vector<16x16xf32>
    %cst_59 = arith.constant dense<0xFF800000> : vector<16xf32>
    %231 = vector.multi_reduction <maximumf>, %230, %cst_59 [1] : vector<16x16xf32> to vector<16xf32>
    %232 = vector.shape_cast %231 : vector<16xf32> to vector<16x1xf32>
    %233 = vector.broadcast %232 : vector<16x1xf32> to vector<16x16xf32>
    %234 = arith.subf %230, %233 : vector<16x16xf32>
    %235 = math.exp %234 : vector<16x16xf32>
    %cst_60 = arith.constant dense<0.000000e+00> : vector<16xf32>
    %236 = vector.multi_reduction <add>, %235, %cst_60 [1] : vector<16x16xf32> to vector<16xf32>
    %237 = vector.shape_cast %236 : vector<16xf32> to vector<16x1xf32>
    %238 = tpu.reciprocal %237 {approx = true} : vector<16x1xf32> -> vector<16x1xf32>
    %239 = vector.broadcast %238 : vector<16x1xf32> to vector<16x16xf32>
    %240 = arith.mulf %235, %239 : vector<16x16xf32>
    %241 = arith.truncf %240 : vector<16x16xf32> to vector<16x16xbf16>
    %242 = vector.extract_strided_slice %149 {offsets = [0, 96], sizes = [16, 32], strides = [1, 1]} : vector<16x128xf32> to vector<16x32xf32>
    %243 = arith.truncf %242 : vector<16x32xf32> to vector<16x32xbf16>
    %cst_61 = arith.constant dense<0.000000e+00> : vector<16x32xf32>
    %244 = tpu.matmul %241, %243, %cst_61 {dimension_numbers = #tpu.dot_dimension_numbers<[1], [0], [0], [1], [0, 0, 1, 1], [], []>} : vector<16x16xbf16>, vector<16x32xbf16>, vector<16x32xf32> -> vector<16x32xf32>
    %c16_62 = arith.constant 16 : index
    %c96_63 = arith.constant 96 : index
    %245 = vector.load %arg13[%c16_62, %c96_63] : memref<32x128xf32, #tpu.memory_space<vmem>>, vector<16x32xf32>
    tpu.vector_store %arg13[%c16_62, %c96_63], %244 {strides = array<i32>} : memref<32x128xf32, #tpu.memory_space<vmem>>, vector<16x32xf32>,
    %c0_64 = arith.constant 0 : index
    %c0_65 = arith.constant 0 : index
    %246 = vector.load %arg13[%c0_64, %c0_65] : memref<32x128xf32, #tpu.memory_space<vmem>>, vector<32x128xf32>
    %247 = arith.truncf %246 : vector<32x128xf32> to vector<32x128xbf16>
    %c0_66 = arith.constant 0 : index
    %c0_67 = arith.constant 0 : index
    %248 = vector.load %arg7[%c0_66, %c0_67] : memref<128x128xbf16, #tpu.memory_space<vmem>>, vector<128x128xbf16>
    %cst_68 = arith.constant dense<0.000000e+00> : vector<32x128xf32>
    %249 = tpu.matmul %247, %248, %cst_68 {dimension_numbers = #tpu.dot_dimension_numbers<[1], [0], [0], [1], [0, 0, 1, 1], [], []>} : vector<32x128xbf16>, vector<128x128xbf16>, vector<32x128xf32> -> vector<32x128xf32>
    %250 = arith.addf %8, %249 : vector<32x128xf32>
    %c0_69 = arith.constant 0 : index
    %c0_70 = arith.constant 0 : index
    %251 = vector.load %arg8[%c0_69, %c0_70] : memref<1x128xf32, #tpu.memory_space<vmem>>, vector<1x128xf32>
    %252 = arith.mulf %250, %250 : vector<32x128xf32>
    %cst_71 = arith.constant dense<0.000000e+00> : vector<32xf32>
    %253 = vector.multi_reduction <add>, %252, %cst_71 [1] : vector<32x128xf32> to vector<32xf32>
    %254 = vector.shape_cast %253 : vector<32xf32> to vector<32x1xf32>
    %cst_72 = arith.constant 1.280000e+02 : f32
    %255 = vector.broadcast %cst_72 : f32 to vector<32x1xf32>
    %256 = arith.divf %254, %255 : vector<32x1xf32>
    %cst_73 = arith.constant 9.99999997E-7 : f32
    %257 = vector.broadcast %cst_73 : f32 to vector<32x1xf32>
    %258 = arith.addf %256, %257 : vector<32x1xf32>
    %259 = math.rsqrt %258 : vector<32x1xf32>
    %260 = vector.broadcast %259 : vector<32x1xf32> to vector<32x128xf32>
    %261 = arith.mulf %250, %260 : vector<32x128xf32>
    %262 = vector.broadcast %251 : vector<1x128xf32> to vector<32x128xf32>
    %263 = arith.mulf %261, %262 : vector<32x128xf32>
    %264 = arith.truncf %263 : vector<32x128xf32> to vector<32x128xbf16>
    %c0_74 = arith.constant 0 : index
    %c0_75 = arith.constant 0 : index
    %265 = vector.load %arg9[%c0_74, %c0_75] : memref<128x256xbf16, #tpu.memory_space<vmem>>, vector<128x256xbf16>
    %cst_76 = arith.constant dense<0.000000e+00> : vector<32x256xf32>
    %266 = tpu.matmul %264, %265, %cst_76 {dimension_numbers = #tpu.dot_dimension_numbers<[1], [0], [0], [1], [0, 0, 1, 1], [], []>} : vector<32x128xbf16>, vector<128x256xbf16>, vector<32x256xf32> -> vector<32x256xf32>
    %cst_77 = arith.constant 0.000000e+00 : f32
    %267 = vector.broadcast %cst_77 : f32 to vector<32x256xf32>
    %268 = arith.maximumf %266, %267 : vector<32x256xf32>
    %269 = arith.truncf %268 : vector<32x256xf32> to vector<32x256xbf16>
    %c0_78 = arith.constant 0 : index
    %c0_79 = arith.constant 0 : index
    %270 = vector.load %arg10[%c0_78, %c0_79] : memref<256x128xbf16, #tpu.memory_space<vmem>>, vector<256x128xbf16>
    %cst_80 = arith.constant dense<0.000000e+00> : vector<32x128xf32>
    %271 = tpu.matmul %269, %270, %cst_80 {dimension_numbers = #tpu.dot_dimension_numbers<[1], [0], [0], [1], [0, 0, 1, 1], [], []>} : vector<32x256xbf16>, vector<256x128xbf16>, vector<32x128xf32> -> vector<32x128xf32>
    %272 = arith.addf %250, %271 : vector<32x128xf32>
    %c0_81 = arith.constant 0 : index
    %c0_82 = arith.constant 0 : index
    %273 = vector.load %arg11[%c0_81, %c0_82] : memref<1x128xf32, #tpu.memory_space<vmem>>, vector<1x128xf32>
    %274 = arith.mulf %272, %272 : vector<32x128xf32>
    %cst_83 = arith.constant dense<0.000000e+00> : vector<32xf32>
    %275 = vector.multi_reduction <add>, %274, %cst_83 [1] : vector<32x128xf32> to vector<32xf32>
    %276 = vector.shape_cast %275 : vector<32xf32> to vector<32x1xf32>
    %cst_84 = arith.constant 1.280000e+02 : f32
    %277 = vector.broadcast %cst_84 : f32 to vector<32x1xf32>
    %278 = arith.divf %276, %277 : vector<32x1xf32>
    %cst_85 = arith.constant 9.99999997E-7 : f32
    %279 = vector.broadcast %cst_85 : f32 to vector<32x1xf32>
    %280 = arith.addf %278, %279 : vector<32x1xf32>
    %281 = math.rsqrt %280 : vector<32x1xf32>
    %282 = vector.broadcast %281 : vector<32x1xf32> to vector<32x128xf32>
    %283 = arith.mulf %272, %282 : vector<32x128xf32>
    %284 = vector.broadcast %273 : vector<1x128xf32> to vector<32x128xf32>
    %285 = arith.mulf %283, %284 : vector<32x128xf32>
    %c0_86 = arith.constant 0 : index
    %c0_87 = arith.constant 0 : index
    %286 = vector.load %arg12[%c0_86, %c0_87] : memref<32x128xf32, #tpu.memory_space<vmem>>, vector<32x128xf32>
    tpu.vector_store %arg12[%c0_86, %c0_87], %285 {strides = array<i32>} : memref<32x128xf32, #tpu.memory_space<vmem>>, vector<32x128xf32>,
    return
  }
  func.func @transform_0(%arg0: i32) -> (i32, i32) {
    %c0_i32 = arith.constant 0 : i32
    %c0_i32_0 = arith.constant 0 : i32
    %c0_i32_1 = arith.constant 0 : i32
    return %c0_i32, %c0_i32_0 : i32, i32
  }
  func.func @transform_1(%arg0: i32) -> (i32, i32) {
    %c0_i32 = arith.constant 0 : i32
    %c0_i32_0 = arith.constant 0 : i32
    %c0_i32_1 = arith.constant 0 : i32
    return %c0_i32, %c0_i32_0 : i32, i32
  }
  func.func @transform_2(%arg0: i32) -> (i32, i32) {
    %c0_i32 = arith.constant 0 : i32
    %c0_i32_0 = arith.constant 0 : i32
    %c0_i32_1 = arith.constant 0 : i32
    return %c0_i32, %c0_i32_0 : i32, i32
  }
  func.func @transform_3(%arg0: i32) -> (i32, i32, i32) {
    %c0_i32 = arith.constant 0 : i32
    %c0_i32_0 = arith.constant 0 : i32
    %c0_i32_1 = arith.constant 0 : i32
    %c0_i32_2 = arith.constant 0 : i32
    return %c0_i32, %c0_i32_0, %c0_i32_1 : i32, i32, i32
  }
  func.func @transform_4(%arg0: i32) -> (i32, i32) {
    %c0_i32 = arith.constant 0 : i32
    %c0_i32_0 = arith.constant 0 : i32
    %c0_i32_1 = arith.constant 0 : i32
    return %c0_i32, %c0_i32_0 : i32, i32
  }
  func.func @transform_5(%arg0: i32) -> (i32, i32) {
    %c0_i32 = arith.constant 0 : i32
    %c0_i32_0 = arith.constant 0 : i32
    %c0_i32_1 = arith.constant 0 : i32
    return %c0_i32, %c0_i32_0 : i32, i32
  }
  func.func @transform_6(%arg0: i32) -> (i32, i32) {
    %c0_i32 = arith.constant 0 : i32
    %c0_i32_0 = arith.constant 0 : i32
    %c0_i32_1 = arith.constant 0 : i32
    return %c0_i32, %c0_i32_0 : i32, i32
  }
  func.func @transform_7(%arg0: i32) -> (i32, i32) {
    %c0_i32 = arith.constant 0 : i32
    %c0_i32_0 = arith.constant 0 : i32
    %c0_i32_1 = arith.constant 0 : i32
    return %c0_i32, %c0_i32_0 : i32, i32
  }
  func.func @transform_8(%arg0: i32) -> (i32, i32) {
    %c0_i32 = arith.constant 0 : i32
    %c0_i32_0 = arith.constant 0 : i32
    %c0_i32_1 = arith.constant 0 : i32
    return %c0_i32, %c0_i32_0 : i32, i32
  }
  func.func @transform_9(%arg0: i32) -> (i32, i32) {
    %c0_i32 = arith.constant 0 : i32
    %c0_i32_0 = arith.constant 0 : i32
    %c0_i32_1 = arith.constant 0 : i32
    return %c0_i32, %c0_i32_0 : i32, i32
  }
  func.func @transform_10(%arg0: i32) -> (i32, i32) {
    %c0_i32 = arith.constant 0 : i32
    %c0_i32_0 = arith.constant 0 : i32
    %c0_i32_1 = arith.constant 0 : i32
    return %c0_i32, %c0_i32_0 : i32, i32
  }
  func.func @transform_11(%arg0: i32) -> (i32, i32) {
    %c0_i32 = arith.constant 0 : i32
    %c0_i32_0 = arith.constant 0 : i32
    %c0_i32_1 = arith.constant 0 : i32
    return %c0_i32, %c0_i32_0 : i32, i32
  }
}

module attributes {stable_mosaic.version = 11 : i64} {
  func.func @_head_ce_kernel(%arg0: i32, %arg1: memref<16x128xf32, #tpu.memory_space<vmem>>, %arg2: memref<384x128xbf16, #tpu.memory_space<vmem>>, %arg3: memref<16x1xi32, #tpu.memory_space<vmem>>, %arg4: memref<1x128xf32, #tpu.memory_space<vmem>>, %arg5: memref<1x128xf32, #tpu.memory_space<vmem>>) attributes {dimension_semantics = [#tpu.dimension_semantics<parallel>], iteration_bounds = array<i64: 1>, scalar_prefetch = 0 : i64, scratch_operands = 0 : i64, tpu.core_type = #tpu.core_type<tc>, window_params = [{transform_indices = @transform_0, window_bounds = array<i64: 16, 128>}, {pipeline_mode = #tpu.pipeline_mode<synchronous>, transform_indices = @transform_1, window_bounds = array<i64: 384, 128>}, {transform_indices = @transform_2, window_bounds = array<i64: 16, 1>}, {transform_indices = @transform_3, window_bounds = array<i64: 1, 128>}, {transform_indices = @transform_4, window_bounds = array<i64: 1, 128>}]} {
    %c0 = arith.constant 0 : index
    %c0_0 = arith.constant 0 : index
    %0 = vector.load %arg1[%c0, %c0_0] : memref<16x128xf32, #tpu.memory_space<vmem>>, vector<16x128xf32>
    %cst = arith.constant 0.0883883461 : f32
    %1 = vector.broadcast %cst : f32 to vector<16x128xf32>
    %2 = arith.mulf %0, %1 : vector<16x128xf32>
    %3 = arith.truncf %2 : vector<16x128xf32> to vector<16x128xbf16>
    %c0_1 = arith.constant 0 : index
    %c0_2 = arith.constant 0 : index
    %4 = vector.load %arg2[%c0_1, %c0_2] : memref<384x128xbf16, #tpu.memory_space<vmem>>, vector<384x128xbf16>
    %cst_3 = arith.constant dense<0.000000e+00> : vector<16x384xf32>
    %5 = tpu.matmul %3, %4, %cst_3 {dimension_numbers = #tpu.dot_dimension_numbers<[1], [1], [0], [0], [0, 0, 1, 0], [], []>} : vector<16x128xbf16>, vector<384x128xbf16>, vector<16x384xf32> -> vector<16x384xf32>
    %c0_4 = arith.constant 0 : index
    %c0_5 = arith.constant 0 : index
    %6 = vector.load %arg3[%c0_4, %c0_5] : memref<16x1xi32, #tpu.memory_space<vmem>>, vector<16x1xi32>
    %cst_6 = arith.constant dense<0xFF800000> : vector<16xf32>
    %7 = vector.multi_reduction <maximumf>, %5, %cst_6 [1] : vector<16x384xf32> to vector<16xf32>
    %8 = vector.shape_cast %7 : vector<16xf32> to vector<16x1xf32>
    %9 = vector.broadcast %8 : vector<16x1xf32> to vector<16x384xf32>
    %10 = arith.subf %5, %9 : vector<16x384xf32>
    %11 = math.exp %10 : vector<16x384xf32>
    %cst_7 = arith.constant dense<0.000000e+00> : vector<16xf32>
    %12 = vector.multi_reduction <add>, %11, %cst_7 [1] : vector<16x384xf32> to vector<16xf32>
    %13 = vector.shape_cast %12 : vector<16xf32> to vector<16x1xf32>
    %14 = math.log %13 : vector<16x1xf32>
    %15 = arith.addf %14, %8 : vector<16x1xf32>
    %16 = tpu.iota {dimensions = array<i32: 1>} : vector<16x384xi32>
    %17 = vector.broadcast %6 : vector<16x1xi32> to vector<16x384xi32>
    %18 = arith.cmpi eq, %16, %17 : vector<16x384xi32>
    %19 = arith.extui %18 : vector<16x384xi1> to vector<16x384xi32>
    %20 = arith.sitofp %19 : vector<16x384xi32> to vector<16x384xf32>
    %21 = arith.mulf %20, %5 : vector<16x384xf32>
    %cst_8 = arith.constant dense<0.000000e+00> : vector<16xf32>
    %22 = vector.multi_reduction <add>, %21, %cst_8 [1] : vector<16x384xf32> to vector<16xf32>
    %23 = vector.shape_cast %22 : vector<16xf32> to vector<16x1xf32>
    %c-100_i32 = arith.constant -100 : i32
    %24 = vector.broadcast %c-100_i32 : i32 to vector<16x1xi32>
    %25 = arith.cmpi ne, %6, %24 : vector<16x1xi32>
    %26 = arith.extui %25 : vector<16x1xi1> to vector<16x1xi32>
    %27 = arith.sitofp %26 : vector<16x1xi32> to vector<16x1xf32>
    %28 = arith.subf %15, %23 : vector<16x1xf32>
    %29 = arith.mulf %28, %27 : vector<16x1xf32>
    %cst_9 = arith.constant dense<0.000000e+00> : vector<1xf32>
    %30 = vector.multi_reduction <add>, %29, %cst_9 [0] : vector<16x1xf32> to vector<1xf32>
    %31 = vector.shape_cast %30 : vector<1xf32> to vector<1x1xf32>
    %32 = vector.shape_cast %31 : vector<1x1xf32> to vector<1x1xf32>
    %33 = vector.broadcast %32 : vector<1x1xf32> to vector<1x128xf32>
    %c0_10 = arith.constant 0 : index
    %c0_11 = arith.constant 0 : index
    %34 = vector.load %arg4[%c0_10, %c0_11] : memref<1x128xf32, #tpu.memory_space<vmem>>, vector<1x128xf32>
    tpu.vector_store %arg4[%c0_10, %c0_11], %33 {strides = array<i32>} : memref<1x128xf32, #tpu.memory_space<vmem>>, vector<1x128xf32>,
    %cst_12 = arith.constant dense<0.000000e+00> : vector<1xf32>
    %35 = vector.multi_reduction <add>, %27, %cst_12 [0] : vector<16x1xf32> to vector<1xf32>
    %36 = vector.shape_cast %35 : vector<1xf32> to vector<1x1xf32>
    %37 = vector.shape_cast %36 : vector<1x1xf32> to vector<1x1xf32>
    %38 = vector.broadcast %37 : vector<1x1xf32> to vector<1x128xf32>
    %c0_13 = arith.constant 0 : index
    %c0_14 = arith.constant 0 : index
    %39 = vector.load %arg5[%c0_13, %c0_14] : memref<1x128xf32, #tpu.memory_space<vmem>>, vector<1x128xf32>
    tpu.vector_store %arg5[%c0_13, %c0_14], %38 {strides = array<i32>} : memref<1x128xf32, #tpu.memory_space<vmem>>, vector<1x128xf32>,
    return
  }
  func.func @transform_0(%arg0: i32) -> (i32, i32) {
    %c0_i32 = arith.constant 0 : i32
    %c0_i32_0 = arith.constant 0 : i32
    return %arg0, %c0_i32 : i32, i32
  }
  func.func @transform_1(%arg0: i32) -> (i32, i32) {
    %c0_i32 = arith.constant 0 : i32
    %c0_i32_0 = arith.constant 0 : i32
    %c0_i32_1 = arith.constant 0 : i32
    return %c0_i32, %c0_i32_0 : i32, i32
  }
  func.func @transform_2(%arg0: i32) -> (i32, i32) {
    %c0_i32 = arith.constant 0 : i32
    %c0_i32_0 = arith.constant 0 : i32
    return %arg0, %c0_i32 : i32, i32
  }
  func.func @transform_3(%arg0: i32) -> (i32, i32) {
    %c0_i32 = arith.constant 0 : i32
    %c0_i32_0 = arith.constant 0 : i32
    return %c0_i32, %arg0 : i32, i32
  }
  func.func @transform_4(%arg0: i32) -> (i32, i32) {
    %c0_i32 = arith.constant 0 : i32
    %c0_i32_0 = arith.constant 0 : i32
    return %c0_i32, %arg0 : i32, i32
  }
}

module attributes {stable_mosaic.version = 11 : i64} {
  func.func @_decoder_kernel(%arg0: i32, %arg1: memref<16x1xi32, #tpu.memory_space<vmem>>, %arg2: memref<2x8xi32, #tpu.memory_space<vmem>>, %arg3: memref<2x16xi32, #tpu.memory_space<vmem>>, %arg4: memref<32x128xf32, #tpu.memory_space<vmem>>, %arg5: memref<384x128xbf16, #tpu.memory_space<vmem>>, %arg6: memref<4x8x8xf32, #tpu.memory_space<vmem>>, %arg7: memref<1x128xf32, #tpu.memory_space<vmem>>, %arg8: memref<128x384xbf16, #tpu.memory_space<vmem>>, %arg9: memref<128x128xbf16, #tpu.memory_space<vmem>>, %arg10: memref<1x128xf32, #tpu.memory_space<vmem>>, %arg11: memref<128x384xbf16, #tpu.memory_space<vmem>>, %arg12: memref<128x128xbf16, #tpu.memory_space<vmem>>, %arg13: memref<1x128xf32, #tpu.memory_space<vmem>>, %arg14: memref<128x256xbf16, #tpu.memory_space<vmem>>, %arg15: memref<256x128xbf16, #tpu.memory_space<vmem>>, %arg16: memref<1x128xf32, #tpu.memory_space<vmem>>, %arg17: memref<16x128xf32, #tpu.memory_space<vmem>>, %arg18: memref<16x128xf32, #tpu.memory_space<vmem>>) attributes {dimension_semantics = [#tpu.dimension_semantics<arbitrary>], iteration_bounds = array<i64: 1>, scalar_prefetch = 0 : i64, scratch_operands = 1 : i64, tpu.core_type = #tpu.core_type<tc>, window_params = [{pipeline_mode = #tpu.pipeline_mode<synchronous>, transform_indices = @transform_0, window_bounds = array<i64: 16, 1>}, {pipeline_mode = #tpu.pipeline_mode<synchronous>, transform_indices = @transform_1, window_bounds = array<i64: 2, 8>}, {pipeline_mode = #tpu.pipeline_mode<synchronous>, transform_indices = @transform_2, window_bounds = array<i64: 2, 16>}, {pipeline_mode = #tpu.pipeline_mode<synchronous>, transform_indices = @transform_3, window_bounds = array<i64: 32, 128>}, {pipeline_mode = #tpu.pipeline_mode<synchronous>, transform_indices = @transform_4, window_bounds = array<i64: 384, 128>}, {pipeline_mode = #tpu.pipeline_mode<synchronous>, transform_indices = @transform_5, window_bounds = array<i64: 4, 8, 8>}, {pipeline_mode = #tpu.pipeline_mode<synchronous>, transform_indices = @transform_6, window_bounds = array<i64: 1, 128>}, {pipeline_mode = #tpu.pipeline_mode<synchronous>, transform_indices = @transform_7, window_bounds = array<i64: 128, 384>}, {pipeline_mode = #tpu.pipeline_mode<synchronous>, transform_indices = @transform_8, window_bounds = array<i64: 128, 128>}, {pipeline_mode = #tpu.pipeline_mode<synchronous>, transform_indices = @transform_9, window_bounds = array<i64: 1, 128>}, {pipeline_mode = #tpu.pipeline_mode<synchronous>, transform_indices = @transform_10, window_bounds = array<i64: 128, 384>}, {pipeline_mode = #tpu.pipeline_mode<synchronous>, transform_indices = @transform_11, window_bounds = array<i64: 128, 128>}, {pipeline_mode = #tpu.pipeline_mode<synchronous>, transform_indices = @transform_12, window_bounds = array<i64: 1, 128>}, {pipeline_mode = #tpu.pipeline_mode<synchronous>, transform_indices = @transform_13, window_bounds = array<i64: 128, 256>}, {pipeline_mode = #tpu.pipeline_mode<synchronous>, transform_indices = @transform_14, window_bounds = array<i64: 256, 128>}, {pipeline_mode = #tpu.pipeline_mode<synchronous>, transform_indices = @transform_15, window_bounds = array<i64: 1, 128>}, {pipeline_mode = #tpu.pipeline_mode<synchronous>, transform_indices = @transform_16, window_bounds = array<i64: 16, 128>}]} {
    %c0 = arith.constant 0 : index
    %c0_0 = arith.constant 0 : index
    %0 = vector.load %arg1[%c0, %c0_0] : memref<16x1xi32, #tpu.memory_space<vmem>>, vector<16x1xi32>
    %1 = tpu.iota {dimensions = array<i32: 1>} : vector<16x384xi32>
    %2 = vector.broadcast %0 : vector<16x1xi32> to vector<16x384xi32>
    %3 = arith.cmpi eq, %1, %2 : vector<16x384xi32>
    %4 = arith.extui %3 : vector<16x384xi1> to vector<16x384xi32>
    %5 = arith.sitofp %4 : vector<16x384xi32> to vector<16x384xf32>
    %6 = arith.truncf %5 : vector<16x384xf32> to vector<16x384xbf16>
    %c0_1 = arith.constant 0 : index
    %c0_2 = arith.constant 0 : index
    %7 = vector.load %arg5[%c0_1, %c0_2] : memref<384x128xbf16, #tpu.memory_space<vmem>>, vector<384x128xbf16>
    %cst = arith.constant dense<0.000000e+00> : vector<16x128xf32>
    %8 = tpu.matmul %6, %7, %cst {dimension_numbers = #tpu.dot_dimension_numbers<[1], [0], [0], [1], [0, 0, 1, 1], [], []>} : vector<16x384xbf16>, vector<384x128xbf16>, vector<16x128xf32> -> vector<16x128xf32>
    %c0_3 = arith.constant 0 : index
    %c0_4 = arith.constant 0 : index
    %9 = vector.load %arg2[%c0_3, %c0_4] : memref<2x8xi32, #tpu.memory_space<vmem>>, vector<2x8xi32>
    %c0_i32 = arith.constant 0 : i32
    %10 = vector.broadcast %c0_i32 : i32 to vector<2x8xi32>
    %11 = arith.cmpi ne, %9, %10 : vector<2x8xi32>
    %12 = arith.extui %11 : vector<2x8xi1> to vector<2x8xi32>
    %13 = arith.sitofp %12 : vector<2x8xi32> to vector<2x8xf32>
    %c0_5 = arith.constant 0 : index
    %c0_6 = arith.constant 0 : index
    %14 = vector.load %arg3[%c0_5, %c0_6] : memref<2x16xi32, #tpu.memory_space<vmem>>, vector<2x16xi32>
    %c0_i32_7 = arith.constant 0 : i32
    %15 = vector.broadcast %c0_i32_7 : i32 to vector<2x16xi32>
    %16 = arith.cmpi ne, %14, %15 : vector<2x16xi32>
    %17 = arith.extui %16 : vector<2x16xi1> to vector<2x16xi32>
    %18 = arith.sitofp %17 : vector<2x16xi32> to vector<2x16xf32>
    %c0_8 = arith.constant 0 : index
    %c0_9 = arith.constant 0 : index
    %19 = vector.load %arg7[%c0_8, %c0_9] : memref<1x128xf32, #tpu.memory_space<vmem>>, vector<1x128xf32>
    %20 = arith.mulf %8, %8 : vector<16x128xf32>
    %cst_10 = arith.constant dense<0.000000e+00> : vector<16xf32>
    %21 = vector.multi_reduction <add>, %20, %cst_10 [1] : vector<16x128xf32> to vector<16xf32>
    %22 = vector.shape_cast %21 : vector<16xf32> to vector<16x1xf32>
    %cst_11 = arith.constant 1.280000e+02 : f32
    %23 = vector.broadcast %cst_11 : f32 to vector<16x1xf32>
    %24 = arith.divf %22, %23 : vector<16x1xf32>
    %cst_12 = arith.constant 9.99999997E-7 : f32
    %25 = vector.broadcast %cst_12 : f32 to vector<16x1xf32>
    %26 = arith.addf %24, %25 : vector<16x1xf32>
    %27 = math.rsqrt %26 : vector<16x1xf32>
    %28 = vector.broadcast %27 : vector<16x1xf32> to vector<16x128xf32>
    %29 = arith.mulf %8, %28 : vector<16x128xf32>
    %30 = vector.broadcast %19 : vector<1x128xf32> to vector<16x128xf32>
    %31 = arith.mulf %29, %30 : vector<16x128xf32>
    %32 = arith.truncf %31 : vector<16x128xf32> to vector<16x128xbf16>
    %c0_13 = arith.constant 0 : index
    %c0_14 = arith.constant 0 : index
    %33 = vector.load %arg8[%c0_13, %c0_14] : memref<128x384xbf16, #tpu.memory_space<vmem>>, vector<128x384xbf16>
    %cst_15 = arith.constant dense<0.000000e+00> : vector<16x384xf32>
    %34 = tpu.matmul %32, %33, %cst_15 {dimension_numbers = #tpu.dot_dimension_numbers<[1], [0], [0], [1], [0, 0, 1, 1], [], []>} : vector<16x128xbf16>, vector<128x384xbf16>, vector<16x384xf32> -> vector<16x384xf32>
    %35 = vector.extract_strided_slice %34 {offsets = [0, 0], sizes = [16, 128], strides = [1, 1]} : vector<16x384xf32> to vector<16x128xf32>
    %36 = vector.extract_strided_slice %34 {offsets = [0, 128], sizes = [16, 128], strides = [1, 1]} : vector<16x384xf32> to vector<16x128xf32>
    %37 = vector.extract_strided_slice %34 {offsets = [0, 256], sizes = [16, 128], strides = [1, 1]} : vector<16x384xf32> to vector<16x128xf32>
    %c0_16 = arith.constant 0 : index
    %c0_17 = arith.constant 0 : index
    %c0_18 = arith.constant 0 : index
    %38 = vector.load %arg6[%c0_16, %c0_17, %c0_18] : memref<4x8x8xf32, #tpu.memory_space<vmem>>, vector<4x8x8xf32>
    %39 = tpu.iota {dimensions = array<i32: 0>} : vector<8x8xi32>
    %40 = tpu.iota {dimensions = array<i32: 1>} : vector<8x8xi32>
    %41 = arith.cmpi sle, %40, %39 : vector<8x8xi32>
    %42 = arith.extui %41 : vector<8x8xi1> to vector<8x8xi32>
    %43 = arith.sitofp %42 : vector<8x8xi32> to vector<8x8xf32>
    %44 = vector.extract_strided_slice %13 {offsets = [0, 0], sizes = [1, 8], strides = [1, 1]} : vector<2x8xf32> to vector<1x8xf32>
    %45 = vector.shape_cast %44 : vector<1x8xf32> to vector<1x8xf32>
    %46 = vector.broadcast %45 : vector<1x8xf32> to vector<8x8xf32>
    %47 = arith.mulf %46, %43 : vector<8x8xf32>
    %cst_19 = arith.constant 1.000000e+00 : f32
    %48 = vector.broadcast %cst_19 : f32 to vector<8x8xf32>
    %49 = arith.subf %48, %47 : vector<8x8xf32>
    %cst_20 = arith.constant -1.000000e+09 : f32
    %50 = vector.broadcast %cst_20 : f32 to vector<8x8xf32>
    %51 = arith.mulf %49, %50 : vector<8x8xf32>
    %52 = vector.extract_strided_slice %35 {offsets = [0, 0], sizes = [8, 128], strides = [1, 1]} : vector<16x128xf32> to vector<8x128xf32>
    %53 = vector.extract_strided_slice %36 {offsets = [0, 0], sizes = [8, 128], strides = [1, 1]} : vector<16x128xf32> to vector<8x128xf32>
    %54 = vector.extract_strided_slice %37 {offsets = [0, 0], sizes = [8, 128], strides = [1, 1]} : vector<16x128xf32> to vector<8x128xf32>
    %55 = vector.extract_strided_slice %52 {offsets = [0, 0], sizes = [8, 32], strides = [1, 1]} : vector<8x128xf32> to vector<8x32xf32>
    %56 = arith.truncf %55 : vector<8x32xf32> to vector<8x32xbf16>
    %57 = vector.extract_strided_slice %53 {offsets = [0, 0], sizes = [8, 32], strides = [1, 1]} : vector<8x128xf32> to vector<8x32xf32>
    %58 = arith.truncf %57 : vector<8x32xf32> to vector<8x32xbf16>
    %cst_21 = arith.constant dense<0.000000e+00> : vector<8x8xf32>
    %59 = tpu.matmul %56, %58, %cst_21 {dimension_numbers = #tpu.dot_dimension_numbers<[1], [1], [0], [0], [0, 0, 1, 0], [], []>} : vector<8x32xbf16>, vector<8x32xbf16>, vector<8x8xf32> -> vector<8x8xf32>
    %60 = vector.extract_strided_slice %38 {offsets = [0, 0, 0], sizes = [1, 8, 8], strides = [1, 1, 1]} : vector<4x8x8xf32> to vector<1x8x8xf32>
    %61 = vector.shape_cast %60 : vector<1x8x8xf32> to vector<8x8xf32>
    %62 = arith.addf %59, %61 : vector<8x8xf32>
    %63 = arith.addf %62, %51 : vector<8x8xf32>
    %cst_22 = arith.constant dense<0xFF800000> : vector<8xf32>
    %64 = vector.multi_reduction <maximumf>, %63, %cst_22 [1] : vector<8x8xf32> to vector<8xf32>
    %65 = vector.shape_cast %64 : vector<8xf32> to vector<8x1xf32>
    %66 = vector.broadcast %65 : vector<8x1xf32> to vector<8x8xf32>
    %67 = arith.subf %63, %66 : vector<8x8xf32>
    %68 = math.exp %67 : vector<8x8xf32>
    %cst_23 = arith.constant dense<0.000000e+00> : vector<8xf32>
    %69 = vector.multi_reduction <add>, %68, %cst_23 [1] : vector<8x8xf32> to vector<8xf32>
    %70 = vector.shape_cast %69 : vector<8xf32> to vector<8x1xf32>
    %71 = tpu.reciprocal %70 {approx = true} : vector<8x1xf32> -> vector<8x1xf32>
    %72 = vector.broadcast %71 : vector<8x1xf32> to vector<8x8xf32>
    %73 = arith.mulf %68, %72 : vector<8x8xf32>
    %74 = arith.truncf %73 : vector<8x8xf32> to vector<8x8xbf16>
    %75 = vector.extract_strided_slice %54 {offsets = [0, 0], sizes = [8, 32], strides = [1, 1]} : vector<8x128xf32> to vector<8x32xf32>
    %76 = arith.truncf %75 : vector<8x32xf32> to vector<8x32xbf16>
    %cst_24 = arith.constant dense<0.000000e+00> : vector<8x32xf32>
    %77 = tpu.matmul %74, %76, %cst_24 {dimension_numbers = #tpu.dot_dimension_numbers<[1], [0], [0], [1], [0, 0, 1, 1], [], []>} : vector<8x8xbf16>, vector<8x32xbf16>, vector<8x32xf32> -> vector<8x32xf32>
    %c0_25 = arith.constant 0 : index
    %c0_26 = arith.constant 0 : index
    %78 = vector.load %arg18[%c0_25, %c0_26] : memref<16x128xf32, #tpu.memory_space<vmem>>, vector<8x32xf32>
    tpu.vector_store %arg18[%c0_25, %c0_26], %77 {strides = array<i32>} : memref<16x128xf32, #tpu.memory_space<vmem>>, vector<8x32xf32>,
    %79 = vector.extract_strided_slice %52 {offsets = [0, 32], sizes = [8, 32], strides = [1, 1]} : vector<8x128xf32> to vector<8x32xf32>
    %80 = arith.truncf %79 : vector<8x32xf32> to vector<8x32xbf16>
    %81 = vector.extract_strided_slice %53 {offsets = [0, 32], sizes = [8, 32], strides = [1, 1]} : vector<8x128xf32> to vector<8x32xf32>
    %82 = arith.truncf %81 : vector<8x32xf32> to vector<8x32xbf16>
    %cst_27 = arith.constant dense<0.000000e+00> : vector<8x8xf32>
    %83 = tpu.matmul %80, %82, %cst_27 {dimension_numbers = #tpu.dot_dimension_numbers<[1], [1], [0], [0], [0, 0, 1, 0], [], []>} : vector<8x32xbf16>, vector<8x32xbf16>, vector<8x8xf32> -> vector<8x8xf32>
    %84 = vector.extract_strided_slice %38 {offsets = [1, 0, 0], sizes = [1, 8, 8], strides = [1, 1, 1]} : vector<4x8x8xf32> to vector<1x8x8xf32>
    %85 = vector.shape_cast %84 : vector<1x8x8xf32> to vector<8x8xf32>
    %86 = arith.addf %83, %85 : vector<8x8xf32>
    %87 = arith.addf %86, %51 : vector<8x8xf32>
    %cst_28 = arith.constant dense<0xFF800000> : vector<8xf32>
    %88 = vector.multi_reduction <maximumf>, %87, %cst_28 [1] : vector<8x8xf32> to vector<8xf32>
    %89 = vector.shape_cast %88 : vector<8xf32> to vector<8x1xf32>
    %90 = vector.broadcast %89 : vector<8x1xf32> to vector<8x8xf32>
    %91 = arith.subf %87, %90 : vector<8x8xf32>
    %92 = math.exp %91 : vector<8x8xf32>
    %cst_29 = arith.constant dense<0.000000e+00> : vector<8xf32>
    %93 = vector.multi_reduction <add>, %92, %cst_29 [1] : vector<8x8xf32> to vector<8xf32>
    %94 = vector.shape_cast %93 : vector<8xf32> to vector<8x1xf32>
    %95 = tpu.reciprocal %94 {approx = true} : vector<8x1xf32> -> vector<8x1xf32>
    %96 = vector.broadcast %95 : vector<8x1xf32> to vector<8x8xf32>
    %97 = arith.mulf %92, %96 : vector<8x8xf32>
    %98 = arith.truncf %97 : vector<8x8xf32> to vector<8x8xbf16>
    %99 = vector.extract_strided_slice %54 {offsets = [0, 32], sizes = [8, 32], strides = [1, 1]} : vector<8x128xf32> to vector<8x32xf32>
    %100 = arith.truncf %99 : vector<8x32xf32> to vector<8x32xbf16>
    %cst_30 = arith.constant dense<0.000000e+00> : vector<8x32xf32>
    %101 = tpu.matmul %98, %100, %cst_30 {dimension_numbers = #tpu.dot_dimension_numbers<[1], [0], [0], [1], [0, 0, 1, 1], [], []>} : vector<8x8xbf16>, vector<8x32xbf16>, vector<8x32xf32> -> vector<8x32xf32>
    %c0_31 = arith.constant 0 : index
    %c32 = arith.constant 32 : index
    %102 = vector.load %arg18[%c0_31, %c32] : memref<16x128xf32, #tpu.memory_space<vmem>>, vector<8x32xf32>
    tpu.vector_store %arg18[%c0_31, %c32], %101 {strides = array<i32>} : memref<16x128xf32, #tpu.memory_space<vmem>>, vector<8x32xf32>,
    %103 = vector.extract_strided_slice %52 {offsets = [0, 64], sizes = [8, 32], strides = [1, 1]} : vector<8x128xf32> to vector<8x32xf32>
    %104 = arith.truncf %103 : vector<8x32xf32> to vector<8x32xbf16>
    %105 = vector.extract_strided_slice %53 {offsets = [0, 64], sizes = [8, 32], strides = [1, 1]} : vector<8x128xf32> to vector<8x32xf32>
    %106 = arith.truncf %105 : vector<8x32xf32> to vector<8x32xbf16>
    %cst_32 = arith.constant dense<0.000000e+00> : vector<8x8xf32>
    %107 = tpu.matmul %104, %106, %cst_32 {dimension_numbers = #tpu.dot_dimension_numbers<[1], [1], [0], [0], [0, 0, 1, 0], [], []>} : vector<8x32xbf16>, vector<8x32xbf16>, vector<8x8xf32> -> vector<8x8xf32>
    %108 = vector.extract_strided_slice %38 {offsets = [2, 0, 0], sizes = [1, 8, 8], strides = [1, 1, 1]} : vector<4x8x8xf32> to vector<1x8x8xf32>
    %109 = vector.shape_cast %108 : vector<1x8x8xf32> to vector<8x8xf32>
    %110 = arith.addf %107, %109 : vector<8x8xf32>
    %111 = arith.addf %110, %51 : vector<8x8xf32>
    %cst_33 = arith.constant dense<0xFF800000> : vector<8xf32>
    %112 = vector.multi_reduction <maximumf>, %111, %cst_33 [1] : vector<8x8xf32> to vector<8xf32>
    %113 = vector.shape_cast %112 : vector<8xf32> to vector<8x1xf32>
    %114 = vector.broadcast %113 : vector<8x1xf32> to vector<8x8xf32>
    %115 = arith.subf %111, %114 : vector<8x8xf32>
    %116 = math.exp %115 : vector<8x8xf32>
    %cst_34 = arith.constant dense<0.000000e+00> : vector<8xf32>
    %117 = vector.multi_reduction <add>, %116, %cst_34 [1] : vector<8x8xf32> to vector<8xf32>
    %118 = vector.shape_cast %117 : vector<8xf32> to vector<8x1xf32>
    %119 = tpu.reciprocal %118 {approx = true} : vector<8x1xf32> -> vector<8x1xf32>
    %120 = vector.broadcast %119 : vector<8x1xf32> to vector<8x8xf32>
    %121 = arith.mulf %116, %120 : vector<8x8xf32>
    %122 = arith.truncf %121 : vector<8x8xf32> to vector<8x8xbf16>
    %123 = vector.extract_strided_slice %54 {offsets = [0, 64], sizes = [8, 32], strides = [1, 1]} : vector<8x128xf32> to vector<8x32xf32>
    %124 = arith.truncf %123 : vector<8x32xf32> to vector<8x32xbf16>
    %cst_35 = arith.constant dense<0.000000e+00> : vector<8x32xf32>
    %125 = tpu.matmul %122, %124, %cst_35 {dimension_numbers = #tpu.dot_dimension_numbers<[1], [0], [0], [1], [0, 0, 1, 1], [], []>} : vector<8x8xbf16>, vector<8x32xbf16>, vector<8x32xf32> -> vector<8x32xf32>
    %c0_36 = arith.constant 0 : index
    %c64 = arith.constant 64 : index
    %126 = vector.load %arg18[%c0_36, %c64] : memref<16x128xf32, #tpu.memory_space<vmem>>, vector<8x32xf32>
    tpu.vector_store %arg18[%c0_36, %c64], %125 {strides = array<i32>} : memref<16x128xf32, #tpu.memory_space<vmem>>, vector<8x32xf32>,
    %127 = vector.extract_strided_slice %52 {offsets = [0, 96], sizes = [8, 32], strides = [1, 1]} : vector<8x128xf32> to vector<8x32xf32>
    %128 = arith.truncf %127 : vector<8x32xf32> to vector<8x32xbf16>
    %129 = vector.extract_strided_slice %53 {offsets = [0, 96], sizes = [8, 32], strides = [1, 1]} : vector<8x128xf32> to vector<8x32xf32>
    %130 = arith.truncf %129 : vector<8x32xf32> to vector<8x32xbf16>
    %cst_37 = arith.constant dense<0.000000e+00> : vector<8x8xf32>
    %131 = tpu.matmul %128, %130, %cst_37 {dimension_numbers = #tpu.dot_dimension_numbers<[1], [1], [0], [0], [0, 0, 1, 0], [], []>} : vector<8x32xbf16>, vector<8x32xbf16>, vector<8x8xf32> -> vector<8x8xf32>
    %132 = vector.extract_strided_slice %38 {offsets = [3, 0, 0], sizes = [1, 8, 8], strides = [1, 1, 1]} : vector<4x8x8xf32> to vector<1x8x8xf32>
    %133 = vector.shape_cast %132 : vector<1x8x8xf32> to vector<8x8xf32>
    %134 = arith.addf %131, %133 : vector<8x8xf32>
    %135 = arith.addf %134, %51 : vector<8x8xf32>
    %cst_38 = arith.constant dense<0xFF800000> : vector<8xf32>
    %136 = vector.multi_reduction <maximumf>, %135, %cst_38 [1] : vector<8x8xf32> to vector<8xf32>
    %137 = vector.shape_cast %136 : vector<8xf32> to vector<8x1xf32>
    %138 = vector.broadcast %137 : vector<8x1xf32> to vector<8x8xf32>
    %139 = arith.subf %135, %138 : vector<8x8xf32>
    %140 = math.exp %139 : vector<8x8xf32>
    %cst_39 = arith.constant dense<0.000000e+00> : vector<8xf32>
    %141 = vector.multi_reduction <add>, %140, %cst_39 [1] : vector<8x8xf32> to vector<8xf32>
    %142 = vector.shape_cast %141 : vector<8xf32> to vector<8x1xf32>
    %143 = tpu.reciprocal %142 {approx = true} : vector<8x1xf32> -> vector<8x1xf32>
    %144 = vector.broadcast %143 : vector<8x1xf32> to vector<8x8xf32>
    %145 = arith.mulf %140, %144 : vector<8x8xf32>
    %146 = arith.truncf %145 : vector<8x8xf32> to vector<8x8xbf16>
    %147 = vector.extract_strided_slice %54 {offsets = [0, 96], sizes = [8, 32], strides = [1, 1]} : vector<8x128xf32> to vector<8x32xf32>
    %148 = arith.truncf %147 : vector<8x32xf32> to vector<8x32xbf16>
    %cst_40 = arith.constant dense<0.000000e+00> : vector<8x32xf32>
    %149 = tpu.matmul %146, %148, %cst_40 {dimension_numbers = #tpu.dot_dimension_numbers<[1], [0], [0], [1], [0, 0, 1, 1], [], []>} : vector<8x8xbf16>, vector<8x32xbf16>, vector<8x32xf32> -> vector<8x32xf32>
    %c0_41 = arith.constant 0 : index
    %c96 = arith.constant 96 : index
    %150 = vector.load %arg18[%c0_41, %c96] : memref<16x128xf32, #tpu.memory_space<vmem>>, vector<8x32xf32>
    tpu.vector_store %arg18[%c0_41, %c96], %149 {strides = array<i32>} : memref<16x128xf32, #tpu.memory_space<vmem>>, vector<8x32xf32>,
    %151 = vector.extract_strided_slice %13 {offsets = [1, 0], sizes = [1, 8], strides = [1, 1]} : vector<2x8xf32> to vector<1x8xf32>
    %152 = vector.shape_cast %151 : vector<1x8xf32> to vector<1x8xf32>
    %153 = vector.broadcast %152 : vector<1x8xf32> to vector<8x8xf32>
    %154 = arith.mulf %153, %43 : vector<8x8xf32>
    %cst_42 = arith.constant 1.000000e+00 : f32
    %155 = vector.broadcast %cst_42 : f32 to vector<8x8xf32>
    %156 = arith.subf %155, %154 : vector<8x8xf32>
    %cst_43 = arith.constant -1.000000e+09 : f32
    %157 = vector.broadcast %cst_43 : f32 to vector<8x8xf32>
    %158 = arith.mulf %156, %157 : vector<8x8xf32>
    %159 = vector.extract_strided_slice %35 {offsets = [8, 0], sizes = [8, 128], strides = [1, 1]} : vector<16x128xf32> to vector<8x128xf32>
    %160 = vector.extract_strided_slice %36 {offsets = [8, 0], sizes = [8, 128], strides = [1, 1]} : vector<16x128xf32> to vector<8x128xf32>
    %161 = vector.extract_strided_slice %37 {offsets = [8, 0], sizes = [8, 128], strides = [1, 1]} : vector<16x128xf32> to vector<8x128xf32>
    %162 = vector.extract_strided_slice %159 {offsets = [0, 0], sizes = [8, 32], strides = [1, 1]} : vector<8x128xf32> to vector<8x32xf32>
    %163 = arith.truncf %162 : vector<8x32xf32> to vector<8x32xbf16>
    %164 = vector.extract_strided_slice %160 {offsets = [0, 0], sizes = [8, 32], strides = [1, 1]} : vector<8x128xf32> to vector<8x32xf32>
    %165 = arith.truncf %164 : vector<8x32xf32> to vector<8x32xbf16>
    %cst_44 = arith.constant dense<0.000000e+00> : vector<8x8xf32>
    %166 = tpu.matmul %163, %165, %cst_44 {dimension_numbers = #tpu.dot_dimension_numbers<[1], [1], [0], [0], [0, 0, 1, 0], [], []>} : vector<8x32xbf16>, vector<8x32xbf16>, vector<8x8xf32> -> vector<8x8xf32>
    %167 = vector.extract_strided_slice %38 {offsets = [0, 0, 0], sizes = [1, 8, 8], strides = [1, 1, 1]} : vector<4x8x8xf32> to vector<1x8x8xf32>
    %168 = vector.shape_cast %167 : vector<1x8x8xf32> to vector<8x8xf32>
    %169 = arith.addf %166, %168 : vector<8x8xf32>
    %170 = arith.addf %169, %158 : vector<8x8xf32>
    %cst_45 = arith.constant dense<0xFF800000> : vector<8xf32>
    %171 = vector.multi_reduction <maximumf>, %170, %cst_45 [1] : vector<8x8xf32> to vector<8xf32>
    %172 = vector.shape_cast %171 : vector<8xf32> to vector<8x1xf32>
    %173 = vector.broadcast %172 : vector<8x1xf32> to vector<8x8xf32>
    %174 = arith.subf %170, %173 : vector<8x8xf32>
    %175 = math.exp %174 : vector<8x8xf32>
    %cst_46 = arith.constant dense<0.000000e+00> : vector<8xf32>
    %176 = vector.multi_reduction <add>, %175, %cst_46 [1] : vector<8x8xf32> to vector<8xf32>
    %177 = vector.shape_cast %176 : vector<8xf32> to vector<8x1xf32>
    %178 = tpu.reciprocal %177 {approx = true} : vector<8x1xf32> -> vector<8x1xf32>
    %179 = vector.broadcast %178 : vector<8x1xf32> to vector<8x8xf32>
    %180 = arith.mulf %175, %179 : vector<8x8xf32>
    %181 = arith.truncf %180 : vector<8x8xf32> to vector<8x8xbf16>
    %182 = vector.extract_strided_slice %161 {offsets = [0, 0], sizes = [8, 32], strides = [1, 1]} : vector<8x128xf32> to vector<8x32xf32>
    %183 = arith.truncf %182 : vector<8x32xf32> to vector<8x32xbf16>
    %cst_47 = arith.constant dense<0.000000e+00> : vector<8x32xf32>
    %184 = tpu.matmul %181, %183, %cst_47 {dimension_numbers = #tpu.dot_dimension_numbers<[1], [0], [0], [1], [0, 0, 1, 1], [], []>} : vector<8x8xbf16>, vector<8x32xbf16>, vector<8x32xf32> -> vector<8x32xf32>
    %c8 = arith.constant 8 : index
    %c0_48 = arith.constant 0 : index
    %185 = vector.load %arg18[%c8, %c0_48] : memref<16x128xf32, #tpu.memory_space<vmem>>, vector<8x32xf32>
    tpu.vector_store %arg18[%c8, %c0_48], %184 {strides = array<i32>} : memref<16x128xf32, #tpu.memory_space<vmem>>, vector<8x32xf32>,
    %186 = vector.extract_strided_slice %159 {offsets = [0, 32], sizes = [8, 32], strides = [1, 1]} : vector<8x128xf32> to vector<8x32xf32>
    %187 = arith.truncf %186 : vector<8x32xf32> to vector<8x32xbf16>
    %188 = vector.extract_strided_slice %160 {offsets = [0, 32], sizes = [8, 32], strides = [1, 1]} : vector<8x128xf32> to vector<8x32xf32>
    %189 = arith.truncf %188 : vector<8x32xf32> to vector<8x32xbf16>
    %cst_49 = arith.constant dense<0.000000e+00> : vector<8x8xf32>
    %190 = tpu.matmul %187, %189, %cst_49 {dimension_numbers = #tpu.dot_dimension_numbers<[1], [1], [0], [0], [0, 0, 1, 0], [], []>} : vector<8x32xbf16>, vector<8x32xbf16>, vector<8x8xf32> -> vector<8x8xf32>
    %191 = vector.extract_strided_slice %38 {offsets = [1, 0, 0], sizes = [1, 8, 8], strides = [1, 1, 1]} : vector<4x8x8xf32> to vector<1x8x8xf32>
    %192 = vector.shape_cast %191 : vector<1x8x8xf32> to vector<8x8xf32>
    %193 = arith.addf %190, %192 : vector<8x8xf32>
    %194 = arith.addf %193, %158 : vector<8x8xf32>
    %cst_50 = arith.constant dense<0xFF800000> : vector<8xf32>
    %195 = vector.multi_reduction <maximumf>, %194, %cst_50 [1] : vector<8x8xf32> to vector<8xf32>
    %196 = vector.shape_cast %195 : vector<8xf32> to vector<8x1xf32>
    %197 = vector.broadcast %196 : vector<8x1xf32> to vector<8x8xf32>
    %198 = arith.subf %194, %197 : vector<8x8xf32>
    %199 = math.exp %198 : vector<8x8xf32>
    %cst_51 = arith.constant dense<0.000000e+00> : vector<8xf32>
    %200 = vector.multi_reduction <add>, %199, %cst_51 [1] : vector<8x8xf32> to vector<8xf32>
    %201 = vector.shape_cast %200 : vector<8xf32> to vector<8x1xf32>
    %202 = tpu.reciprocal %201 {approx = true} : vector<8x1xf32> -> vector<8x1xf32>
    %203 = vector.broadcast %202 : vector<8x1xf32> to vector<8x8xf32>
    %204 = arith.mulf %199, %203 : vector<8x8xf32>
    %205 = arith.truncf %204 : vector<8x8xf32> to vector<8x8xbf16>
    %206 = vector.extract_strided_slice %161 {offsets = [0, 32], sizes = [8, 32], strides = [1, 1]} : vector<8x128xf32> to vector<8x32xf32>
    %207 = arith.truncf %206 : vector<8x32xf32> to vector<8x32xbf16>
    %cst_52 = arith.constant dense<0.000000e+00> : vector<8x32xf32>
    %208 = tpu.matmul %205, %207, %cst_52 {dimension_numbers = #tpu.dot_dimension_numbers<[1], [0], [0], [1], [0, 0, 1, 1], [], []>} : vector<8x8xbf16>, vector<8x32xbf16>, vector<8x32xf32> -> vector<8x32xf32>
    %c8_53 = arith.constant 8 : index
    %c32_54 = arith.constant 32 : index
    %209 = vector.load %arg18[%c8_53, %c32_54] : memref<16x128xf32, #tpu.memory_space<vmem>>, vector<8x32xf32>
    tpu.vector_store %arg18[%c8_53, %c32_54], %208 {strides = array<i32>} : memref<16x128xf32, #tpu.memory_space<vmem>>, vector<8x32xf32>,
    %210 = vector.extract_strided_slice %159 {offsets = [0, 64], sizes = [8, 32], strides = [1, 1]} : vector<8x128xf32> to vector<8x32xf32>
    %211 = arith.truncf %210 : vector<8x32xf32> to vector<8x32xbf16>
    %212 = vector.extract_strided_slice %160 {offsets = [0, 64], sizes = [8, 32], strides = [1, 1]} : vector<8x128xf32> to vector<8x32xf32>
    %213 = arith.truncf %212 : vector<8x32xf32> to vector<8x32xbf16>
    %cst_55 = arith.constant dense<0.000000e+00> : vector<8x8xf32>
    %214 = tpu.matmul %211, %213, %cst_55 {dimension_numbers = #tpu.dot_dimension_numbers<[1], [1], [0], [0], [0, 0, 1, 0], [], []>} : vector<8x32xbf16>, vector<8x32xbf16>, vector<8x8xf32> -> vector<8x8xf32>
    %215 = vector.extract_strided_slice %38 {offsets = [2, 0, 0], sizes = [1, 8, 8], strides = [1, 1, 1]} : vector<4x8x8xf32> to vector<1x8x8xf32>
    %216 = vector.shape_cast %215 : vector<1x8x8xf32> to vector<8x8xf32>
    %217 = arith.addf %214, %216 : vector<8x8xf32>
    %218 = arith.addf %217, %158 : vector<8x8xf32>
    %cst_56 = arith.constant dense<0xFF800000> : vector<8xf32>
    %219 = vector.multi_reduction <maximumf>, %218, %cst_56 [1] : vector<8x8xf32> to vector<8xf32>
    %220 = vector.shape_cast %219 : vector<8xf32> to vector<8x1xf32>
    %221 = vector.broadcast %220 : vector<8x1xf32> to vector<8x8xf32>
    %222 = arith.subf %218, %221 : vector<8x8xf32>
    %223 = math.exp %222 : vector<8x8xf32>
    %cst_57 = arith.constant dense<0.000000e+00> : vector<8xf32>
    %224 = vector.multi_reduction <add>, %223, %cst_57 [1] : vector<8x8xf32> to vector<8xf32>
    %225 = vector.shape_cast %224 : vector<8xf32> to vector<8x1xf32>
    %226 = tpu.reciprocal %225 {approx = true} : vector<8x1xf32> -> vector<8x1xf32>
    %227 = vector.broadcast %226 : vector<8x1xf32> to vector<8x8xf32>
    %228 = arith.mulf %223, %227 : vector<8x8xf32>
    %229 = arith.truncf %228 : vector<8x8xf32> to vector<8x8xbf16>
    %230 = vector.extract_strided_slice %161 {offsets = [0, 64], sizes = [8, 32], strides = [1, 1]} : vector<8x128xf32> to vector<8x32xf32>
    %231 = arith.truncf %230 : vector<8x32xf32> to vector<8x32xbf16>
    %cst_58 = arith.constant dense<0.000000e+00> : vector<8x32xf32>
    %232 = tpu.matmul %229, %231, %cst_58 {dimension_numbers = #tpu.dot_dimension_numbers<[1], [0], [0], [1], [0, 0, 1, 1], [], []>} : vector<8x8xbf16>, vector<8x32xbf16>, vector<8x32xf32> -> vector<8x32xf32>
    %c8_59 = arith.constant 8 : index
    %c64_60 = arith.constant 64 : index
    %233 = vector.load %arg18[%c8_59, %c64_60] : memref<16x128xf32, #tpu.memory_space<vmem>>, vector<8x32xf32>
    tpu.vector_store %arg18[%c8_59, %c64_60], %232 {strides = array<i32>} : memref<16x128xf32, #tpu.memory_space<vmem>>, vector<8x32xf32>,
    %234 = vector.extract_strided_slice %159 {offsets = [0, 96], sizes = [8, 32], strides = [1, 1]} : vector<8x128xf32> to vector<8x32xf32>
    %235 = arith.truncf %234 : vector<8x32xf32> to vector<8x32xbf16>
    %236 = vector.extract_strided_slice %160 {offsets = [0, 96], sizes = [8, 32], strides = [1, 1]} : vector<8x128xf32> to vector<8x32xf32>
    %237 = arith.truncf %236 : vector<8x32xf32> to vector<8x32xbf16>
    %cst_61 = arith.constant dense<0.000000e+00> : vector<8x8xf32>
    %238 = tpu.matmul %235, %237, %cst_61 {dimension_numbers = #tpu.dot_dimension_numbers<[1], [1], [0], [0], [0, 0, 1, 0], [], []>} : vector<8x32xbf16>, vector<8x32xbf16>, vector<8x8xf32> -> vector<8x8xf32>
    %239 = vector.extract_strided_slice %38 {offsets = [3, 0, 0], sizes = [1, 8, 8], strides = [1, 1, 1]} : vector<4x8x8xf32> to vector<1x8x8xf32>
    %240 = vector.shape_cast %239 : vector<1x8x8xf32> to vector<8x8xf32>
    %241 = arith.addf %238, %240 : vector<8x8xf32>
    %242 = arith.addf %241, %158 : vector<8x8xf32>
    %cst_62 = arith.constant dense<0xFF800000> : vector<8xf32>
    %243 = vector.multi_reduction <maximumf>, %242, %cst_62 [1] : vector<8x8xf32> to vector<8xf32>
    %244 = vector.shape_cast %243 : vector<8xf32> to vector<8x1xf32>
    %245 = vector.broadcast %244 : vector<8x1xf32> to vector<8x8xf32>
    %246 = arith.subf %242, %245 : vector<8x8xf32>
    %247 = math.exp %246 : vector<8x8xf32>
    %cst_63 = arith.constant dense<0.000000e+00> : vector<8xf32>
    %248 = vector.multi_reduction <add>, %247, %cst_63 [1] : vector<8x8xf32> to vector<8xf32>
    %249 = vector.shape_cast %248 : vector<8xf32> to vector<8x1xf32>
    %250 = tpu.reciprocal %249 {approx = true} : vector<8x1xf32> -> vector<8x1xf32>
    %251 = vector.broadcast %250 : vector<8x1xf32> to vector<8x8xf32>
    %252 = arith.mulf %247, %251 : vector<8x8xf32>
    %253 = arith.truncf %252 : vector<8x8xf32> to vector<8x8xbf16>
    %254 = vector.extract_strided_slice %161 {offsets = [0, 96], sizes = [8, 32], strides = [1, 1]} : vector<8x128xf32> to vector<8x32xf32>
    %255 = arith.truncf %254 : vector<8x32xf32> to vector<8x32xbf16>
    %cst_64 = arith.constant dense<0.000000e+00> : vector<8x32xf32>
    %256 = tpu.matmul %253, %255, %cst_64 {dimension_numbers = #tpu.dot_dimension_numbers<[1], [0], [0], [1], [0, 0, 1, 1], [], []>} : vector<8x8xbf16>, vector<8x32xbf16>, vector<8x32xf32> -> vector<8x32xf32>
    %c8_65 = arith.constant 8 : index
    %c96_66 = arith.constant 96 : index
    %257 = vector.load %arg18[%c8_65, %c96_66] : memref<16x128xf32, #tpu.memory_space<vmem>>, vector<8x32xf32>
    tpu.vector_store %arg18[%c8_65, %c96_66], %256 {strides = array<i32>} : memref<16x128xf32, #tpu.memory_space<vmem>>, vector<8x32xf32>,
    %c0_67 = arith.constant 0 : index
    %c0_68 = arith.constant 0 : index
    %258 = vector.load %arg18[%c0_67, %c0_68] : memref<16x128xf32, #tpu.memory_space<vmem>>, vector<16x128xf32>
    %259 = arith.truncf %258 : vector<16x128xf32> to vector<16x128xbf16>
    %c0_69 = arith.constant 0 : index
    %c0_70 = arith.constant 0 : index
    %260 = vector.load %arg9[%c0_69, %c0_70] : memref<128x128xbf16, #tpu.memory_space<vmem>>, vector<128x128xbf16>
    %cst_71 = arith.constant dense<0.000000e+00> : vector<16x128xf32>
    %261 = tpu.matmul %259, %260, %cst_71 {dimension_numbers = #tpu.dot_dimension_numbers<[1], [0], [0], [1], [0, 0, 1, 1], [], []>} : vector<16x128xbf16>, vector<128x128xbf16>, vector<16x128xf32> -> vector<16x128xf32>
    %262 = arith.addf %8, %261 : vector<16x128xf32>
    %c0_72 = arith.constant 0 : index
    %c0_73 = arith.constant 0 : index
    %263 = vector.load %arg10[%c0_72, %c0_73] : memref<1x128xf32, #tpu.memory_space<vmem>>, vector<1x128xf32>
    %264 = arith.mulf %262, %262 : vector<16x128xf32>
    %cst_74 = arith.constant dense<0.000000e+00> : vector<16xf32>
    %265 = vector.multi_reduction <add>, %264, %cst_74 [1] : vector<16x128xf32> to vector<16xf32>
    %266 = vector.shape_cast %265 : vector<16xf32> to vector<16x1xf32>
    %cst_75 = arith.constant 1.280000e+02 : f32
    %267 = vector.broadcast %cst_75 : f32 to vector<16x1xf32>
    %268 = arith.divf %266, %267 : vector<16x1xf32>
    %cst_76 = arith.constant 9.99999997E-7 : f32
    %269 = vector.broadcast %cst_76 : f32 to vector<16x1xf32>
    %270 = arith.addf %268, %269 : vector<16x1xf32>
    %271 = math.rsqrt %270 : vector<16x1xf32>
    %272 = vector.broadcast %271 : vector<16x1xf32> to vector<16x128xf32>
    %273 = arith.mulf %262, %272 : vector<16x128xf32>
    %274 = vector.broadcast %263 : vector<1x128xf32> to vector<16x128xf32>
    %275 = arith.mulf %273, %274 : vector<16x128xf32>
    %276 = arith.truncf %275 : vector<16x128xf32> to vector<16x128xbf16>
    %c0_77 = arith.constant 0 : index
    %c0_78 = arith.constant 0 : index
    %277 = vector.load %arg11[%c0_77, %c0_78] : memref<128x384xbf16, #tpu.memory_space<vmem>>, vector<128x128xbf16>
    %cst_79 = arith.constant dense<0.000000e+00> : vector<16x128xf32>
    %278 = tpu.matmul %276, %277, %cst_79 {dimension_numbers = #tpu.dot_dimension_numbers<[1], [0], [0], [1], [0, 0, 1, 1], [], []>} : vector<16x128xbf16>, vector<128x128xbf16>, vector<16x128xf32> -> vector<16x128xf32>
    %c0_80 = arith.constant 0 : index
    %c0_81 = arith.constant 0 : index
    %279 = vector.load %arg4[%c0_80, %c0_81] : memref<32x128xf32, #tpu.memory_space<vmem>>, vector<32x128xf32>
    %280 = arith.truncf %279 : vector<32x128xf32> to vector<32x128xbf16>
    %c0_82 = arith.constant 0 : index
    %c128 = arith.constant 128 : index
    %281 = vector.load %arg11[%c0_82, %c128] : memref<128x384xbf16, #tpu.memory_space<vmem>>, vector<128x256xbf16>
    %cst_83 = arith.constant dense<0.000000e+00> : vector<32x256xf32>
    %282 = tpu.matmul %280, %281, %cst_83 {dimension_numbers = #tpu.dot_dimension_numbers<[1], [0], [0], [1], [0, 0, 1, 1], [], []>} : vector<32x128xbf16>, vector<128x256xbf16>, vector<32x256xf32> -> vector<32x256xf32>
    %283 = vector.extract_strided_slice %282 {offsets = [0, 0], sizes = [32, 128], strides = [1, 1]} : vector<32x256xf32> to vector<32x128xf32>
    %284 = vector.extract_strided_slice %282 {offsets = [0, 128], sizes = [32, 128], strides = [1, 1]} : vector<32x256xf32> to vector<32x128xf32>
    %285 = vector.extract_strided_slice %18 {offsets = [0, 0], sizes = [1, 16], strides = [1, 1]} : vector<2x16xf32> to vector<1x16xf32>
    %286 = vector.shape_cast %285 : vector<1x16xf32> to vector<1x16xf32>
    %287 = vector.broadcast %286 : vector<1x16xf32> to vector<8x16xf32>
    %cst_84 = arith.constant 1.000000e+00 : f32
    %288 = vector.broadcast %cst_84 : f32 to vector<8x16xf32>
    %289 = arith.subf %288, %287 : vector<8x16xf32>
    %cst_85 = arith.constant -1.000000e+09 : f32
    %290 = vector.broadcast %cst_85 : f32 to vector<8x16xf32>
    %291 = arith.mulf %289, %290 : vector<8x16xf32>
    %292 = vector.extract_strided_slice %278 {offsets = [0, 0], sizes = [8, 128], strides = [1, 1]} : vector<16x128xf32> to vector<8x128xf32>
    %293 = vector.extract_strided_slice %283 {offsets = [0, 0], sizes = [16, 128], strides = [1, 1]} : vector<32x128xf32> to vector<16x128xf32>
    %294 = vector.extract_strided_slice %284 {offsets = [0, 0], sizes = [16, 128], strides = [1, 1]} : vector<32x128xf32> to vector<16x128xf32>
    %295 = vector.extract_strided_slice %292 {offsets = [0, 0], sizes = [8, 32], strides = [1, 1]} : vector<8x128xf32> to vector<8x32xf32>
    %296 = arith.truncf %295 : vector<8x32xf32> to vector<8x32xbf16>
    %297 = vector.extract_strided_slice %293 {offsets = [0, 0], sizes = [16, 32], strides = [1, 1]} : vector<16x128xf32> to vector<16x32xf32>
    %298 = arith.truncf %297 : vector<16x32xf32> to vector<16x32xbf16>
    %cst_86 = arith.constant dense<0.000000e+00> : vector<8x16xf32>
    %299 = tpu.matmul %296, %298, %cst_86 {dimension_numbers = #tpu.dot_dimension_numbers<[1], [1], [0], [0], [0, 0, 1, 0], [], []>} : vector<8x32xbf16>, vector<16x32xbf16>, vector<8x16xf32> -> vector<8x16xf32>
    %300 = arith.addf %299, %291 : vector<8x16xf32>
    %cst_87 = arith.constant dense<0xFF800000> : vector<8xf32>
    %301 = vector.multi_reduction <maximumf>, %300, %cst_87 [1] : vector<8x16xf32> to vector<8xf32>
    %302 = vector.shape_cast %301 : vector<8xf32> to vector<8x1xf32>
    %303 = vector.broadcast %302 : vector<8x1xf32> to vector<8x16xf32>
    %304 = arith.subf %300, %303 : vector<8x16xf32>
    %305 = math.exp %304 : vector<8x16xf32>
    %cst_88 = arith.constant dense<0.000000e+00> : vector<8xf32>
    %306 = vector.multi_reduction <add>, %305, %cst_88 [1] : vector<8x16xf32> to vector<8xf32>
    %307 = vector.shape_cast %306 : vector<8xf32> to vector<8x1xf32>
    %308 = tpu.reciprocal %307 {approx = true} : vector<8x1xf32> -> vector<8x1xf32>
    %309 = vector.broadcast %308 : vector<8x1xf32> to vector<8x16xf32>
    %310 = arith.mulf %305, %309 : vector<8x16xf32>
    %311 = arith.truncf %310 : vector<8x16xf32> to vector<8x16xbf16>
    %312 = vector.extract_strided_slice %294 {offsets = [0, 0], sizes = [16, 32], strides = [1, 1]} : vector<16x128xf32> to vector<16x32xf32>
    %313 = arith.truncf %312 : vector<16x32xf32> to vector<16x32xbf16>
    %cst_89 = arith.constant dense<0.000000e+00> : vector<8x32xf32>
    %314 = tpu.matmul %311, %313, %cst_89 {dimension_numbers = #tpu.dot_dimension_numbers<[1], [0], [0], [1], [0, 0, 1, 1], [], []>} : vector<8x16xbf16>, vector<16x32xbf16>, vector<8x32xf32> -> vector<8x32xf32>
    %c0_90 = arith.constant 0 : index
    %c0_91 = arith.constant 0 : index
    %315 = vector.load %arg18[%c0_90, %c0_91] : memref<16x128xf32, #tpu.memory_space<vmem>>, vector<8x32xf32>
    tpu.vector_store %arg18[%c0_90, %c0_91], %314 {strides = array<i32>} : memref<16x128xf32, #tpu.memory_space<vmem>>, vector<8x32xf32>,
    %316 = vector.extract_strided_slice %292 {offsets = [0, 32], sizes = [8, 32], strides = [1, 1]} : vector<8x128xf32> to vector<8x32xf32>
    %317 = arith.truncf %316 : vector<8x32xf32> to vector<8x32xbf16>
    %318 = vector.extract_strided_slice %293 {offsets = [0, 32], sizes = [16, 32], strides = [1, 1]} : vector<16x128xf32> to vector<16x32xf32>
    %319 = arith.truncf %318 : vector<16x32xf32> to vector<16x32xbf16>
    %cst_92 = arith.constant dense<0.000000e+00> : vector<8x16xf32>
    %320 = tpu.matmul %317, %319, %cst_92 {dimension_numbers = #tpu.dot_dimension_numbers<[1], [1], [0], [0], [0, 0, 1, 0], [], []>} : vector<8x32xbf16>, vector<16x32xbf16>, vector<8x16xf32> -> vector<8x16xf32>
    %321 = arith.addf %320, %291 : vector<8x16xf32>
    %cst_93 = arith.constant dense<0xFF800000> : vector<8xf32>
    %322 = vector.multi_reduction <maximumf>, %321, %cst_93 [1] : vector<8x16xf32> to vector<8xf32>
    %323 = vector.shape_cast %322 : vector<8xf32> to vector<8x1xf32>
    %324 = vector.broadcast %323 : vector<8x1xf32> to vector<8x16xf32>
    %325 = arith.subf %321, %324 : vector<8x16xf32>
    %326 = math.exp %325 : vector<8x16xf32>
    %cst_94 = arith.constant dense<0.000000e+00> : vector<8xf32>
    %327 = vector.multi_reduction <add>, %326, %cst_94 [1] : vector<8x16xf32> to vector<8xf32>
    %328 = vector.shape_cast %327 : vector<8xf32> to vector<8x1xf32>
    %329 = tpu.reciprocal %328 {approx = true} : vector<8x1xf32> -> vector<8x1xf32>
    %330 = vector.broadcast %329 : vector<8x1xf32> to vector<8x16xf32>
    %331 = arith.mulf %326, %330 : vector<8x16xf32>
    %332 = arith.truncf %331 : vector<8x16xf32> to vector<8x16xbf16>
    %333 = vector.extract_strided_slice %294 {offsets = [0, 32], sizes = [16, 32], strides = [1, 1]} : vector<16x128xf32> to vector<16x32xf32>
    %334 = arith.truncf %333 : vector<16x32xf32> to vector<16x32xbf16>
    %cst_95 = arith.constant dense<0.000000e+00> : vector<8x32xf32>
    %335 = tpu.matmul %332, %334, %cst_95 {dimension_numbers = #tpu.dot_dimension_numbers<[1], [0], [0], [1], [0, 0, 1, 1], [], []>} : vector<8x16xbf16>, vector<16x32xbf16>, vector<8x32xf32> -> vector<8x32xf32>
    %c0_96 = arith.constant 0 : index
    %c32_97 = arith.constant 32 : index
    %336 = vector.load %arg18[%c0_96, %c32_97] : memref<16x128xf32, #tpu.memory_space<vmem>>, vector<8x32xf32>
    tpu.vector_store %arg18[%c0_96, %c32_97], %335 {strides = array<i32>} : memref<16x128xf32, #tpu.memory_space<vmem>>, vector<8x32xf32>,
    %337 = vector.extract_strided_slice %292 {offsets = [0, 64], sizes = [8, 32], strides = [1, 1]} : vector<8x128xf32> to vector<8x32xf32>
    %338 = arith.truncf %337 : vector<8x32xf32> to vector<8x32xbf16>
    %339 = vector.extract_strided_slice %293 {offsets = [0, 64], sizes = [16, 32], strides = [1, 1]} : vector<16x128xf32> to vector<16x32xf32>
    %340 = arith.truncf %339 : vector<16x32xf32> to vector<16x32xbf16>
    %cst_98 = arith.constant dense<0.000000e+00> : vector<8x16xf32>
    %341 = tpu.matmul %338, %340, %cst_98 {dimension_numbers = #tpu.dot_dimension_numbers<[1], [1], [0], [0], [0, 0, 1, 0], [], []>} : vector<8x32xbf16>, vector<16x32xbf16>, vector<8x16xf32> -> vector<8x16xf32>
    %342 = arith.addf %341, %291 : vector<8x16xf32>
    %cst_99 = arith.constant dense<0xFF800000> : vector<8xf32>
    %343 = vector.multi_reduction <maximumf>, %342, %cst_99 [1] : vector<8x16xf32> to vector<8xf32>
    %344 = vector.shape_cast %343 : vector<8xf32> to vector<8x1xf32>
    %345 = vector.broadcast %344 : vector<8x1xf32> to vector<8x16xf32>
    %346 = arith.subf %342, %345 : vector<8x16xf32>
    %347 = math.exp %346 : vector<8x16xf32>
    %cst_100 = arith.constant dense<0.000000e+00> : vector<8xf32>
    %348 = vector.multi_reduction <add>, %347, %cst_100 [1] : vector<8x16xf32> to vector<8xf32>
    %349 = vector.shape_cast %348 : vector<8xf32> to vector<8x1xf32>
    %350 = tpu.reciprocal %349 {approx = true} : vector<8x1xf32> -> vector<8x1xf32>
    %351 = vector.broadcast %350 : vector<8x1xf32> to vector<8x16xf32>
    %352 = arith.mulf %347, %351 : vector<8x16xf32>
    %353 = arith.truncf %352 : vector<8x16xf32> to vector<8x16xbf16>
    %354 = vector.extract_strided_slice %294 {offsets = [0, 64], sizes = [16, 32], strides = [1, 1]} : vector<16x128xf32> to vector<16x32xf32>
    %355 = arith.truncf %354 : vector<16x32xf32> to vector<16x32xbf16>
    %cst_101 = arith.constant dense<0.000000e+00> : vector<8x32xf32>
    %356 = tpu.matmul %353, %355, %cst_101 {dimension_numbers = #tpu.dot_dimension_numbers<[1], [0], [0], [1], [0, 0, 1, 1], [], []>} : vector<8x16xbf16>, vector<16x32xbf16>, vector<8x32xf32> -> vector<8x32xf32>
    %c0_102 = arith.constant 0 : index
    %c64_103 = arith.constant 64 : index
    %357 = vector.load %arg18[%c0_102, %c64_103] : memref<16x128xf32, #tpu.memory_space<vmem>>, vector<8x32xf32>
    tpu.vector_store %arg18[%c0_102, %c64_103], %356 {strides = array<i32>} : memref<16x128xf32, #tpu.memory_space<vmem>>, vector<8x32xf32>,
    %358 = vector.extract_strided_slice %292 {offsets = [0, 96], sizes = [8, 32], strides = [1, 1]} : vector<8x128xf32> to vector<8x32xf32>
    %359 = arith.truncf %358 : vector<8x32xf32> to vector<8x32xbf16>
    %360 = vector.extract_strided_slice %293 {offsets = [0, 96], sizes = [16, 32], strides = [1, 1]} : vector<16x128xf32> to vector<16x32xf32>
    %361 = arith.truncf %360 : vector<16x32xf32> to vector<16x32xbf16>
    %cst_104 = arith.constant dense<0.000000e+00> : vector<8x16xf32>
    %362 = tpu.matmul %359, %361, %cst_104 {dimension_numbers = #tpu.dot_dimension_numbers<[1], [1], [0], [0], [0, 0, 1, 0], [], []>} : vector<8x32xbf16>, vector<16x32xbf16>, vector<8x16xf32> -> vector<8x16xf32>
    %363 = arith.addf %362, %291 : vector<8x16xf32>
    %cst_105 = arith.constant dense<0xFF800000> : vector<8xf32>
    %364 = vector.multi_reduction <maximumf>, %363, %cst_105 [1] : vector<8x16xf32> to vector<8xf32>
    %365 = vector.shape_cast %364 : vector<8xf32> to vector<8x1xf32>
    %366 = vector.broadcast %365 : vector<8x1xf32> to vector<8x16xf32>
    %367 = arith.subf %363, %366 : vector<8x16xf32>
    %368 = math.exp %367 : vector<8x16xf32>
    %cst_106 = arith.constant dense<0.000000e+00> : vector<8xf32>
    %369 = vector.multi_reduction <add>, %368, %cst_106 [1] : vector<8x16xf32> to vector<8xf32>
    %370 = vector.shape_cast %369 : vector<8xf32> to vector<8x1xf32>
    %371 = tpu.reciprocal %370 {approx = true} : vector<8x1xf32> -> vector<8x1xf32>
    %372 = vector.broadcast %371 : vector<8x1xf32> to vector<8x16xf32>
    %373 = arith.mulf %368, %372 : vector<8x16xf32>
    %374 = arith.truncf %373 : vector<8x16xf32> to vector<8x16xbf16>
    %375 = vector.extract_strided_slice %294 {offsets = [0, 96], sizes = [16, 32], strides = [1, 1]} : vector<16x128xf32> to vector<16x32xf32>
    %376 = arith.truncf %375 : vector<16x32xf32> to vector<16x32xbf16>
    %cst_107 = arith.constant dense<0.000000e+00> : vector<8x32xf32>
    %377 = tpu.matmul %374, %376, %cst_107 {dimension_numbers = #tpu.dot_dimension_numbers<[1], [0], [0], [1], [0, 0, 1, 1], [], []>} : vector<8x16xbf16>, vector<16x32xbf16>, vector<8x32xf32> -> vector<8x32xf32>
    %c0_108 = arith.constant 0 : index
    %c96_109 = arith.constant 96 : index
    %378 = vector.load %arg18[%c0_108, %c96_109] : memref<16x128xf32, #tpu.memory_space<vmem>>, vector<8x32xf32>
    tpu.vector_store %arg18[%c0_108, %c96_109], %377 {strides = array<i32>} : memref<16x128xf32, #tpu.memory_space<vmem>>, vector<8x32xf32>,
    %379 = vector.extract_strided_slice %18 {offsets = [1, 0], sizes = [1, 16], strides = [1, 1]} : vector<2x16xf32> to vector<1x16xf32>
    %380 = vector.shape_cast %379 : vector<1x16xf32> to vector<1x16xf32>
    %381 = vector.broadcast %380 : vector<1x16xf32> to vector<8x16xf32>
    %cst_110 = arith.constant 1.000000e+00 : f32
    %382 = vector.broadcast %cst_110 : f32 to vector<8x16xf32>
    %383 = arith.subf %382, %381 : vector<8x16xf32>
    %cst_111 = arith.constant -1.000000e+09 : f32
    %384 = vector.broadcast %cst_111 : f32 to vector<8x16xf32>
    %385 = arith.mulf %383, %384 : vector<8x16xf32>
    %386 = vector.extract_strided_slice %278 {offsets = [8, 0], sizes = [8, 128], strides = [1, 1]} : vector<16x128xf32> to vector<8x128xf32>
    %387 = vector.extract_strided_slice %283 {offsets = [16, 0], sizes = [16, 128], strides = [1, 1]} : vector<32x128xf32> to vector<16x128xf32>
    %388 = vector.extract_strided_slice %284 {offsets = [16, 0], sizes = [16, 128], strides = [1, 1]} : vector<32x128xf32> to vector<16x128xf32>
    %389 = vector.extract_strided_slice %386 {offsets = [0, 0], sizes = [8, 32], strides = [1, 1]} : vector<8x128xf32> to vector<8x32xf32>
    %390 = arith.truncf %389 : vector<8x32xf32> to vector<8x32xbf16>
    %391 = vector.extract_strided_slice %387 {offsets = [0, 0], sizes = [16, 32], strides = [1, 1]} : vector<16x128xf32> to vector<16x32xf32>
    %392 = arith.truncf %391 : vector<16x32xf32> to vector<16x32xbf16>
    %cst_112 = arith.constant dense<0.000000e+00> : vector<8x16xf32>
    %393 = tpu.matmul %390, %392, %cst_112 {dimension_numbers = #tpu.dot_dimension_numbers<[1], [1], [0], [0], [0, 0, 1, 0], [], []>} : vector<8x32xbf16>, vector<16x32xbf16>, vector<8x16xf32> -> vector<8x16xf32>
    %394 = arith.addf %393, %385 : vector<8x16xf32>
    %cst_113 = arith.constant dense<0xFF800000> : vector<8xf32>
    %395 = vector.multi_reduction <maximumf>, %394, %cst_113 [1] : vector<8x16xf32> to vector<8xf32>
    %396 = vector.shape_cast %395 : vector<8xf32> to vector<8x1xf32>
    %397 = vector.broadcast %396 : vector<8x1xf32> to vector<8x16xf32>
    %398 = arith.subf %394, %397 : vector<8x16xf32>
    %399 = math.exp %398 : vector<8x16xf32>
    %cst_114 = arith.constant dense<0.000000e+00> : vector<8xf32>
    %400 = vector.multi_reduction <add>, %399, %cst_114 [1] : vector<8x16xf32> to vector<8xf32>
    %401 = vector.shape_cast %400 : vector<8xf32> to vector<8x1xf32>
    %402 = tpu.reciprocal %401 {approx = true} : vector<8x1xf32> -> vector<8x1xf32>
    %403 = vector.broadcast %402 : vector<8x1xf32> to vector<8x16xf32>
    %404 = arith.mulf %399, %403 : vector<8x16xf32>
    %405 = arith.truncf %404 : vector<8x16xf32> to vector<8x16xbf16>
    %406 = vector.extract_strided_slice %388 {offsets = [0, 0], sizes = [16, 32], strides = [1, 1]} : vector<16x128xf32> to vector<16x32xf32>
    %407 = arith.truncf %406 : vector<16x32xf32> to vector<16x32xbf16>
    %cst_115 = arith.constant dense<0.000000e+00> : vector<8x32xf32>
    %408 = tpu.matmul %405, %407, %cst_115 {dimension_numbers = #tpu.dot_dimension_numbers<[1], [0], [0], [1], [0, 0, 1, 1], [], []>} : vector<8x16xbf16>, vector<16x32xbf16>, vector<8x32xf32> -> vector<8x32xf32>
    %c8_116 = arith.constant 8 : index
    %c0_117 = arith.constant 0 : index
    %409 = vector.load %arg18[%c8_116, %c0_117] : memref<16x128xf32, #tpu.memory_space<vmem>>, vector<8x32xf32>
    tpu.vector_store %arg18[%c8_116, %c0_117], %408 {strides = array<i32>} : memref<16x128xf32, #tpu.memory_space<vmem>>, vector<8x32xf32>,
    %410 = vector.extract_strided_slice %386 {offsets = [0, 32], sizes = [8, 32], strides = [1, 1]} : vector<8x128xf32> to vector<8x32xf32>
    %411 = arith.truncf %410 : vector<8x32xf32> to vector<8x32xbf16>
    %412 = vector.extract_strided_slice %387 {offsets = [0, 32], sizes = [16, 32], strides = [1, 1]} : vector<16x128xf32> to vector<16x32xf32>
    %413 = arith.truncf %412 : vector<16x32xf32> to vector<16x32xbf16>
    %cst_118 = arith.constant dense<0.000000e+00> : vector<8x16xf32>
    %414 = tpu.matmul %411, %413, %cst_118 {dimension_numbers = #tpu.dot_dimension_numbers<[1], [1], [0], [0], [0, 0, 1, 0], [], []>} : vector<8x32xbf16>, vector<16x32xbf16>, vector<8x16xf32> -> vector<8x16xf32>
    %415 = arith.addf %414, %385 : vector<8x16xf32>
    %cst_119 = arith.constant dense<0xFF800000> : vector<8xf32>
    %416 = vector.multi_reduction <maximumf>, %415, %cst_119 [1] : vector<8x16xf32> to vector<8xf32>
    %417 = vector.shape_cast %416 : vector<8xf32> to vector<8x1xf32>
    %418 = vector.broadcast %417 : vector<8x1xf32> to vector<8x16xf32>
    %419 = arith.subf %415, %418 : vector<8x16xf32>
    %420 = math.exp %419 : vector<8x16xf32>
    %cst_120 = arith.constant dense<0.000000e+00> : vector<8xf32>
    %421 = vector.multi_reduction <add>, %420, %cst_120 [1] : vector<8x16xf32> to vector<8xf32>
    %422 = vector.shape_cast %421 : vector<8xf32> to vector<8x1xf32>
    %423 = tpu.reciprocal %422 {approx = true} : vector<8x1xf32> -> vector<8x1xf32>
    %424 = vector.broadcast %423 : vector<8x1xf32> to vector<8x16xf32>
    %425 = arith.mulf %420, %424 : vector<8x16xf32>
    %426 = arith.truncf %425 : vector<8x16xf32> to vector<8x16xbf16>
    %427 = vector.extract_strided_slice %388 {offsets = [0, 32], sizes = [16, 32], strides = [1, 1]} : vector<16x128xf32> to vector<16x32xf32>
    %428 = arith.truncf %427 : vector<16x32xf32> to vector<16x32xbf16>
    %cst_121 = arith.constant dense<0.000000e+00> : vector<8x32xf32>
    %429 = tpu.matmul %426, %428, %cst_121 {dimension_numbers = #tpu.dot_dimension_numbers<[1], [0], [0], [1], [0, 0, 1, 1], [], []>} : vector<8x16xbf16>, vector<16x32xbf16>, vector<8x32xf32> -> vector<8x32xf32>
    %c8_122 = arith.constant 8 : index
    %c32_123 = arith.constant 32 : index
    %430 = vector.load %arg18[%c8_122, %c32_123] : memref<16x128xf32, #tpu.memory_space<vmem>>, vector<8x32xf32>
    tpu.vector_store %arg18[%c8_122, %c32_123], %429 {strides = array<i32>} : memref<16x128xf32, #tpu.memory_space<vmem>>, vector<8x32xf32>,
    %431 = vector.extract_strided_slice %386 {offsets = [0, 64], sizes = [8, 32], strides = [1, 1]} : vector<8x128xf32> to vector<8x32xf32>
    %432 = arith.truncf %431 : vector<8x32xf32> to vector<8x32xbf16>
    %433 = vector.extract_strided_slice %387 {offsets = [0, 64], sizes = [16, 32], strides = [1, 1]} : vector<16x128xf32> to vector<16x32xf32>
    %434 = arith.truncf %433 : vector<16x32xf32> to vector<16x32xbf16>
    %cst_124 = arith.constant dense<0.000000e+00> : vector<8x16xf32>
    %435 = tpu.matmul %432, %434, %cst_124 {dimension_numbers = #tpu.dot_dimension_numbers<[1], [1], [0], [0], [0, 0, 1, 0], [], []>} : vector<8x32xbf16>, vector<16x32xbf16>, vector<8x16xf32> -> vector<8x16xf32>
    %436 = arith.addf %435, %385 : vector<8x16xf32>
    %cst_125 = arith.constant dense<0xFF800000> : vector<8xf32>
    %437 = vector.multi_reduction <maximumf>, %436, %cst_125 [1] : vector<8x16xf32> to vector<8xf32>
    %438 = vector.shape_cast %437 : vector<8xf32> to vector<8x1xf32>
    %439 = vector.broadcast %438 : vector<8x1xf32> to vector<8x16xf32>
    %440 = arith.subf %436, %439 : vector<8x16xf32>
    %441 = math.exp %440 : vector<8x16xf32>
    %cst_126 = arith.constant dense<0.000000e+00> : vector<8xf32>
    %442 = vector.multi_reduction <add>, %441, %cst_126 [1] : vector<8x16xf32> to vector<8xf32>
    %443 = vector.shape_cast %442 : vector<8xf32> to vector<8x1xf32>
    %444 = tpu.reciprocal %443 {approx = true} : vector<8x1xf32> -> vector<8x1xf32>
    %445 = vector.broadcast %444 : vector<8x1xf32> to vector<8x16xf32>
    %446 = arith.mulf %441, %445 : vector<8x16xf32>
    %447 = arith.truncf %446 : vector<8x16xf32> to vector<8x16xbf16>
    %448 = vector.extract_strided_slice %388 {offsets = [0, 64], sizes = [16, 32], strides = [1, 1]} : vector<16x128xf32> to vector<16x32xf32>
    %449 = arith.truncf %448 : vector<16x32xf32> to vector<16x32xbf16>
    %cst_127 = arith.constant dense<0.000000e+00> : vector<8x32xf32>
    %450 = tpu.matmul %447, %449, %cst_127 {dimension_numbers = #tpu.dot_dimension_numbers<[1], [0], [0], [1], [0, 0, 1, 1], [], []>} : vector<8x16xbf16>, vector<16x32xbf16>, vector<8x32xf32> -> vector<8x32xf32>
    %c8_128 = arith.constant 8 : index
    %c64_129 = arith.constant 64 : index
    %451 = vector.load %arg18[%c8_128, %c64_129] : memref<16x128xf32, #tpu.memory_space<vmem>>, vector<8x32xf32>
    tpu.vector_store %arg18[%c8_128, %c64_129], %450 {strides = array<i32>} : memref<16x128xf32, #tpu.memory_space<vmem>>, vector<8x32xf32>,
    %452 = vector.extract_strided_slice %386 {offsets = [0, 96], sizes = [8, 32], strides = [1, 1]} : vector<8x128xf32> to vector<8x32xf32>
    %453 = arith.truncf %452 : vector<8x32xf32> to vector<8x32xbf16>
    %454 = vector.extract_strided_slice %387 {offsets = [0, 96], sizes = [16, 32], strides = [1, 1]} : vector<16x128xf32> to vector<16x32xf32>
    %455 = arith.truncf %454 : vector<16x32xf32> to vector<16x32xbf16>
    %cst_130 = arith.constant dense<0.000000e+00> : vector<8x16xf32>
    %456 = tpu.matmul %453, %455, %cst_130 {dimension_numbers = #tpu.dot_dimension_numbers<[1], [1], [0], [0], [0, 0, 1, 0], [], []>} : vector<8x32xbf16>, vector<16x32xbf16>, vector<8x16xf32> -> vector<8x16xf32>
    %457 = arith.addf %456, %385 : vector<8x16xf32>
    %cst_131 = arith.constant dense<0xFF800000> : vector<8xf32>
    %458 = vector.multi_reduction <maximumf>, %457, %cst_131 [1] : vector<8x16xf32> to vector<8xf32>
    %459 = vector.shape_cast %458 : vector<8xf32> to vector<8x1xf32>
    %460 = vector.broadcast %459 : vector<8x1xf32> to vector<8x16xf32>
    %461 = arith.subf %457, %460 : vector<8x16xf32>
    %462 = math.exp %461 : vector<8x16xf32>
    %cst_132 = arith.constant dense<0.000000e+00> : vector<8xf32>
    %463 = vector.multi_reduction <add>, %462, %cst_132 [1] : vector<8x16xf32> to vector<8xf32>
    %464 = vector.shape_cast %463 : vector<8xf32> to vector<8x1xf32>
    %465 = tpu.reciprocal %464 {approx = true} : vector<8x1xf32> -> vector<8x1xf32>
    %466 = vector.broadcast %465 : vector<8x1xf32> to vector<8x16xf32>
    %467 = arith.mulf %462, %466 : vector<8x16xf32>
    %468 = arith.truncf %467 : vector<8x16xf32> to vector<8x16xbf16>
    %469 = vector.extract_strided_slice %388 {offsets = [0, 96], sizes = [16, 32], strides = [1, 1]} : vector<16x128xf32> to vector<16x32xf32>
    %470 = arith.truncf %469 : vector<16x32xf32> to vector<16x32xbf16>
    %cst_133 = arith.constant dense<0.000000e+00> : vector<8x32xf32>
    %471 = tpu.matmul %468, %470, %cst_133 {dimension_numbers = #tpu.dot_dimension_numbers<[1], [0], [0], [1], [0, 0, 1, 1], [], []>} : vector<8x16xbf16>, vector<16x32xbf16>, vector<8x32xf32> -> vector<8x32xf32>
    %c8_134 = arith.constant 8 : index
    %c96_135 = arith.constant 96 : index
    %472 = vector.load %arg18[%c8_134, %c96_135] : memref<16x128xf32, #tpu.memory_space<vmem>>, vector<8x32xf32>
    tpu.vector_store %arg18[%c8_134, %c96_135], %471 {strides = array<i32>} : memref<16x128xf32, #tpu.memory_space<vmem>>, vector<8x32xf32>,
    %c0_136 = arith.constant 0 : index
    %c0_137 = arith.constant 0 : index
    %473 = vector.load %arg18[%c0_136, %c0_137] : memref<16x128xf32, #tpu.memory_space<vmem>>, vector<16x128xf32>
    %474 = arith.truncf %473 : vector<16x128xf32> to vector<16x128xbf16>
    %c0_138 = arith.constant 0 : index
    %c0_139 = arith.constant 0 : index
    %475 = vector.load %arg12[%c0_138, %c0_139] : memref<128x128xbf16, #tpu.memory_space<vmem>>, vector<128x128xbf16>
    %cst_140 = arith.constant dense<0.000000e+00> : vector<16x128xf32>
    %476 = tpu.matmul %474, %475, %cst_140 {dimension_numbers = #tpu.dot_dimension_numbers<[1], [0], [0], [1], [0, 0, 1, 1], [], []>} : vector<16x128xbf16>, vector<128x128xbf16>, vector<16x128xf32> -> vector<16x128xf32>
    %477 = arith.addf %262, %476 : vector<16x128xf32>
    %c0_141 = arith.constant 0 : index
    %c0_142 = arith.constant 0 : index
    %478 = vector.load %arg13[%c0_141, %c0_142] : memref<1x128xf32, #tpu.memory_space<vmem>>, vector<1x128xf32>
    %479 = arith.mulf %477, %477 : vector<16x128xf32>
    %cst_143 = arith.constant dense<0.000000e+00> : vector<16xf32>
    %480 = vector.multi_reduction <add>, %479, %cst_143 [1] : vector<16x128xf32> to vector<16xf32>
    %481 = vector.shape_cast %480 : vector<16xf32> to vector<16x1xf32>
    %cst_144 = arith.constant 1.280000e+02 : f32
    %482 = vector.broadcast %cst_144 : f32 to vector<16x1xf32>
    %483 = arith.divf %481, %482 : vector<16x1xf32>
    %cst_145 = arith.constant 9.99999997E-7 : f32
    %484 = vector.broadcast %cst_145 : f32 to vector<16x1xf32>
    %485 = arith.addf %483, %484 : vector<16x1xf32>
    %486 = math.rsqrt %485 : vector<16x1xf32>
    %487 = vector.broadcast %486 : vector<16x1xf32> to vector<16x128xf32>
    %488 = arith.mulf %477, %487 : vector<16x128xf32>
    %489 = vector.broadcast %478 : vector<1x128xf32> to vector<16x128xf32>
    %490 = arith.mulf %488, %489 : vector<16x128xf32>
    %491 = arith.truncf %490 : vector<16x128xf32> to vector<16x128xbf16>
    %c0_146 = arith.constant 0 : index
    %c0_147 = arith.constant 0 : index
    %492 = vector.load %arg14[%c0_146, %c0_147] : memref<128x256xbf16, #tpu.memory_space<vmem>>, vector<128x256xbf16>
    %cst_148 = arith.constant dense<0.000000e+00> : vector<16x256xf32>
    %493 = tpu.matmul %491, %492, %cst_148 {dimension_numbers = #tpu.dot_dimension_numbers<[1], [0], [0], [1], [0, 0, 1, 1], [], []>} : vector<16x128xbf16>, vector<128x256xbf16>, vector<16x256xf32> -> vector<16x256xf32>
    %cst_149 = arith.constant 0.000000e+00 : f32
    %494 = vector.broadcast %cst_149 : f32 to vector<16x256xf32>
    %495 = arith.maximumf %493, %494 : vector<16x256xf32>
    %496 = arith.truncf %495 : vector<16x256xf32> to vector<16x256xbf16>
    %c0_150 = arith.constant 0 : index
    %c0_151 = arith.constant 0 : index
    %497 = vector.load %arg15[%c0_150, %c0_151] : memref<256x128xbf16, #tpu.memory_space<vmem>>, vector<256x128xbf16>
    %cst_152 = arith.constant dense<0.000000e+00> : vector<16x128xf32>
    %498 = tpu.matmul %496, %497, %cst_152 {dimension_numbers = #tpu.dot_dimension_numbers<[1], [0], [0], [1], [0, 0, 1, 1], [], []>} : vector<16x256xbf16>, vector<256x128xbf16>, vector<16x128xf32> -> vector<16x128xf32>
    %499 = arith.addf %477, %498 : vector<16x128xf32>
    %c0_153 = arith.constant 0 : index
    %c0_154 = arith.constant 0 : index
    %500 = vector.load %arg16[%c0_153, %c0_154] : memref<1x128xf32, #tpu.memory_space<vmem>>, vector<1x128xf32>
    %501 = arith.mulf %499, %499 : vector<16x128xf32>
    %cst_155 = arith.constant dense<0.000000e+00> : vector<16xf32>
    %502 = vector.multi_reduction <add>, %501, %cst_155 [1] : vector<16x128xf32> to vector<16xf32>
    %503 = vector.shape_cast %502 : vector<16xf32> to vector<16x1xf32>
    %cst_156 = arith.constant 1.280000e+02 : f32
    %504 = vector.broadcast %cst_156 : f32 to vector<16x1xf32>
    %505 = arith.divf %503, %504 : vector<16x1xf32>
    %cst_157 = arith.constant 9.99999997E-7 : f32
    %506 = vector.broadcast %cst_157 : f32 to vector<16x1xf32>
    %507 = arith.addf %505, %506 : vector<16x1xf32>
    %508 = math.rsqrt %507 : vector<16x1xf32>
    %509 = vector.broadcast %508 : vector<16x1xf32> to vector<16x128xf32>
    %510 = arith.mulf %499, %509 : vector<16x128xf32>
    %511 = vector.broadcast %500 : vector<1x128xf32> to vector<16x128xf32>
    %512 = arith.mulf %510, %511 : vector<16x128xf32>
    %c0_158 = arith.constant 0 : index
    %c0_159 = arith.constant 0 : index
    %513 = vector.load %arg17[%c0_158, %c0_159] : memref<16x128xf32, #tpu.memory_space<vmem>>, vector<16x128xf32>
    tpu.vector_store %arg17[%c0_158, %c0_159], %512 {strides = array<i32>} : memref<16x128xf32, #tpu.memory_space<vmem>>, vector<16x128xf32>,
    return
  }
  func.func @transform_0(%arg0: i32) -> (i32, i32) {
    %c0_i32 = arith.constant 0 : i32
    %c0_i32_0 = arith.constant 0 : i32
    %c0_i32_1 = arith.constant 0 : i32
    return %c0_i32, %c0_i32_0 : i32, i32
  }
  func.func @transform_1(%arg0: i32) -> (i32, i32) {
    %c0_i32 = arith.constant 0 : i32
    %c0_i32_0 = arith.constant 0 : i32
    %c0_i32_1 = arith.constant 0 : i32
    return %c0_i32, %c0_i32_0 : i32, i32
  }
  func.func @transform_2(%arg0: i32) -> (i32, i32) {
    %c0_i32 = arith.constant 0 : i32
    %c0_i32_0 = arith.constant 0 : i32
    %c0_i32_1 = arith.constant 0 : i32
    return %c0_i32, %c0_i32_0 : i32, i32
  }
  func.func @transform_3(%arg0: i32) -> (i32, i32) {
    %c0_i32 = arith.constant 0 : i32
    %c0_i32_0 = arith.constant 0 : i32
    %c0_i32_1 = arith.constant 0 : i32
    return %c0_i32, %c0_i32_0 : i32, i32
  }
  func.func @transform_4(%arg0: i32) -> (i32, i32) {
    %c0_i32 = arith.constant 0 : i32
    %c0_i32_0 = arith.constant 0 : i32
    %c0_i32_1 = arith.constant 0 : i32
    return %c0_i32, %c0_i32_0 : i32, i32
  }
  func.func @transform_5(%arg0: i32) -> (i32, i32, i32) {
    %c0_i32 = arith.constant 0 : i32
    %c0_i32_0 = arith.constant 0 : i32
    %c0_i32_1 = arith.constant 0 : i32
    %c0_i32_2 = arith.constant 0 : i32
    return %c0_i32, %c0_i32_0, %c0_i32_1 : i32, i32, i32
  }
  func.func @transform_6(%arg0: i32) -> (i32, i32) {
    %c0_i32 = arith.constant 0 : i32
    %c0_i32_0 = arith.constant 0 : i32
    %c0_i32_1 = arith.constant 0 : i32
    return %c0_i32, %c0_i32_0 : i32, i32
  }
  func.func @transform_7(%arg0: i32) -> (i32, i32) {
    %c0_i32 = arith.constant 0 : i32
    %c0_i32_0 = arith.constant 0 : i32
    %c0_i32_1 = arith.constant 0 : i32
    return %c0_i32, %c0_i32_0 : i32, i32
  }
  func.func @transform_8(%arg0: i32) -> (i32, i32) {
    %c0_i32 = arith.constant 0 : i32
    %c0_i32_0 = arith.constant 0 : i32
    %c0_i32_1 = arith.constant 0 : i32
    return %c0_i32, %c0_i32_0 : i32, i32
  }
  func.func @transform_9(%arg0: i32) -> (i32, i32) {
    %c0_i32 = arith.constant 0 : i32
    %c0_i32_0 = arith.constant 0 : i32
    %c0_i32_1 = arith.constant 0 : i32
    return %c0_i32, %c0_i32_0 : i32, i32
  }
  func.func @transform_10(%arg0: i32) -> (i32, i32) {
    %c0_i32 = arith.constant 0 : i32
    %c0_i32_0 = arith.constant 0 : i32
    %c0_i32_1 = arith.constant 0 : i32
    return %c0_i32, %c0_i32_0 : i32, i32
  }
  func.func @transform_11(%arg0: i32) -> (i32, i32) {
    %c0_i32 = arith.constant 0 : i32
    %c0_i32_0 = arith.constant 0 : i32
    %c0_i32_1 = arith.constant 0 : i32
    return %c0_i32, %c0_i32_0 : i32, i32
  }
  func.func @transform_12(%arg0: i32) -> (i32, i32) {
    %c0_i32 = arith.constant 0 : i32
    %c0_i32_0 = arith.constant 0 : i32
    %c0_i32_1 = arith.constant 0 : i32
    return %c0_i32, %c0_i32_0 : i32, i32
  }
  func.func @transform_13(%arg0: i32) -> (i32, i32) {
    %c0_i32 = arith.constant 0 : i32
    %c0_i32_0 = arith.constant 0 : i32
    %c0_i32_1 = arith.constant 0 : i32
    return %c0_i32, %c0_i32_0 : i32, i32
  }
  func.func @transform_14(%arg0: i32) -> (i32, i32) {
    %c0_i32 = arith.constant 0 : i32
    %c0_i32_0 = arith.constant 0 : i32
    %c0_i32_1 = arith.constant 0 : i32
    return %c0_i32, %c0_i32_0 : i32, i32
  }
  func.func @transform_15(%arg0: i32) -> (i32, i32) {
    %c0_i32 = arith.constant 0 : i32
    %c0_i32_0 = arith.constant 0 : i32
    %c0_i32_1 = arith.constant 0 : i32
    return %c0_i32, %c0_i32_0 : i32, i32
  }
  func.func @transform_16(%arg0: i32) -> (i32, i32) {
    %c0_i32 = arith.constant 0 : i32
    %c0_i32_0 = arith.constant 0 : i32
    %c0_i32_1 = arith.constant 0 : i32
    return %c0_i32, %c0_i32_0 : i32, i32
  }
}

</mosaic_0001>

<bundles_post_ra>
// kernel: t5_loss.5
= control target key start
LH: loop header
LB: loop body
LE: loop exit
PB: predicated region body
PF: predicated region fallthrough
CT: control target
= control target key end

     0   :  { %v555_v0 = vmov 0.0   ;;  %vm556_vm0 = vmmov 0   ;;  %v557_v3 = vmov 0   ;;  %v340_v45 = vlaneseq  ;;  %s737_s1 = inlined_call_operand.vmem [shape: bf16[384,128], index: 1, kind: input, shape index: {}]   ;;  %s738_s0 = inlined_call_operand.vmem [shape: f32[16,128], index: 0, kind: input, shape index: {}]   ;;  %s739_s2 = inlined_call_operand.vmem [shape: s32[16,1], index: 2, kind: input, shape index: {}]   ;;  %s740_s4 = inlined_call_operand.vmem [shape: f32[1,128], index: 4, kind: output, shape index: {1}]   ;;  %s741_s3 = inlined_call_operand.vmem [shape: f32[1,128], index: 3, kind: output, shape index: {0}]  }
   0x1   :  { %490 = vmatprep.subr.bf16.mxu1 %v555_v0  ;;  %v515_v1 = vld [vmem:[%s737_s1 + $0x78] sm:$0xff]   ;;  %506 = vmatprep.mubr.msk.bf16.mxu1 %vm556_vm0, %v555_v0  ;;  %v518_v5 = vld [vmem:[%s737_s1 + $0x70] sm:$0xff]   ;;  %v521_v8 = vld [vmem:[%s737_s1 + $0x68] sm:$0xff]   ;;  %vm392_vm3 = vcmask 7168  }
   0x2   :  { %v516_v2 = vld [vmem:[%s737_s1 + $0xb8] sm:$0xff]   ;;  %513 = vset.pattern.permute.xlu1 %v557_v3  ;;  %514 = vset.pattern.permute.xlu0 %v557_v3  ;;  %v519_v6 = vld [vmem:[%s737_s1 + $0xb0] sm:$0xff]   ;;  %v522_v9 = vld [vmem:[%s737_s1 + $0xa8] sm:$0xff]   ;;  %v341_v52 = vand.u32 127, %v340_v45 }
   0x3   :  { %463 = vmatprep.subr.bf16.mxu0 %v515_v1  ;;  %v517_v4 = vld [vmem:[%s737_s1 + $0x38] sm:$0xff]   ;;  %491 = vmatpush3.bf16.xpose.msra.mxu1 %v516_v2  ;;  %v520_v7 = vld [vmem:[%s737_s1 + $0x30] sm:$0xff]   ;;  %v523_v10 = vld [vmem:[%s737_s1 + $0x28] sm:$0xff]  }
   0x4   :  { %464 = vmatpush3.bf16.xpose.msra.mxu0 %v517_v4  ;;  %492 = vmatprep.subr.bf16.mxu1 %v555_v0  ;;  %v524_v11 = vld [vmem:[%s737_s1 + $0x60] sm:$0xff]   ;;  %v18_v15 = vld [vmem:[%s738_s0 + $0x8] sm:$0xff]  ;;  %v527_v17 = vld [vmem:[%s737_s1 + $0x58] sm:$0xff]   ;;  %v342_v58 = vadd.s32 128, %v341_v52  ;;  %v343_v4 = vadd.s32 256, %v341_v52 }
   0x5   :  { %465 = vmatprep.subr.bf16.mxu0 %v518_v5  ;;  %v525_v12 = vld [vmem:[%s737_s1 + $0xa0] sm:$0xff]   ;;  %v20_v19 = vmul.f32 0.088388346, %v18_v15  ;;  %v642_v21 = vld [vmem:[%s739_s2 + $0x8] sm:$0xff]  ;;  %v528_v22 = vld [vmem:[%s737_s1 + $0x98] sm:$0xff]  }
   0x6   :  { %v526_v13 = vld [vmem:[%s737_s1 + $0x20] sm:$0xff]   ;;  %v529_v23 = vld [vmem:[%s737_s1 + $0x18] sm:$0xff]   ;;  %v530_v24 = vld [vmem:[%s737_s1 + $0x50] sm:$0xff]   ;;  %vm383_vm2 = vcmp.ne.s32.totalorder %v642_v21, 4294967196 }
   0x7   :  { %v17_v14 = vld [vmem:[%s738_s0] sm:$0xff]  ;;  %v531_v25 = vld [vmem:[%s737_s1 + $0x90] sm:$0xff]   ;;  %v533_v27 = vld [vmem:[%s737_s1 + $0x48] sm:$0xff]   ;;  %v710_v1 = vsel %vm383_vm2, 1.0, %v555_v0 }
   0x8   :  { %v633_v16 = vld [vmem:[%s739_s2] sm:$0xff]  ;;  %v19_v18 = vmul.f32 0.088388346, %v17_v14  ;;  %v532_v26 = vld [vmem:[%s737_s1 + $0x10] sm:$0xff]   ;;  %v534_v28 = vld [vmem:[%s737_s1 + $0x88] sm:$0xff]   ;;  %v409_v3 = vsel %vm392_vm3, %v710_v1, 0.0 }
   0x9   :  { %345 = vperm.xlu1 %513, %v633_v16   ;;  %v535_v29 = vld [vmem:[%s737_s1 + $0x8] sm:$0xff]   ;;  %v536_v30 = vld [vmem:[%s737_s1 + $0x40] sm:$0xff]   ;;  %vm382_vm1 = vcmp.ne.s32.totalorder %v633_v16, 4294967196 }
   0xa   :  { %v21_v20 = vpack.c.bf16 %v20_v19, %v19_v18  ;;  %v537_v31 = vld [vmem:[%s737_s1 + $0x80] sm:$0xff]   ;;  %v707_v63 = vsel %vm382_vm1, 1.0, %v555_v0 }
   0xb   :  { %493 = vmatpush3.bf16.xpose.msra.mxu1 %v519_v6  ;;  %v538_v32 = vld [vmem:[%s737_s1] sm:$0xff]   ;;  %v408_v2 = vsel %vm392_vm3, %v707_v63, 0.0 }
   0xc   :  { %466 = vmatpush3.bf16.xpose.msra.mxu0 %v520_v7  ;;  %494 = vmatprep.subr.bf16.mxu1 %v555_v0  ;;  %v410_v7 = vadd.f32 %v409_v3, %v408_v2 }
   0xd   :  { %467 = vmatprep.subr.bf16.mxu0 %v521_v8  ;;  %479 = vmatprep.mubr.bf16.mxu0 %v21_v20 }
   0xe   :  { %348 = vperm.xlu1 %513, %v642_v21   ;;  %v411_v16 = vrot.slane %v410_v7, 4 }
  0x13   :  { %495 = vmatpush3.bf16.xpose.msra.mxu1 %v522_v9 }
  0x14   :  { %468 = vmatpush3.bf16.xpose.msra.mxu0 %v523_v10  ;;  %496 = vmatprep.subr.bf16.mxu1 %v555_v0 }
  0x15   :  { %469 = vmatprep.subr.bf16.mxu0 %v524_v11 }
  0x1b   :  { %497 = vmatpush3.bf16.xpose.msra.mxu1 %v525_v12 }
  0x1c   :  { %470 = vmatpush3.bf16.xpose.msra.mxu0 %v526_v13  ;;  %498 = vmatprep.subr.bf16.mxu1 %v555_v0 }
  0x1d   :  { %471 = vmatprep.subr.bf16.mxu0 %v527_v17 }
  0x23   :  { %499 = vmatpush3.bf16.xpose.msra.mxu1 %v528_v22 }
  0x24   :  { %472 = vmatpush3.bf16.xpose.msra.mxu0 %v529_v23  ;;  %500 = vmatprep.subr.bf16.mxu1 %v555_v0 }
  0x25   :  { %473 = vmatprep.subr.bf16.mxu0 %v530_v24 }
  0x2b   :  { %501 = vmatpush3.bf16.xpose.msra.mxu1 %v531_v25 }
  0x2c   :  { %474 = vmatpush3.bf16.xpose.msra.mxu0 %v532_v26  ;;  %502 = vmatprep.subr.bf16.mxu1 %v555_v0 }
  0x2d   :  { %475 = vmatprep.subr.bf16.mxu0 %v533_v27 }
  0x33   :  { %503 = vmatpush3.bf16.xpose.msra.mxu1 %v534_v28  ;;  %v412_v28 = vadd.f32 %v411_v16, %v410_v7 }
  0x34   :  { %476 = vmatpush3.bf16.xpose.msra.mxu0 %v535_v29  ;;  %504 = vmatprep.subr.bf16.mxu1 %v555_v0 }
  0x35   :  { %477 = vmatprep.subr.bf16.mxu0 %v536_v30 }
  0x3b   :  { %505 = vmatpush3.bf16.xpose.msra.mxu1 %v537_v31 }
  0x3c   :  { %478 = vmatpush3.bf16.xpose.msra.mxu0 %v538_v32 }
  0x42   :  { %507 = vmatmul.mubr.bf16.vlgmr.msra.gmra.mxu1 %v21_v20 }
  0x43   :  { %480 = vmatmul.mubr.bf16.vlgmr.msra.gmra.mxu0 %v21_v20 }
  0x84   :  { %v346_v62 = vpop.permute.xlu1 %345 }
  0x85   :  { %vm351_vm4 = vcmp.eq.s32.totalorder %v342_v58, %v346_v62  ;;  %vm350_vm5 = vcmp.eq.s32.totalorder %v341_v52, %v346_v62  ;;  %vm352_vm7 = vcmp.eq.s32.totalorder %v343_v4, %v346_v62 }
  0x86   :  { %v456_v6 = vsel %vm351_vm4, 1.0, %v555_v0  ;;  %v455_v8 = vsel %vm350_vm5, 1.0, %v555_v0  ;;  %v457_v18 = vsel %vm352_vm7, 1.0, %v555_v0 }
  0x89   :  { %v349_v5 = vpop.permute.xlu1 %348 }
  0x8a   :  { %vm354_vm6 = vcmp.eq.s32.totalorder %v342_v58, %v349_v5  ;;  %vm353_vm8 = vcmp.eq.s32.totalorder %v341_v52, %v349_v5  ;;  %vm355_vm9 = vcmp.eq.s32.totalorder %v343_v4, %v349_v5 }
  0x8b   :  { %v459_v12 = vsel %vm354_vm6, 1.0, %v555_v0  ;;  %v458_v17 = vsel %vm353_vm8, 1.0, %v555_v0  ;;  %v460_v29 = vsel %vm355_vm9, 1.0, %v555_v0 }
 0x102   :  { %v682_v33 = vpop.f32.mrf.mxu1 }
 0x103   :  { %v248_v34 = vpop.f32.mrf.mxu0  ;;  %v370_v25 = vmul.f32 %v457_v18, %v682_v33 }
 0x104   :  { %v508_v35 = vpop.f32.mrf.mxu1  ;;  %v300_v36 = vmax.f32 %v248_v34, %v682_v33  ;;  %v368_v13 = vmul.f32 %v455_v8, %v248_v34 }
 0x105   :  { %v250_v37 = vpop.f32.mrf.mxu0  ;;  %v413_v35 = vrot.slane %v412_v28, 2 }
 0x106   :  { %v685_v38 = vpop.f32.mrf.mxu1  ;;  %v301_v39 = vmax.f32 %v300_v36, %v250_v37  ;;  %v369_v10 = vmul.f32 %v456_v6, %v250_v37 }
 0x107   :  { %v687_v40 = vpop.f32.mrf.mxu0 }
 0x108   :  { %v509_v41 = vpop.f32.mrf.mxu1  ;;  %302 = vmax.xlane.f32.xlu0 %v301_v39  ;;  %v304_v42 = vmax.f32 %v687_v40, %v685_v38  ;;  %v374_v22 = vadd.f32 %v369_v10, %v368_v13  ;;  %v371_v24 = vmul.f32 %v458_v17, %v687_v40 }
 0x109   :  { %v254_v43 = vpop.f32.mrf.mxu0 }
 0x10a   :  { %v305_v44 = vmax.f32 %v304_v42, %v254_v43  ;;  %v372_v20 = vmul.f32 %v459_v12, %v254_v43  ;;  %v375_v30 = vadd.f32 %v374_v22, %v370_v25 }
 0x10c   :  { %306 = vmax.xlane.f32.xlu0 %v305_v44  ;;  %v378_v32 = vadd.f32 %v372_v20, %v371_v24 }
 0x191   :  { %v691_v46 = vpop.xlane.xlu0 %302 }
 0x192   :  { %v308_v47 = vsub.f32 %v248_v34, %v691_v46  ;;  %v309_v48 = vsub.f32 %v250_v37, %v691_v46  ;;  %v310_v49 = vsub.f32 %v682_v33, %v691_v46  ;;  %v373_v34 = vmul.f32 %v460_v29, %v685_v38 }
 0x193   :  { %v414_v37 = vadd.f32 %v413_v35, %v412_v28 }
 0x194   :  { %v314_v50 = vmul.f32 1.442695, %v308_v47  ;;  %v316_v51 = vmul.f32 1.442695, %v309_v48  ;;  %v318_v53 = vmul.f32 1.442695, %v310_v49  ;;  %v379_v36 = vadd.f32 %v378_v32, %v373_v34 }
 0x195   :  { %v697_v54 = vpop.xlane.xlu0 %306  ;;  %v415_v39 = vrot.slane %v414_v37, 1 }
 0x196   :  { %539 = vpow2.f32 %v314_v50  ;;  %v311_v55 = vsub.f32 %v687_v40, %v697_v54  ;;  %v312_v56 = vsub.f32 %v254_v43, %v697_v54  ;;  %v313_v57 = vsub.f32 %v685_v38, %v697_v54 }
 0x197   :  { %541 = vpow2.f32 %v316_v51  ;;  %v416_v40 = vadd.f32 %v415_v39, %v414_v37 }
 0x198   :  { %v320_v59 = vmul.f32 1.442695, %v311_v55  ;;  %v322_v60 = vmul.f32 1.442695, %v312_v56  ;;  %543 = vpow2.f32 %v318_v53  ;;  %v324_v61 = vmul.f32 1.442695, %v313_v57 }
 0x19a   :  { %545 = vpow2.f32 %v320_v59 }
 0x19b   :  { %547 = vpow2.f32 %v322_v60 }
 0x19c   :  { %549 = vpow2.f32 %v324_v61 }
 0x1a3   :  { %v540_v9 = vpop.eup %539 }
 0x1a4   :  { %v542_v11 = vpop.eup %541 }
 0x1a5   :  { %v326_v14 = vadd.f32 %v542_v11, %v540_v9  ;;  %v544_v15 = vpop.eup %543 }
 0x1a7   :  { %v546_v19 = vpop.eup %545  ;;  %v327_v21 = vadd.f32 %v544_v15, %v326_v14 }
 0x1a8   :  { %v548_v23 = vpop.eup %547 }
 0x1a9   :  { %328 = vadd.xlane.f32.xlu0 %v327_v21  ;;  %v330_v26 = vadd.f32 %v548_v23, %v546_v19  ;;  %v550_v27 = vpop.eup %549 }
 0x1ab   :  { %v331_v31 = vadd.f32 %v550_v27, %v330_v26 }
 0x1ad   :  { %376 = vadd.xlane.f32.xlu0 %v375_v30  ;;  %332 = vadd.xlane.f32.xlu1 %v331_v31 }
 0x1b1   :  { %380 = vadd.xlane.f32.xlu0 %v379_v36 }
 0x1be   :  { %419 = vperm.xlu1 %513, %v416_v40  }
 0x232   :  { %v329_v33 = vpop.xlane.xlu0 %328 }
 0x233   :  { %551 = vlog2.f32 %v329_v33 }
 0x236   :  { %v333_v41 = vpop.xlane.xlu1 %332  ;;  %v377_v44 = vpop.xlane.xlu0 %376 }
 0x237   :  { %553 = vlog2.f32 %v333_v41 }
 0x23a   :  { %v420_v42 = vpop.permute.xlu1 %419  ;;  %v381_v50 = vpop.xlane.xlu0 %380 }
 0x23b   :  { %422 = vst [vmem:[%s740_s4] sm:$0x1] %v420_v42 }
 0x240   :  { %v552_v0 = vpop.eup %551 }
 0x241   :  { %v335_v43 = vmul.f32 0.6931472, %v552_v0 }
 0x243   :  { %v338_v38 = vadd.f32 %v335_v43, %v691_v46 }
 0x244   :  { %v554_v45 = vpop.eup %553 }
 0x245   :  { %v337_v47 = vmul.f32 0.6931472, %v554_v45  ;;  %v388_v48 = vsub.f32 %v338_v38, %v377_v44 }
 0x247   :  { %v339_v49 = vadd.f32 %v337_v47, %v697_v54  ;;  %v390_v51 = vmul.f32 %v707_v63, %v388_v48 }
 0x249   :  { %v389_v52 = vsub.f32 %v339_v49, %v381_v50  ;;  %v393_v55 = vsel %vm392_vm3, %v390_v51, 0.0 }
 0x24b   :  { %v391_v53 = vmul.f32 %v710_v1, %v389_v52 }
 0x24d   :  { %v394_v56 = vsel %vm392_vm3, %v391_v53, 0.0 }
 0x24e   :  { %v395_v57 = vadd.f32 %v394_v56, %v393_v55 }
 0x250   :  { %v396_v58 = vrot.slane %v395_v57, 4 }
 0x252   :  { %v397_v59 = vadd.f32 %v396_v58, %v395_v57 }
 0x254   :  { %v398_v60 = vrot.slane %v397_v59, 2 }
 0x256   :  { %v399_v46 = vadd.f32 %v398_v60, %v397_v59 }
 0x258   :  { %v400_v61 = vrot.slane %v399_v46, 1 }
 0x25a   :  { %v401_v62 = vadd.f32 %v400_v61, %v399_v46 }
 0x25c   :  { %404 = vperm.xlu0 %514, %v401_v62  }
 0x2d7   :  { %v405_v2 = vpop.permute.xlu0 %404 }
 0x2d8   :  { %407 = vst [vmem:[%s741_s3] sm:$0x1] %v405_v2 }

// kernel: t5_loss.3
= control target key start
LH: loop header
LB: loop body
LE: loop exit
PB: predicated region body
PF: predicated region fallthrough
CT: control target
= control target key end

     0   :  { %v2930_v0 = vmov 0   ;;  %v43_v19 = vlaneseq  ;;  %v2931_v28 = vmov 0.0   ;;  %v2932_v43 = vmov 1.0|1.0   ;;  %s2935_s18 = smov 32   ;;  %s2936_s19 = smov 64   ;;  %s3677_s0 = inlined_call_operand.vmem [shape: s32[32,1], index: 0, kind: input, shape index: {}]   ;;  %s3678_s2 = inlined_call_operand.vmem [shape: bf16[384,128], index: 2, kind: input, shape index: {}]   ;;  %s3679_s1 = inlined_call_operand.vmem [shape: s32[2,16], index: 1, kind: input, shape index: {}]   ;;  %s3680_s5 = inlined_call_operand.vmem [shape: bf16[128,384], index: 5, kind: input, shape index: {}]   ;;  %s3681_s4 = inlined_call_operand.vmem [shape: f32[1,128], index: 4, kind: input, shape index: {}]   ;;  %s3682_s3 = inlined_call_operand.vmem [shape: f32[4,16,16], index: 3, kind: input, shape index: {}]   ;;  %s3683_s6 = inlined_call_operand.vmem [shape: bf16[128,128], index: 6, kind: input, shape index: {}]   ;;  %s3684_s8 = inlined_call_operand.vmem [shape: bf16[128,256], index: 8, kind: input, shape index: {}]   ;;  %s3685_s9 = inlined_call_operand.vmem [shape: bf16[256,128], index: 9, kind: input, shape index: {}]   ;;  %s3686_s7 = inlined_call_operand.vmem [shape: f32[1,128], index: 7, kind: input, shape index: {}]   ;;  %s3687_s10 = inlined_call_operand.vmem [shape: f32[1,128], index: 10, kind: input, shape index: {}]   ;;  %s3688_s11 = inlined_call_operand.vmem [shape: f32[32,128], index: 11, kind: output, shape index: {}]  }
   0x1   :  { %2737 = vset.pattern.permute.xlu1 %v2930_v0  ;;  %2736 = vset.pattern.permute.xlu0 %v2930_v0  ;;  %v41_v1 = vld [vmem:[%s3677_s0 + $0x10] sm:$0xff]  ;;  %v39_v2 = vld [vmem:[%s3677_s0] sm:$0xff]  ;;  %v42_v3 = vld [vmem:[%s3677_s0 + $0x18] sm:$0xff] }
   0x2   :  { %54 = vperm.xlu1 %2737, %v41_v1   ;;  %48 = vperm.xlu0 %2736, %v39_v2   ;;  %v40_v4 = vld [vmem:[%s3677_s0 + $0x8] sm:$0xff]  ;;  %v2738_v5 = vld [vmem:[%s3678_s2 + $0x78] sm:$0xff]   ;;  %v2741_v8 = vld [vmem:[%s3678_s2 + $0x70] sm:$0xff]   ;;  %v3056_v21 = vshrl.u32 %v43_v19, 7  ;;  %v44_v36 = vand.u32 127, %v43_v19 }
   0x3   :  { %v2739_v6 = vld [vmem:[%s3678_s2 + $0xb8] sm:$0xff]   ;;  %2455 = vmatprep.subr.bf16.mxu0 %v2738_v5  ;;  %v2742_v9 = vld [vmem:[%s3678_s2 + $0xb0] sm:$0xff]   ;;  %v2744_v11 = vld [vmem:[%s3678_s2 + $0x68] sm:$0xff]  }
   0x4   :  { %v2740_v7 = vld [vmem:[%s3678_s2 + $0x38] sm:$0xff]   ;;  %2573 = vmatprep.subr.bf16.mxu1 %v2739_v6  ;;  %v2743_v10 = vld [vmem:[%s3678_s2 + $0x30] sm:$0xff]   ;;  %v2745_v12 = vld [vmem:[%s3678_s2 + $0xa8] sm:$0xff]   ;;  %v1243_v24 = vsub.s32 1, %v3056_v21  ;;  %v45_v39 = vadd.s32 128, %v44_v36  ;;  %v46_v40 = vadd.s32 256, %v44_v36 }
   0x5   :  { %2456 = vmatpush3.bf16.msra.mxu0 %v2740_v7  ;;  %2574 = vmatpush3.bf16.msra.mxu1 %v2739_v6  ;;  %v2746_v13 = vld [vmem:[%s3678_s2 + $0x28] sm:$0xff]   ;;  %v2747_v14 = vld [vmem:[%s3678_s2 + $0x60] sm:$0xff]   ;;  %v2750_v17 = vld [vmem:[%s3678_s2 + $0x58] sm:$0xff]  }
   0x6   :  { %57 = vperm.xlu1 %2737, %v42_v3   ;;  %51 = vperm.xlu0 %2736, %v40_v4   ;;  %v2748_v15 = vld [vmem:[%s3678_s2 + $0xa0] sm:$0xff]   ;;  %v2751_v18 = vld [vmem:[%s3678_s2 + $0x98] sm:$0xff]   ;;  %v2753_v22 = vld [vmem:[%s3678_s2 + $0x50] sm:$0xff]  }
   0x7   :  { %2457 = vmatprep.subr.bf16.mxu0 %v2741_v8  ;;  %2575 = vmatprep.subr.bf16.mxu1 %v2742_v9  ;;  %v2749_v16 = vld [vmem:[%s3678_s2 + $0x20] sm:$0xff]   ;;  %v2752_v20 = vld [vmem:[%s3678_s2 + $0x18] sm:$0xff]   ;;  %v2754_v23 = vld [vmem:[%s3678_s2 + $0x90] sm:$0xff]  }
   0x8   :  { %v391_v25 = vld [vmem:[%s3679_s1] sm:$0x3]  ;;  %v2755_v26 = vld [vmem:[%s3678_s2 + $0x10] sm:$0xff]   ;;  %v2756_v27 = vld [vmem:[%s3678_s2 + $0x48] sm:$0xff]  }
   0x9   :  { %2458 = vmatpush3.bf16.msra.mxu0 %v2743_v10  ;;  %2576 = vmatpush3.bf16.msra.mxu1 %v2742_v9  ;;  %vm392_vm0 = vcmp.ne.s32.totalorder %v391_v25, 0  ;;  %v2757_v30 = vld [vmem:[%s3678_s2 + $0x88] sm:$0xff]   ;;  %v2759_v33 = vld [vmem:[%s3678_s2 + $0x40] sm:$0xff]   ;;  %v2765_v8 = vld [vmem:[%s3680_s5 + $0x90] ss:$12 sps:$4 sm:$0xff]  }
   0xa   :  { %2459 = vmatprep.subr.bf16.mxu0 %v2744_v11  ;;  %2577 = vmatprep.subr.bf16.mxu1 %v2745_v12  ;;  %v3075_v29 = vsel %vm392_vm0, 1.0, %v2931_v28  ;;  %v2758_v32 = vld [vmem:[%s3678_s2 + $0x8] sm:$0xff]   ;;  %v2760_v34 = vld [vmem:[%s3678_s2 + $0x80] sm:$0xff]   ;;  %v2771_v10 = vld [vmem:[%s3680_s5 + $0xb0] ss:$12 sps:$4 sm:$0xff]  }
   0xb   :  { %v3081_v31 = vrot.slane %v3075_v29, %v1243_v24  ;;  %v2761_v35 = vld [vmem:[%s3678_s2] sm:$0xff]   ;;  %v2762_v44 = vld [vmem:[%s3680_s5 + $0xa8] ss:$12 sps:$4 sm:$0xff]   ;;  %v2764_v45 = vld [vmem:[%s3680_s5 + $0xac] ss:$12 sps:$4 sm:$0xff]  }
   0xc   :  { %v2767_v7 = vld [vmem:[%s3680_s5 + $0x94] ss:$12 sps:$4 sm:$0xff]   ;;  %v2770_v9 = vld [vmem:[%s3680_s5 + $0x7c] ss:$12 sps:$4 sm:$0xff]   ;;  %v2768_v11 = vld [vmem:[%s3680_s5 + $0x78] ss:$12 sps:$4 sm:$0xff]  }
   0xd   :  { %2460 = vmatpush3.bf16.msra.mxu0 %v2746_v13  ;;  %2578 = vmatpush3.bf16.msra.mxu1 %v2745_v12  ;;  %v2774_v12 = vld [vmem:[%s3680_s5 + $0x64] ss:$12 sps:$4 sm:$0xff]   ;;  %v2783_v19 = vld [vmem:[%s3680_s5 + $0x68] ss:$12 sps:$4 sm:$0xff]  }
   0xe   :  { %2461 = vmatprep.subr.bf16.mxu0 %v2747_v14  ;;  %2579 = vmatprep.subr.bf16.mxu1 %v2748_v15  ;;  %v2775_v13 = vld [vmem:[%s3680_s5 + $0x98] ss:$12 sps:$4 sm:$0xff]   ;;  %v2772_v14 = vld [vmem:[%s3680_s5 + $0x60] ss:$12 sps:$4 sm:$0xff]   ;;  %v2787_v24 = vld [vmem:[%s3680_s5 + $0x50] ss:$12 sps:$4 sm:$0xff]  }
   0xf   :  { %v2790_v25 = vld [vmem:[%s3680_s5 + $0x4] ss:$12 sps:$4 sm:$0xff]  }
  0x11   :  { %2462 = vmatpush3.bf16.msra.mxu0 %v2749_v16  ;;  %2580 = vmatpush3.bf16.msra.mxu1 %v2748_v15  ;;  %v2778_v15 = vld [vmem:[%s3680_s5 + $0x4c] ss:$12 sps:$4 sm:$0xff]  }
  0x12   :  { %2463 = vmatprep.subr.bf16.mxu0 %v2750_v17  ;;  %2581 = vmatprep.subr.bf16.mxu1 %v2751_v18  ;;  %v2779_v16 = vld [vmem:[%s3680_s5 + $0x80] ss:$12 sps:$4 sm:$0xff]   ;;  %v2776_v17 = vld [vmem:[%s3680_s5 + $0x48] ss:$12 sps:$4 sm:$0xff]  }
  0x15   :  { %2464 = vmatpush3.bf16.msra.mxu0 %v2752_v20  ;;  %2582 = vmatpush3.bf16.msra.mxu1 %v2751_v18  ;;  %v2782_v18 = vld [vmem:[%s3680_s5 + $0x34] ss:$12 sps:$4 sm:$0xff]   ;;  %v2780_v20 = vld [vmem:[%s3680_s5 + $0x30] ss:$12 sps:$4 sm:$0xff]  }
  0x16   :  { %2465 = vmatprep.subr.bf16.mxu0 %v2753_v22  ;;  %2583 = vmatprep.subr.bf16.mxu1 %v2754_v23  ;;  %v2784_v22 = vld [vmem:[%s3680_s5 + $0x18] ss:$12 sps:$4 sm:$0xff]  }
  0x19   :  { %2466 = vmatpush3.bf16.msra.mxu0 %v2755_v26  ;;  %2584 = vmatpush3.bf16.msra.mxu1 %v2754_v23  ;;  %v2786_v23 = vld [vmem:[%s3680_s5 + $0x1c] ss:$12 sps:$4 sm:$0xff]   ;;  %v2791_v26 = vld [vmem:[%s3680_s5 + $0x38] ss:$12 sps:$4 sm:$0xff]  }
  0x1a   :  { %2467 = vmatprep.subr.bf16.mxu0 %v2756_v27  ;;  %2585 = vmatprep.subr.bf16.mxu1 %v2757_v30  ;;  %v2788_v27 = vld [vmem:[%s3680_s5] ss:$12 sps:$4 sm:$0xff]  }
  0x1d   :  { %2468 = vmatpush3.bf16.msra.mxu0 %v2758_v32  ;;  %2586 = vmatpush3.bf16.msra.mxu1 %v2757_v30  ;;  %v2792_v30 = vld [vmem:[%s3680_s5 + $0x20] ss:$12 sps:$4 sm:$0xff]   ;;  %v2793_v32 = vld [vmem:[%s3680_s5 + $0x8] ss:$12 sps:$4 sm:$0xff]  }
  0x1e   :  { %2469 = vmatprep.subr.bf16.mxu0 %v2759_v33  ;;  %2587 = vmatprep.subr.bf16.mxu1 %v2760_v34 }
  0x21   :  { %2470 = vmatpush3.bf16.msra.mxu0 %v2761_v35  ;;  %2588 = vmatpush3.bf16.msra.mxu1 %v2760_v34 }
  0x22   :  { %597 = vmatprep.subr.bf16.mxu0 %v2764_v45  ;;  %2593 = vmatprep.subr.bf16.mxu1 %v2771_v10 }
  0x7d   :  { %v55_v37 = vpop.permute.xlu1 %54  ;;  %v49_v38 = vpop.permute.xlu0 %48 }
  0x7e   :  { %vm67_vm1 = vcmp.eq.s32.totalorder %v46_v40, %v55_v37  ;;  %vm59_vm2 = vcmp.eq.s32.totalorder %v44_v36, %v49_v38  ;;  %vm60_vm5 = vcmp.eq.s32.totalorder %v45_v39, %v49_v38  ;;  %vm66_vm9 = vcmp.eq.s32.totalorder %v45_v39, %v55_v37 }
  0x7f   :  { %vm61_vm12 = vcmp.eq.s32.totalorder %v46_v40, %v49_v38  ;;  %vm65_vm0 = vcmp.eq.s32.totalorder %v44_v36, %v55_v37 }
  0x81   :  { %v58_v41 = vpop.permute.xlu1 %57  ;;  %v52_v42 = vpop.permute.xlu0 %51 }
  0x82   :  { %vm62_vm3 = vcmp.eq.s32.totalorder %v44_v36, %v52_v42  ;;  %vm70_vm4 = vcmp.eq.s32.totalorder %v46_v40, %v58_v41  ;;  %vm63_vm6 = vcmp.eq.s32.totalorder %v45_v39, %v52_v42  ;;  %vm64_vm7 = vcmp.eq.s32.totalorder %v46_v40, %v52_v42 }
  0x83   :  { %vm2361_vm8 = vmpackc.low %vm62_vm3, %vm59_vm2  ;;  %vm69_vm10 = vcmp.eq.s32.totalorder %v45_v39, %v58_v41  ;;  %vm68_vm2 = vcmp.eq.s32.totalorder %v44_v36, %v58_v41 }
  0x84   :  { %vm2359_vm11 = vmpackc.low %vm63_vm6, %vm60_vm5  ;;  %vm765_vm5 = vcmask 130048   ;;  %vm970_vm6 = vcmask 523520  }
  0x85   :  { %2360 = vmatprep.mubr.msk.bf16.mxu0 %vm2359_vm11, %v2932_v43  ;;  %vm2367_vm13 = vmpackc.low %vm64_vm7, %vm61_vm12  ;;  %vm1104_vm7 = vcmask 785920  }
  0x86   :  { %2589 = vmatprep.mubr.msk.bf16.mxu1 %vm2367_vm13, %v2932_v43  ;;  %2362 = vmatmul.mubr.msk.bf16.vlgmr.msra.gmra.mxu0 %vm2361_vm8, %v2932_v43  ;;  %vm2369_vm14 = vmpackc.low %vm70_vm4, %vm67_vm1  ;;  %vm2933_vm1 = vmmov 0   ;;  %vm715_vm4 = vcmask 261120   ;;  %vm1238_vm8 = vcmask 1048320  }
  0x87   :  { %2590 = vmatmul.mubr.msk.bf16.vlgmr.msra.gmra.mxu1 %vm2369_vm14, %v2932_v43  ;;  %vm2363_vm15 = vmpackc.low %vm69_vm10, %vm66_vm9  ;;  %598 = vmatpush1.bf16.msra.mxu0 %v2762_v44 }
  0x88   :  { %2364 = vmatprep.mubr.msk.bf16.mxu0 %vm2363_vm15, %v2932_v43  ;;  %vm2365_vm3 = vmpackc.low %vm68_vm2, %vm65_vm0  ;;  %599 = vmatprep.subr.bf16.mxu0 %v2767_v7 }
  0x89   :  { %2594 = vmatpush3.bf16.msra.mxu1 %v2771_v10 }
  0x8a   :  { %2595 = vmatprep.subr.bf16.mxu1 %v2775_v13 }
  0x8b   :  { %600 = vmatpush1.bf16.msra.mxu0 %v2765_v8 }
  0x8c   :  { %601 = vmatprep.subr.bf16.mxu0 %v2770_v9 }
  0x8d   :  { %2596 = vmatpush3.bf16.msra.mxu1 %v2775_v13 }
  0x8e   :  { %2366 = vmatmul.mubr.msk.bf16.gmra.mxu0 %vm2365_vm3, %v2932_v43  ;;  %2597 = vmatprep.subr.bf16.mxu1 %v2779_v16 }
  0x8f   :  { %629 = vmatprep.mubr.bf16.mxu0 %v2930_v0  ;;  %602 = vmatpush1.bf16.msra.mxu0 %v2768_v11 }
  0x90   :  { %603 = vmatprep.subr.bf16.mxu0 %v2774_v12 }
  0x91   :  { %2598 = vmatpush3.bf16.msra.mxu1 %v2779_v16 }
  0x92   :  { %2599 = vmatprep.subr.bf16.mxu1 %v2783_v19 }
  0x93   :  { %604 = vmatpush1.bf16.msra.mxu0 %v2772_v14 }
  0x94   :  { %605 = vmatprep.subr.bf16.mxu0 %v2778_v15 }
  0x95   :  { %2600 = vmatpush3.bf16.msra.mxu1 %v2783_v19 }
  0x96   :  { %2601 = vmatprep.subr.bf16.mxu1 %v2787_v24 }
  0x97   :  { %606 = vmatpush1.bf16.msra.mxu0 %v2776_v17 }
  0x98   :  { %607 = vmatprep.subr.bf16.mxu0 %v2782_v18 }
  0x99   :  { %2602 = vmatpush3.bf16.msra.mxu1 %v2787_v24 }
  0x9a   :  { %2603 = vmatprep.subr.bf16.mxu1 %v2791_v26 }
  0x9b   :  { %608 = vmatpush1.bf16.msra.mxu0 %v2780_v20 }
  0x9c   :  { %609 = vmatprep.subr.bf16.mxu0 %v2786_v23 }
  0x9d   :  { %2604 = vmatpush3.bf16.msra.mxu1 %v2791_v26 }
  0x9e   :  { %2605 = vmatprep.subr.bf16.mxu1 %v2792_v30 }
  0x9f   :  { %610 = vmatpush1.bf16.msra.mxu0 %v2784_v22 }
  0xa0   :  { %611 = vmatprep.subr.bf16.mxu0 %v2790_v25 }
  0xa1   :  { %2606 = vmatpush3.bf16.msra.mxu1 %v2792_v30 }
  0xa2   :  { %2607 = vmatprep.subr.bf16.mxu1 %v2793_v32 }
  0xa3   :  { %612 = vmatpush1.bf16.msra.mxu0 %v2788_v27 }
  0xa4   :  { %2613 = vmatprep.subr.bf16.mxu0 %v2931_v28 }
  0xa5   :  { %2608 = vmatpush3.bf16.msra.mxu1 %v2793_v32 }
  0xa6   :  { %2625 = vmatprep.subr.bf16.mxu1 %v2931_v28 }
 0x146   :  { %v2471_v46 = vpop.f32.mrf.mxu0 }
 0x147   :  { %v2591_v47 = vpop.f32.mrf.mxu1 }
 0x148   :  { %v2472_v48 = vpop.f32.mrf.mxu0 }
 0x149   :  { %v2473_v49 = vadd.f32 %v2472_v48, %v2471_v46  ;;  %v376_v50 = vpop.f32.mrf.mxu1  ;;  %v2372_v48 = vld [vmem:[%s3681_s4] ss:$0 sm:$0xff]  ;;  %s2934_s4 = smov 96  }
 0x14a   :  { %v2474_v51 = vpop.f32.mrf.mxu0 }
 0x14b   :  { %v3103_v52 = vadd.f32 %v2473_v49, %v376_v50  ;;  %v2592_v53 = vpop.f32.mrf.mxu1 }
 0x14c   :  { %v2475_v54 = vpop.f32.mrf.mxu0 }
 0x14d   :  { %v2476_v55 = vadd.f32 %v2475_v54, %v2474_v51  ;;  %v396_v56 = vmul.f32 %v3103_v52, %v3103_v52  ;;  %v379_v57 = vpop.f32.mrf.mxu1 }
 0x14e   :  { %v2477_v58 = vpop.f32.mrf.mxu0 }
 0x14f   :  { %v3107_v59 = vadd.f32 %v2476_v55, %v379_v57  ;;  %400 = vadd.xlane.f32.xlu0 %v396_v56 }
 0x150   :  { %v2478_v60 = vpop.f32.mrf.mxu0 }
 0x151   :  { %v2479_v61 = vadd.f32 %v2478_v60, %v2477_v58  ;;  %v397_v62 = vmul.f32 %v3107_v59, %v3107_v59 }
 0x152   :  { %v2480_v63 = vpop.f32.mrf.mxu0 }
 0x153   :  { %v3111_v1 = vadd.f32 %v2591_v47, %v2479_v61  ;;  %402 = vadd.xlane.f32.xlu1 %v397_v62 }
 0x154   :  { %v2481_v2 = vpop.f32.mrf.mxu0 }
 0x155   :  { %v2482_v3 = vadd.f32 %v2481_v2, %v2480_v63  ;;  %v398_v4 = vmul.f32 %v3111_v1, %v3111_v1 }
 0x157   :  { %v3115_v5 = vadd.f32 %v2592_v53, %v2482_v3  ;;  %404 = vadd.xlane.f32.xlu0 %v398_v4 }
 0x159   :  { %v399_v6 = vmul.f32 %v3115_v5, %v3115_v5 }
 0x15b   :  { %406 = vadd.xlane.f32.xlu0 %v399_v6 }
 0x1d8   :  { %v401_v33 = vpop.xlane.xlu0 %400 }
 0x1d9   :  { %v409_v34 = vmul.f32 0.0078125, %v401_v33 }
 0x1db   :  { %v413_v35 = vadd.f32 1e-06, %v409_v34 }
 0x1dc   :  { %v403_v36 = vpop.xlane.xlu1 %402 }
 0x1dd   :  { %2842 = vrsqrt.f32 %v413_v35  ;;  %v410_v37 = vmul.f32 0.0078125, %v403_v36 }
 0x1df   :  { %v414_v38 = vadd.f32 1e-06, %v410_v37 }
 0x1e0   :  { %v405_v39 = vpop.xlane.xlu0 %404 }
 0x1e1   :  { %2844 = vrsqrt.f32 %v414_v38  ;;  %v411_v40 = vmul.f32 0.0078125, %v405_v39 }
 0x1e3   :  { %v415_v41 = vadd.f32 1e-06, %v411_v40 }
 0x1e4   :  { %v407_v42 = vpop.xlane.xlu0 %406 }
 0x1e5   :  { %2846 = vrsqrt.f32 %v415_v41  ;;  %v412_v43 = vmul.f32 0.0078125, %v407_v42 }
 0x1e7   :  { %v416_v44 = vadd.f32 1e-06, %v412_v43  ;;  %v709_v43 = vsub.s32 0, %v3056_v21 }
 0x1e9   :  { %2848 = vrsqrt.f32 %v416_v44  ;;  %v710_v44 = vrot.slane %v3075_v29, %v709_v43 }
 0x1ea   :  { %v2843_v45 = vpop.eup %2842 }
 0x1eb   :  { %v421_v46 = vmul.f32 %v2843_v45, %v3103_v52  ;;  %v711_v45 = vsub.f32 1.0, %v710_v44 }
 0x1ed   :  { %v431_v50 = vmul.f32 %v2372_v48, %v421_v46  ;;  %v3259_v46 = vld [vmem:[%s3682_s3] sm:$0xff] }
 0x1ee   :  { %v2845_v47 = vpop.eup %2844 }
 0x1ef   :  { %v422_v49 = vmul.f32 %v2845_v47, %v3107_v59  ;;  %v712_v47 = vmul.f32 -1e+09, %v711_v45 }
 0x1f1   :  { %v432_v51 = vmul.f32 %v2372_v48, %v422_v49 }
 0x1f2   :  { %v2847_v53 = vpop.eup %2846 }
 0x1f3   :  { %v435_v54 = vpack.c.bf16 %v432_v51, %v431_v50  ;;  %v423_v55 = vmul.f32 %v2847_v53, %v3111_v1  ;;  %v700_v51 = vld [vmem:[%s3682_s3 + $0x8] sm:$0xff] }
 0x1f5   :  { %630 = vmatmul.mubr.bf16.vlgmr.msra.gmra.mxu0 %v435_v54  ;;  %2609 = vmatprep.mubr.bf16.mxu1 %v435_v54  ;;  %v433_v58 = vmul.f32 %v2372_v48, %v423_v55 }
 0x1f6   :  { %v2849_v56 = vpop.eup %2848  ;;  %639 = vmatprep.mubr.bf16.mxu0 %v2930_v0 }
 0x1f7   :  { %v424_v57 = vmul.f32 %v2849_v56, %v3115_v5 }
 0x1f9   :  { %v434_v60 = vmul.f32 %v2372_v48, %v424_v57 }
 0x1fb   :  { %v436_v61 = vpack.c.bf16 %v434_v60, %v433_v58  ;;  %v701_v58 = vld [vmem:[%s3682_s3 + $0x10] sm:$0xff] }
 0x1fd   :  { %640 = vmatmul.mubr.bf16.gmra.mxu0 %v436_v61  ;;  %2610 = vmatmul.mubr.bf16.vlgmr.msra.gmra.mxu1 %v436_v61 }
 0x1fe   :  { %2615 = vmatprep.mubr.msk.bf16.mxu0 %vm2933_vm1, %v2931_v28  ;;  %2627 = vmatprep.mubr.msk.bf16.mxu1 %vm2933_vm1, %v2931_v28 }
 0x2b5   :  { %v631_v62 = vpop.f32.mrf.mxu0 }
 0x2b7   :  { %v633_v63 = vpop.f32.mrf.mxu0 }
 0x2b9   :  { %v635_v2 = vpop.f32.mrf.mxu0 }
 0x2ba   :  { %v713_v3 = vpack.c.bf16 %v635_v2, %v631_v62 }
 0x2bb   :  { %v637_v4 = vpop.f32.mrf.mxu0 }
 0x2bc   :  { %v714_v6 = vpack.c.bf16 %v637_v4, %v633_v63  ;;  %837 = vrot.lane.b32.xlu0 %v713_v3, %s2934_s4  ;;  %v702_v63 = vld [vmem:[%s3682_s3 + $0x18] sm:$0xff] }
 0x2bd   :  { %v641_v7 = vpop.f32.mrf.mxu0  ;;  %v2611_v8 = vpop.f32.mrf.mxu1 }
 0x2be   :  { %840 = vrot.lane.b32.xlu1 %v714_v6, %s2934_s4  ;;  %v720_v9 = vsel %vm715_vm4, %v714_v6, 0 }
 0x2bf   :  { %v643_v10 = vpop.f32.mrf.mxu0  ;;  %v684_v11 = vpop.f32.mrf.mxu1  ;;  %2614 = vmatpush3.bf16.xpose.msra.mxu0 %v720_v9 }
 0x2c0   :  { %1109 = vrot.lane.b32.xlu0 %v714_v6, %s2935_s18  ;;  %2619 = vmatprep.subr.bf16.mxu0 %v2931_v28 }
 0x2c1   :  { %v645_v12 = vpop.f32.mrf.mxu0  ;;  %v2612_v13 = vpop.f32.mrf.mxu1 }
 0x2c2   :  { %v3204_v14 = vpack.c.bf16 %v2612_v13, %v2611_v8  ;;  %975 = vrot.lane.b32.xlu1 %v714_v6, %s2936_s19  ;;  %v1247_v19 = vpack.c.bf16 %v645_v12, %v641_v7  ;;  %v703_v8 = vld [vmem:[%s3682_s3 + $0x20] sm:$0xff] }
 0x2c3   :  { %v647_v15 = vpop.f32.mrf.mxu0  ;;  %v687_v16 = vpop.f32.mrf.mxu1 }
 0x2c4   :  { %v1248_v17 = vpack.c.bf16 %v647_v15, %v643_v10  ;;  %v3207_v18 = vpack.c.bf16 %v687_v16, %v684_v11  ;;  %v704_v15 = vld [vmem:[%s3682_s3 + $0x28] sm:$0xff] }
 0x2c6   :  { %973 = vrot.lane.b32.xlu1 %v713_v3, %s2936_s19  ;;  %2616 = vmatmul.mubr.msk.bf16.vlgmr.msra.gmra.mxu0 %vm715_vm4, %v713_v3  ;;  %v1253_v33 = vsel %vm715_vm4, %v1248_v17, 0 }
 0x2c7   :  { %1372 = vrot.lane.b32.xlu0 %v1248_v17, %s2934_s4  ;;  %2620 = vmatpush3.bf16.msra.mxu0 %v3207_v18 }
 0x2c8   :  { %2621 = vmatprep.mubr.msk.bf16.mxu0 %vm2933_vm1, %v2931_v28  ;;  %2631 = vmatprep.subr.bf16.mxu0 %v2931_v28 }
 0x2ca   :  { %1107 = vrot.lane.b32.xlu1 %v713_v3, %s2935_s18 }
 0x2cb   :  { %1506 = vrot.lane.b32.xlu0 %v1248_v17, %s2936_s19 }
 0x2ce   :  { %1369 = vrot.lane.b32.xlu1 %v1247_v19, %s2934_s4 }
 0x2cf   :  { %1639 = vrot.lane.b32.xlu0 %v1248_v17, %s2935_s18 }
 0x2d2   :  { %1504 = vrot.lane.b32.xlu1 %v1247_v19, %s2936_s19 }
 0x2d6   :  { %1637 = vrot.lane.b32.xlu1 %v1247_v19, %s2935_s18 }
 0x32e   :  { %v838_v24 = vpop.permute.xlu0 %837 }
 0x330   :  { %v841_v20 = vpop.permute.xlu1 %840 }
 0x331   :  { %v846_v22 = vsel %vm715_vm4, %v841_v20, 0 }
 0x332   :  { %2626 = vmatpush3.bf16.xpose.msra.mxu1 %v846_v22  ;;  %v1110_v26 = vpop.permute.xlu0 %1109 }
 0x333   :  { %2637 = vmatprep.subr.bf16.mxu1 %v2931_v28  ;;  %v1115_v30 = vsel %vm715_vm4, %v1110_v26, 0 }
 0x334   :  { %v976_v23 = vpop.permute.xlu1 %975 }
 0x335   :  { %v981_v25 = vsel %vm715_vm4, %v976_v23, 0  ;;  %v705_v23 = vld [vmem:[%s3682_s3 + $0x30] sm:$0xff] }
 0x338   :  { %v974_v27 = vpop.permute.xlu1 %973 }
 0x339   :  { %2628 = vmatmul.mubr.msk.bf16.vlgmr.msra.gmra.mxu1 %vm715_vm4, %v838_v24  ;;  %v1373_v34 = vpop.permute.xlu0 %1372 }
 0x33a   :  { %2638 = vmatpush3.bf16.xpose.msra.mxu1 %v981_v25  ;;  %2639 = vmatprep.mubr.msk.bf16.mxu1 %vm2933_vm1, %v2931_v28  ;;  %v1378_v35 = vsel %vm715_vm4, %v1373_v34, 0 }
 0x33b   :  { %2649 = vmatprep.subr.bf16.mxu1 %v2931_v28 }
 0x33c   :  { %v1108_v32 = vpop.permute.xlu1 %1107 }
 0x33d   :  { %v1507_v36 = vpop.permute.xlu0 %1506 }
 0x33e   :  { %v1512_v38 = vsel %vm715_vm4, %v1507_v36, 0 }
 0x340   :  { %v1370_v37 = vpop.permute.xlu1 %1369 }
 0x341   :  { %2640 = vmatmul.mubr.msk.bf16.vlgmr.msra.gmra.mxu1 %vm715_vm4, %v974_v27  ;;  %v1640_v39 = vpop.permute.xlu0 %1639 }
 0x342   :  { %2650 = vmatpush3.bf16.xpose.msra.mxu1 %v1115_v30  ;;  %2651 = vmatprep.mubr.msk.bf16.mxu1 %vm2933_vm1, %v2931_v28  ;;  %v1645_v41 = vsel %vm715_vm4, %v1640_v39, 0 }
 0x343   :  { %2661 = vmatprep.subr.bf16.mxu1 %v2931_v28 }
 0x344   :  { %v1505_v40 = vpop.permute.xlu1 %1504 }
 0x348   :  { %v1638_v42 = vpop.permute.xlu1 %1637 }
 0x349   :  { %2652 = vmatmul.mubr.msk.bf16.vlgmr.msra.gmra.mxu1 %vm715_vm4, %v1108_v32  ;;  %v706_v32 = vld [vmem:[%s3682_s3 + $0x38] sm:$0xff] }
 0x34a   :  { %2662 = vmatpush3.bf16.xpose.msra.mxu1 %v1253_v33  ;;  %2663 = vmatprep.mubr.msk.bf16.mxu1 %vm2933_vm1, %v2931_v28 }
 0x34b   :  { %2673 = vmatprep.subr.bf16.mxu1 %v2931_v28 }
 0x351   :  { %2664 = vmatmul.mubr.msk.bf16.vlgmr.msra.gmra.mxu1 %vm715_vm4, %v1247_v19 }
 0x352   :  { %2674 = vmatpush3.bf16.xpose.msra.mxu1 %v1378_v35  ;;  %2675 = vmatprep.mubr.msk.bf16.mxu1 %vm2933_vm1, %v2931_v28 }
 0x353   :  { %2685 = vmatprep.subr.bf16.mxu1 %v2931_v28 }
 0x359   :  { %2676 = vmatmul.mubr.msk.bf16.vlgmr.msra.gmra.mxu1 %vm715_vm4, %v1370_v37 }
 0x35a   :  { %2686 = vmatpush3.bf16.xpose.msra.mxu1 %v1512_v38  ;;  %2687 = vmatprep.mubr.msk.bf16.mxu1 %vm2933_vm1, %v2931_v28 }
 0x35b   :  { %2697 = vmatprep.subr.bf16.mxu1 %v2931_v28 }
 0x361   :  { %2688 = vmatmul.mubr.msk.bf16.vlgmr.msra.gmra.mxu1 %vm715_vm4, %v1505_v40  ;;  %v1245_v40 = vsub.f32 1.0, %v3081_v31 }
 0x362   :  { %2698 = vmatpush3.bf16.xpose.msra.mxu1 %v1645_v41  ;;  %2699 = vmatprep.mubr.msk.bf16.mxu1 %vm2933_vm1, %v2931_v28 }
 0x363   :  { %v1246_v44 = vmul.f32 -1e+09, %v1245_v40 }
 0x369   :  { %2700 = vmatmul.mubr.msk.bf16.vlgmr.msra.gmra.mxu1 %vm715_vm4, %v1638_v42 }
 0x386   :  { %v756_v48 = vpop.f32.mrf.mxu0 }
 0x387   :  { %v757_v49 = vadd.f32 %v756_v48, %v3259_v46 }
 0x388   :  { %v2617_v50 = vpop.f32.mrf.mxu0 }
 0x389   :  { %v3265_v53 = vadd.f32 %v757_v49, %v712_v47 }
 0x38a   :  { %v759_v21 = vpop.f32.mrf.mxu0 }
 0x38b   :  { %v760_v29 = vadd.f32 %v759_v21, %v700_v51  ;;  %v766_v54 = vsel %vm765_vm5, %v3265_v53, -inf }
 0x38c   :  { %767 = vmax.xlane.f32.xlu0 %v766_v54  ;;  %v2618_v55 = vpop.f32.mrf.mxu0 }
 0x38d   :  { %v764_v56 = vadd.f32 %v760_v29, %v712_v47 }
 0x38f   :  { %v769_v57 = vsel %vm765_vm5, %v764_v56, -inf }
 0x390   :  { %770 = vmax.xlane.f32.xlu1 %v769_v57 }
 0x3f9   :  { %v882_v60 = vpop.f32.mrf.mxu1 }
 0x3fa   :  { %v883_v61 = vadd.f32 %v882_v60, %v701_v58 }
 0x3fb   :  { %v2629_v62 = vpop.f32.mrf.mxu1 }
 0x3fc   :  { %v3276_v2 = vadd.f32 %v883_v61, %v712_v47 }
 0x3fd   :  { %v885_v3 = vpop.f32.mrf.mxu1 }
 0x3fe   :  { %v886_v4 = vadd.f32 %v885_v3, %v702_v63  ;;  %v891_v6 = vsel %vm765_vm5, %v3276_v2, -inf }
 0x3ff   :  { %892 = vmax.xlane.f32.xlu0 %v891_v6  ;;  %v2630_v7 = vpop.f32.mrf.mxu1 }
 0x400   :  { %v3283_v9 = vadd.f32 %v886_v4, %v712_v47 }
 0x401   :  { %v1017_v10 = vpop.f32.mrf.mxu1 }
 0x402   :  { %v1018_v11 = vadd.f32 %v1017_v10, %v703_v8  ;;  %v894_v12 = vsel %vm765_vm5, %v3283_v9, -inf }
 0x403   :  { %895 = vmax.xlane.f32.xlu0 %v894_v12  ;;  %v2641_v13 = vpop.f32.mrf.mxu1 }
 0x404   :  { %v3290_v16 = vadd.f32 %v1018_v11, %v712_v47 }
 0x405   :  { %v1020_v17 = vpop.f32.mrf.mxu1 }
 0x406   :  { %v1021_v19 = vadd.f32 %v1020_v17, %v704_v15  ;;  %v1026_v20 = vsel %vm765_vm5, %v3290_v16, -inf }
 0x407   :  { %1027 = vmax.xlane.f32.xlu1 %v1026_v20  ;;  %v2642_v22 = vpop.f32.mrf.mxu1 }
 0x408   :  { %v3297_v24 = vadd.f32 %v1021_v19, %v712_v47 }
 0x409   :  { %v1151_v25 = vpop.f32.mrf.mxu1 }
 0x40a   :  { %v1152_v26 = vadd.f32 %v1151_v25, %v705_v23  ;;  %v1029_v27 = vsel %vm765_vm5, %v3297_v24, -inf }
 0x40b   :  { %1030 = vmax.xlane.f32.xlu0 %v1029_v27  ;;  %v2653_v30 = vpop.f32.mrf.mxu1 }
 0x40c   :  { %v3304_v33 = vadd.f32 %v1152_v26, %v712_v47 }
 0x40d   :  { %v1154_v34 = vpop.f32.mrf.mxu1 }
 0x40e   :  { %v1155_v35 = vadd.f32 %v1154_v34, %v706_v32  ;;  %v1160_v36 = vsel %vm765_vm5, %v3304_v33, -inf }
 0x40f   :  { %1161 = vmax.xlane.f32.xlu1 %v1160_v36  ;;  %v2654_v37 = vpop.f32.mrf.mxu1 }
 0x410   :  { %v3308_v38 = vadd.f32 %v1155_v35, %v712_v47 }
 0x411   :  { %v1289_v39 = vpop.f32.mrf.mxu1 }
 0x412   :  { %v1163_v41 = vsel %vm765_vm5, %v3308_v38, -inf  ;;  %v1290_v35 = vadd.f32 %v1289_v39, %v3259_v46 }
 0x413   :  { %1164 = vmax.xlane.f32.xlu0 %v1163_v41  ;;  %v2665_v42 = vpop.f32.mrf.mxu1 }
 0x414   :  { %v1296_v37 = vadd.f32 %v1290_v35, %v1246_v44 }
 0x415   :  { %v1292_v43 = vpop.f32.mrf.mxu1  ;;  %v768_v30 = vpop.xlane.xlu0 %767 }
 0x416   :  { %v1293_v45 = vadd.f32 %v1292_v43, %v700_v51  ;;  %v772_v34 = vsub.f32 %v3265_v53, %v768_v30 }
 0x417   :  { %v2666_v48 = vpop.f32.mrf.mxu1 }
 0x418   :  { %v3313_v49 = vadd.f32 %v1293_v45, %v1246_v44  ;;  %v774_v36 = vmul.f32 1.442695, %v772_v34 }
 0x419   :  { %v771_v50 = vpop.xlane.xlu1 %770  ;;  %v1414_v21 = vpop.f32.mrf.mxu1 }
 0x41a   :  { %v773_v29 = vsub.f32 %v764_v56, %v771_v50  ;;  %v1415_v54 = vadd.f32 %v1414_v21, %v701_v58  ;;  %v1301_v47 = vsel %vm765_vm5, %v3313_v49, -inf }
 0x41b   :  { %1302 = vmax.xlane.f32.xlu0 %v1301_v47  ;;  %v2677_v31 = vpop.f32.mrf.mxu1 }
 0x41c   :  { %v776_v55 = vmul.f32 1.442695, %v773_v29  ;;  %v3317_v57 = vadd.f32 %v1415_v54, %v1246_v44 }
 0x41d   :  { %v1417_v60 = vpop.f32.mrf.mxu1 }
 0x41e   :  { %2850 = vpow2.f32 %v776_v55  ;;  %v1418_v61 = vadd.f32 %v1417_v60, %v702_v63  ;;  %v1423_v40 = vsel %vm765_vm5, %v3317_v57, -inf }
 0x41f   :  { %v2678_v62 = vpop.f32.mrf.mxu1  ;;  %2852 = vpow2.f32 %v774_v36 }
 0x420   :  { %915 = vrot.lane.b32.xlu1 %v3207_v18, %s2934_s4  ;;  %v3321_v51 = vadd.f32 %v1418_v61, %v1246_v44 }
 0x421   :  { %v1548_v3 = vpop.f32.mrf.mxu1 }
 0x422   :  { %v1549_v56 = vadd.f32 %v1548_v3, %v703_v8  ;;  %v1426_v58 = vsel %vm765_vm5, %v3321_v51, -inf }
 0x423   :  { %1427 = vmax.xlane.f32.xlu0 %v1426_v58  ;;  %v2689_v4 = vpop.f32.mrf.mxu1 }
 0x424   :  { %v3325_v6 = vadd.f32 %v1549_v56, %v1246_v44 }
 0x425   :  { %v1551_v7 = vpop.f32.mrf.mxu1 }
 0x426   :  { %v1552_v10 = vadd.f32 %v1551_v7, %v704_v15  ;;  %v1557_v41 = vsel %vm765_vm5, %v3325_v6, -inf }
 0x427   :  { %v2690_v11 = vpop.f32.mrf.mxu1 }
 0x428   :  { %v3327_v12 = vadd.f32 %v1552_v10, %v1246_v44 }
 0x429   :  { %v1681_v63 = vpop.f32.mrf.mxu1 }
 0x42a   :  { %v1682_v13 = vadd.f32 %v1681_v63, %v705_v23  ;;  %v1560_v17 = vsel %vm765_vm5, %v3327_v12, -inf }
 0x42b   :  { %v3331_v19 = vpop.eup %2850  ;;  %1561 = vmax.xlane.f32.xlu0 %v1560_v17  ;;  %v2701_v8 = vpop.f32.mrf.mxu1 }
 0x42c   :  { %v3333_v20 = vadd.f32 %v1682_v13, %v1246_v44  ;;  %v781_v26 = vsel %vm765_vm5, %v3331_v19, 0.0  ;;  %v3348_v42 = vpop.eup %2852 }
 0x42d   :  { %v1684_v22 = vpop.f32.mrf.mxu1  ;;  %v778_v53 = vsel %vm765_vm5, %v3348_v42, 0.0 }
 0x42e   :  { %v1685_v25 = vadd.f32 %v1684_v22, %v706_v32  ;;  %v1298_v32 = vsel %vm765_vm5, %v1296_v37, -inf  ;;  %v1690_v46 = vsel %vm765_vm5, %v3333_v20, -inf }
 0x42f   :  { %782 = vadd.xlane.f32.xlu0 %v781_v26  ;;  %v2702_v15 = vpop.f32.mrf.mxu1 }
 0x430   :  { %v3337_v27 = vadd.f32 %v1685_v25, %v1246_v44 }
 0x432   :  { %v1693_v23 = vsel %vm765_vm5, %v3337_v27, -inf }
 0x433   :  { %1694 = vmax.xlane.f32.xlu0 %v1693_v23 }
 0x444   :  { %1299 = vmax.xlane.f32.xlu1 %v1298_v32 }
 0x448   :  { %1424 = vmax.xlane.f32.xlu1 %v1423_v40 }
 0x44c   :  { %1558 = vmax.xlane.f32.xlu1 %v1557_v41 }
 0x450   :  { %779 = vadd.xlane.f32.xlu1 %v778_v53 }
 0x454   :  { %1691 = vmax.xlane.f32.xlu1 %v1690_v46 }
 0x488   :  { %v893_v39 = vpop.xlane.xlu0 %892 }
 0x489   :  { %v897_v43 = vsub.f32 %v3276_v2, %v893_v39 }
 0x48b   :  { %v899_v44 = vmul.f32 1.442695, %v897_v43 }
 0x48c   :  { %v896_v45 = vpop.xlane.xlu0 %895 }
 0x48d   :  { %2854 = vpow2.f32 %v899_v44  ;;  %v898_v48 = vsub.f32 %v3283_v9, %v896_v45 }
 0x48f   :  { %v901_v50 = vmul.f32 1.442695, %v898_v48 }
 0x490   :  { %v1028_v2 = vpop.xlane.xlu1 %1027 }
 0x491   :  { %2856 = vpow2.f32 %v901_v50  ;;  %v1032_v9 = vsub.f32 %v3290_v16, %v1028_v2 }
 0x493   :  { %v1034_v61 = vmul.f32 1.442695, %v1032_v9 }
 0x494   :  { %v1031_v31 = vpop.xlane.xlu0 %1030 }
 0x495   :  { %v1033_v60 = vsub.f32 %v3297_v24, %v1031_v31  ;;  %2858 = vpow2.f32 %v1034_v61 }
 0x497   :  { %v1036_v56 = vmul.f32 1.442695, %v1033_v60 }
 0x498   :  { %v1162_v55 = vpop.xlane.xlu1 %1161 }
 0x499   :  { %v1166_v62 = vsub.f32 %v3304_v33, %v1162_v55  ;;  %2860 = vpow2.f32 %v1036_v56 }
 0x49a   :  { %v3356_v21 = vpop.eup %2854 }
 0x49b   :  { %v903_v29 = vsel %vm765_vm5, %v3356_v21, 0.0  ;;  %v1168_v58 = vmul.f32 1.442695, %v1166_v62 }
 0x49c   :  { %904 = vadd.xlane.f32.xlu1 %v903_v29  ;;  %v1165_v3 = vpop.xlane.xlu0 %1164  ;;  %v3373_v11 = vpop.permute.xlu1 %915 }
 0x49d   :  { %v1167_v4 = vsub.f32 %v3308_v38, %v1165_v3  ;;  %2862 = vpow2.f32 %v1168_v58 }
 0x49e   :  { %v3360_v54 = vpop.eup %2856 }
 0x49f   :  { %v906_v47 = vsel %vm765_vm5, %v3360_v54, 0.0  ;;  %v1170_v10 = vmul.f32 1.442695, %v1167_v4 }
 0x4a0   :  { %907 = vadd.xlane.f32.xlu0 %v906_v47 }
 0x4a1   :  { %2864 = vpow2.f32 %v1170_v10 }
 0x4a2   :  { %v3375_v63 = vpop.eup %2858 }
 0x4a3   :  { %v1038_v25 = vsel %vm765_vm5, %v3375_v63, 0.0 }
 0x4a4   :  { %v1303_v7 = vpop.xlane.xlu0 %1302 }
 0x4a6   :  { %v3377_v8 = vpop.eup %2860 }
 0x4a7   :  { %v1041_v30 = vsel %vm765_vm5, %v3377_v8, 0.0 }
 0x4ac   :  { %v1428_v24 = vpop.xlane.xlu0 %1427 }
 0x4ad   :  { %1183 = vrot.lane.b32.xlu1 %v3207_v18, %s2935_s18  ;;  %v1430_v38 = vsub.f32 %v3321_v51, %v1428_v24 }
 0x4af   :  { %v1433_v34 = vmul.f32 1.442695, %v1430_v38 }
 0x4b4   :  { %v1562_v33 = vpop.xlane.xlu0 %1561 }
 0x4b5   :  { %v1564_v35 = vsub.f32 %v3327_v12, %v1562_v33 }
 0x4b6   :  { %1049 = vrot.lane.b32.xlu0 %v3207_v18, %s2936_s19  ;;  %v1305_v18 = vsub.f32 %v3313_v49, %v1303_v7  ;;  %v3382_v49 = vpop.eup %2862 }
 0x4b7   :  { %v1172_v51 = vsel %vm765_vm5, %v3382_v49, 0.0  ;;  %v1567_v40 = vmul.f32 1.442695, %v1564_v35 }
 0x4b8   :  { %v1308_v16 = vmul.f32 1.442695, %v1305_v18  ;;  %v783_v23 = vpop.xlane.xlu0 %782 }
 0x4ba   :  { %2866 = vpow2.f32 %v1308_v16 }
 0x4bc   :  { %v1695_v53 = vpop.xlane.xlu0 %1694 }
 0x4bd   :  { %v1697_v46 = vsub.f32 %v3337_v27, %v1695_v53 }
 0x4bf   :  { %v1700_v48 = vmul.f32 1.442695, %v1697_v46 }
 0x4cd   :  { %v1300_v13 = vpop.xlane.xlu1 %1299 }
 0x4ce   :  { %v1304_v17 = vsub.f32 %v1296_v37, %v1300_v13  ;;  %v3390_v37 = vpop.eup %2864 }
 0x4cf   :  { %v3394_v41 = vpop.eup %2866 }
 0x4d0   :  { %v1306_v22 = vmul.f32 1.442695, %v1304_v17  ;;  %v1313_v39 = vsel %vm765_vm5, %v3394_v41, 0.0 }
 0x4d1   :  { %v1425_v26 = vpop.xlane.xlu1 %1424  ;;  %1039 = vadd.xlane.f32.xlu1 %v1038_v25 }
 0x4d2   :  { %2868 = vpow2.f32 %v1306_v22  ;;  %v1429_v15 = vsub.f32 %v3317_v57, %v1425_v26  ;;  %v1175_v57 = vsel %vm765_vm5, %v3390_v37, 0.0 }
 0x4d4   :  { %v1431_v36 = vmul.f32 1.442695, %v1429_v15 }
 0x4d5   :  { %v1559_v32 = vpop.xlane.xlu1 %1558  ;;  %1173 = vadd.xlane.f32.xlu1 %v1172_v51  ;;  %1042 = vadd.xlane.f32.xlu0 %v1041_v30 }
 0x4d6   :  { %2870 = vpow2.f32 %v1431_v36  ;;  %v1563_v4 = vsub.f32 %v3325_v6, %v1559_v32 }
 0x4d7   :  { %2872 = vpow2.f32 %v1433_v34 }
 0x4d8   :  { %2874 = vrcp.f32 %v783_v23  ;;  %v1565_v7 = vmul.f32 1.442695, %v1563_v4 }
 0x4d9   :  { %v780_v12 = vpop.xlane.xlu1 %779  ;;  %1176 = vadd.xlane.f32.xlu0 %v1175_v57 }
 0x4da   :  { %2876 = vrcp.f32 %v780_v12 }
 0x4db   :  { %2878 = vpow2.f32 %v1567_v40 }
 0x4dd   :  { %v1692_v43 = vpop.xlane.xlu1 %1691  ;;  %1314 = vadd.xlane.f32.xlu0 %v1313_v39 }
 0x4de   :  { %v1696_v44 = vsub.f32 %v3333_v20, %v1692_v43 }
 0x4df   :  { %v3400_v45 = vpop.eup %2868 }
 0x4e0   :  { %v1698_v50 = vmul.f32 1.442695, %v1696_v44  ;;  %v1310_v29 = vsel %vm765_vm5, %v3400_v45, 0.0 }
 0x4e1   :  { %1311 = vadd.xlane.f32.xlu1 %v1310_v29 }
 0x4e2   :  { %2880 = vpow2.f32 %v1698_v50 }
 0x4e3   :  { %v3404_v47 = vpop.eup %2870  ;;  %2882 = vpow2.f32 %v1700_v48 }
 0x4e4   :  { %v1435_v27 = vsel %vm765_vm5, %v3404_v47, 0.0  ;;  %v3408_v2 = vpop.eup %2872  ;;  %2884 = vpow2.f32 %v1565_v7 }
 0x4e5   :  { %1436 = vadd.xlane.f32.xlu0 %v1435_v27  ;;  %v2875_v9 = vpop.eup %2874  ;;  %v1438_v31 = vsel %vm765_vm5, %v3408_v2, 0.0 }
 0x4e6   :  { %v787_v61 = vmul.f32 %v2875_v9, %v3331_v19 }
 0x4e7   :  { %v2877_v20 = vpop.eup %2876 }
 0x4e8   :  { %v3412_v55 = vpop.eup %2878  ;;  %v786_v60 = vmul.f32 %v2877_v20, %v3348_v42 }
 0x4e9   :  { %1439 = vadd.xlane.f32.xlu0 %v1438_v31  ;;  %v1572_v3 = vsel %vm765_vm5, %v3412_v55, 0.0 }
 0x4ea   :  { %v788_v62 = vpack.c.bf16 %v787_v61, %v786_v60 }
 0x4ec   :  { %2622 = vmatmul.mubr.msk.bf16.vlgmr.msra.gmra.mxu0 %vm765_vm5, %v788_v62 }
 0x4ed   :  { %1573 = vadd.xlane.f32.xlu0 %v1572_v3  ;;  %2632 = vmatpush3.bf16.msra.mxu0 %v3373_v11 }
 0x4ee   :  { %2633 = vmatprep.mubr.msk.bf16.mxu0 %vm2933_vm1, %v2931_v28  ;;  %2643 = vmatprep.subr.bf16.mxu0 %v2931_v28 }
 0x4ef   :  { %v3422_v56 = vpop.eup %2880 }
 0x4f0   :  { %v1702_v42 = vsel %vm765_vm5, %v3422_v56, 0.0  ;;  %v3427_v19 = vpop.eup %2882 }
 0x4f1   :  { %1703 = vadd.xlane.f32.xlu0 %v1702_v42  ;;  %v1705_v58 = vsel %vm765_vm5, %v3427_v19, 0.0  ;;  %v3436_v10 = vpop.eup %2884 }
 0x4f2   :  { %1447 = vrot.lane.b32.xlu1 %v3204_v14, %s2934_s4  ;;  %v1569_v18 = vsel %vm765_vm5, %v3436_v10, 0.0 }
 0x4f5   :  { %1706 = vadd.xlane.f32.xlu0 %v1705_v58 }
 0x50b   :  { %1580 = vrot.lane.b32.xlu0 %v3204_v14, %s2936_s19 }
 0x516   :  { %1570 = vadd.xlane.f32.xlu1 %v1569_v18 }
 0x525   :  { %v905_v16 = vpop.xlane.xlu1 %904 }
 0x526   :  { %2886 = vrcp.f32 %v905_v16 }
 0x527   :  { %1713 = vrot.lane.b32.xlu1 %v3204_v14, %s2935_s18 }
 0x529   :  { %v908_v11 = vpop.xlane.xlu0 %907  ;;  %v1184_v22 = vpop.permute.xlu1 %1183 }
 0x52a   :  { %2888 = vrcp.f32 %v908_v11 }
 0x52d   :  { %v1050_v38 = vpop.permute.xlu0 %1049 }
 0x533   :  { %v2887_v24 = vpop.eup %2886 }
 0x534   :  { %v911_v33 = vmul.f32 %v2887_v24, %v3356_v21 }
 0x537   :  { %v2889_v6 = vpop.eup %2888 }
 0x538   :  { %v912_v13 = vmul.f32 %v2889_v6, %v3360_v54 }
 0x53a   :  { %v913_v17 = vpack.c.bf16 %v912_v13, %v911_v33 }
 0x53c   :  { %2634 = vmatmul.mubr.msk.bf16.vlgmr.msra.gmra.mxu0 %vm765_vm5, %v913_v17 }
 0x53d   :  { %2644 = vmatpush3.bf16.msra.mxu0 %v1050_v38  ;;  %2645 = vmatprep.mubr.msk.bf16.mxu0 %vm2933_vm1, %v2931_v28 }
 0x53e   :  { %2655 = vmatprep.subr.bf16.mxu0 %v2931_v28 }
 0x55a   :  { %v1040_v25 = vpop.xlane.xlu1 %1039 }
 0x55b   :  { %2890 = vrcp.f32 %v1040_v25 }
 0x55e   :  { %v1043_v26 = vpop.xlane.xlu0 %1042  ;;  %v1174_v23 = vpop.xlane.xlu1 %1173 }
 0x55f   :  { %2892 = vrcp.f32 %v1043_v26 }
 0x562   :  { %v1177_v15 = vpop.xlane.xlu0 %1176 }
 0x563   :  { %2894 = vrcp.f32 %v1177_v15 }
 0x564   :  { %2896 = vrcp.f32 %v1174_v23  ;;  %v2794_v23 = vld [vmem:[%s3683_s6 + $0x38] sm:$0xff]  }
 0x565   :  { %2709 = vmatprep.subr.bf16.mxu1 %v2794_v23 }
 0x566   :  { %v1315_v21 = vpop.xlane.xlu0 %1314  ;;  %2710 = vmatpush3.bf16.msra.mxu1 %v2794_v23  ;;  %v2819_v23 = vld [vmem:[%s3684_s8 + $0x24] ss:$8 sps:$4 sm:$0xff]  }
 0x568   :  { %v2891_v30 = vpop.eup %2890 }
 0x569   :  { %v1046_v36 = vmul.f32 %v2891_v30, %v3375_v63  ;;  %v2796_v30 = vld [vmem:[%s3683_s6 + $0x28] sm:$0xff]  }
 0x56a   :  { %v1312_v54 = vpop.xlane.xlu1 %1311 }
 0x56b   :  { %2898 = vrcp.f32 %v1312_v54  ;;  %v2795_v54 = vld [vmem:[%s3683_s6 + $0x30] sm:$0xff]  }
 0x56c   :  { %v2893_v34 = vpop.eup %2892  ;;  %2900 = vrcp.f32 %v1315_v21  ;;  %2711 = vmatprep.subr.bf16.mxu1 %v2795_v54 }
 0x56d   :  { %v1047_v51 = vmul.f32 %v2893_v34, %v3377_v8  ;;  %2712 = vmatpush3.bf16.msra.mxu1 %v2795_v54  ;;  %v2822_v54 = vld [vmem:[%s3684_s8 + $0x14] ss:$8 sps:$4 sm:$0xff]  }
 0x56e   :  { %v1437_v35 = vpop.xlane.xlu0 %1436  ;;  %v1448_v29 = vpop.permute.xlu1 %1447  ;;  %2713 = vmatprep.subr.bf16.mxu1 %v2796_v30 }
 0x56f   :  { %v1048_v32 = vpack.c.bf16 %v1047_v51, %v1046_v36 }
 0x570   :  { %v2895_v40 = vpop.eup %2894 }
 0x571   :  { %2646 = vmatmul.mubr.msk.bf16.vlgmr.msra.gmra.mxu0 %vm765_vm5, %v1048_v32  ;;  %v2897_v53 = vpop.eup %2896  ;;  %v1181_v12 = vmul.f32 %v2895_v40, %v3390_v37  ;;  %2714 = vmatpush3.bf16.msra.mxu1 %v2796_v30  ;;  %v2820_v30 = vld [vmem:[%s3684_s8 + $0x10] ss:$8 sps:$4 sm:$0xff]  }
 0x572   :  { %v1440_v57 = vpop.xlane.xlu0 %1439  ;;  %2656 = vmatpush3.bf16.msra.mxu0 %v1184_v22  ;;  %2657 = vmatprep.mubr.msk.bf16.mxu0 %vm2933_vm1, %v2931_v28  ;;  %v1180_v63 = vmul.f32 %v2897_v53, %v3382_v49  ;;  %v2798_v53 = vld [vmem:[%s3683_s6 + $0x18] sm:$0xff]  }
 0x573   :  { %2902 = vrcp.f32 %v1440_v57  ;;  %2667 = vmatprep.subr.bf16.mxu0 %v2931_v28  ;;  %v2797_v57 = vld [vmem:[%s3683_s6 + $0x20] sm:$0xff]  }
 0x574   :  { %2904 = vrcp.f32 %v1437_v35  ;;  %v1182_v8 = vpack.c.bf16 %v1181_v12, %v1180_v63  ;;  %2715 = vmatprep.subr.bf16.mxu1 %v2797_v57  ;;  %v2799_v12 = vld [vmem:[%s3683_s6 + $0x10] sm:$0xff]  }
 0x575   :  { %2716 = vmatpush3.bf16.msra.mxu1 %v2797_v57  ;;  %v2830_v57 = vld [vmem:[%s3685_s9 + $0x68] sm:$0xff]  }
 0x576   :  { %v1574_v46 = vpop.xlane.xlu0 %1573  ;;  %2717 = vmatprep.subr.bf16.mxu1 %v2798_v53 }
 0x577   :  { %2906 = vrcp.f32 %v1574_v46 }
 0x578   :  { %v2899_v39 = vpop.eup %2898 }
 0x579   :  { %2658 = vmatmul.mubr.msk.bf16.vlgmr.msra.gmra.mxu0 %vm765_vm5, %v1182_v8  ;;  %v2901_v43 = vpop.eup %2900  ;;  %v1318_v44 = vmul.f32 %v2899_v39, %v3400_v45  ;;  %2718 = vmatpush3.bf16.msra.mxu1 %v2798_v53  ;;  %v2800_v8 = vld [vmem:[%s3683_s6 + $0x8] sm:$0xff]   ;;  %v2801_v39 = vld [vmem:[%s3683_s6] sm:$0xff]  }
 0x57a   :  { %2668 = vmatpush3.bf16.msra.mxu0 %v3204_v14  ;;  %2669 = vmatprep.mubr.msk.bf16.mxu0 %vm2933_vm1, %v2931_v28  ;;  %v1704_v48 = vpop.xlane.xlu0 %1703  ;;  %v1319_v37 = vmul.f32 %v2901_v43, %v3394_v41  ;;  %v2831_v53 = vld [vmem:[%s3685_s9 + $0x28] sm:$0xff]  }
 0x57b   :  { %2679 = vmatprep.subr.bf16.mxu0 %v2931_v28  ;;  %2719 = vmatprep.subr.bf16.mxu1 %v2799_v12 }
 0x57c   :  { %v1320_v50 = vpack.c.bf16 %v1319_v37, %v1318_v44 }
 0x57d   :  { %2720 = vmatpush3.bf16.msra.mxu1 %v2799_v12  ;;  %v2832_v12 = vld [vmem:[%s3685_s9 + $0x60] sm:$0xff]  }
 0x57e   :  { %v1707_v14 = vpop.xlane.xlu0 %1706  ;;  %2721 = vmatprep.subr.bf16.mxu1 %v2800_v8 }
 0x580   :  { %v2903_v49 = vpop.eup %2902 }
 0x581   :  { %2670 = vmatmul.mubr.msk.bf16.vlgmr.msra.gmra.mxu0 %vm765_vm5, %v1320_v50  ;;  %v2905_v27 = vpop.eup %2904  ;;  %v1444_v9 = vmul.f32 %v2903_v49, %v3408_v2  ;;  %2722 = vmatpush3.bf16.msra.mxu1 %v2800_v8  ;;  %v2835_v8 = vld [vmem:[%s3685_s9 + $0x18] sm:$0xff]  }
 0x582   :  { %2680 = vmatpush3.bf16.msra.mxu0 %v1448_v29  ;;  %2681 = vmatprep.mubr.msk.bf16.mxu0 %vm2933_vm1, %v2931_v28  ;;  %v1443_v45 = vmul.f32 %v2905_v27, %v3404_v47  ;;  %v1581_v31 = vpop.permute.xlu0 %1580 }
 0x583   :  { %2691 = vmatprep.subr.bf16.mxu0 %v2931_v28  ;;  %2723 = vmatprep.subr.bf16.mxu1 %v2801_v39 }
 0x584   :  { %v1445_v20 = vpack.c.bf16 %v1444_v9, %v1443_v45  ;;  %v2907_v60 = vpop.eup %2906 }
 0x585   :  { %v1578_v62 = vmul.f32 %v2907_v60, %v3412_v55  ;;  %2724 = vmatpush3.bf16.msra.mxu1 %v2801_v39 }
 0x589   :  { %2682 = vmatmul.mubr.msk.bf16.vlgmr.msra.gmra.mxu0 %vm765_vm5, %v1445_v20 }
 0x58a   :  { %2692 = vmatpush3.bf16.msra.mxu0 %v1581_v31  ;;  %2693 = vmatprep.mubr.msk.bf16.mxu0 %vm2933_vm1, %v2931_v28 }
 0x58b   :  { %2703 = vmatprep.subr.bf16.mxu0 %v2931_v28 }
 0x59f   :  { %v1571_v41 = vpop.xlane.xlu1 %1570 }
 0x5a0   :  { %2908 = vrcp.f32 %v1571_v41 }
 0x5a1   :  { %2910 = vrcp.f32 %v1707_v14 }
 0x5a2   :  { %2912 = vrcp.f32 %v1704_v48 }
 0x5a3   :  { %v1714_v7 = vpop.permute.xlu1 %1713 }
 0x5ac   :  { %v827_v2 = vpop.f32.mrf.mxu0 }
 0x5ad   :  { %v2909_v61 = vpop.eup %2908  ;;  %834 = vst.msk [vmem:[#allocation2] sm:$0xff] %vm715_vm4, %v827_v2 }
 0x5ae   :  { %v1577_v47 = vmul.f32 %v2909_v61, %v3436_v10  ;;  %v2623_v3 = vpop.f32.mrf.mxu0  ;;  %v2911_v58 = vpop.eup %2910 }
 0x5af   :  { %v2913_v18 = vpop.eup %2912  ;;  %v1711_v11 = vmul.f32 %v2911_v58, %v3427_v19 }
 0x5b0   :  { %v1579_v42 = vpack.c.bf16 %v1578_v62, %v1577_v47  ;;  %v830_v4 = vpop.f32.mrf.mxu0  ;;  %v1710_v10 = vmul.f32 %v2913_v18, %v3422_v56  ;;  %v2802_v18 = vld [vmem:[%s3684_s8 + $0x70] ss:$8 sps:$4 sm:$0xff]  }
 0x5b1   :  { %835 = vst.msk [vmem:[#allocation2 + $0x8] sm:$0xff] %vm715_vm4, %v830_v4 }
 0x5b2   :  { %2694 = vmatmul.mubr.msk.bf16.vlgmr.msra.gmra.mxu0 %vm765_vm5, %v1579_v42  ;;  %v2624_v16 = vpop.f32.mrf.mxu0  ;;  %v1712_v55 = vpack.c.bf16 %v1711_v11, %v1710_v10 }
 0x5b3   :  { %2704 = vmatpush3.bf16.msra.mxu0 %v1714_v7  ;;  %2705 = vmatprep.mubr.msk.bf16.mxu0 %vm2933_vm1, %v2931_v28  ;;  %v2804_v16 = vld [vmem:[%s3684_s8 + $0x74] ss:$8 sps:$4 sm:$0xff]  }
 0x5b4   :  { %2030 = vmatprep.subr.bf16.mxu0 %v2804_v16 }
 0x5ba   :  { %2706 = vmatmul.mubr.msk.bf16.vlgmr.msra.gmra.mxu0 %vm765_vm5, %v1712_v55 }
 0x5bb   :  { %2062 = vmatprep.mubr.bf16.mxu0 %v2930_v0  ;;  %2031 = vmatpush1.bf16.msra.mxu0 %v2802_v18 }
 0x5fc   :  { %v955_v24 = vpop.f32.mrf.mxu0 }
 0x5fd   :  { %964 = vrot.lane.b32.xlu1 %v955_v24, %s2935_s18 }
 0x5fe   :  { %v2635_v6 = vpop.f32.mrf.mxu0 }
 0x600   :  { %v958_v33 = vpop.f32.mrf.mxu0 }
 0x601   :  { %966 = vrot.lane.b32.xlu1 %v958_v33, %s2935_s18 }
 0x602   :  { %v2636_v13 = vpop.f32.mrf.mxu0 }
 0x631   :  { %v1089_v17 = vpop.f32.mrf.mxu0 }
 0x632   :  { %1098 = vrot.lane.b32.xlu1 %v1089_v17, %s2936_s19 }
 0x633   :  { %v2647_v28 = vpop.f32.mrf.mxu0 }
 0x635   :  { %v1092_v19 = vpop.f32.mrf.mxu0 }
 0x636   :  { %1100 = vrot.lane.b32.xlu1 %v1092_v19, %s2936_s19 }
 0x637   :  { %v2648_v56 = vpop.f32.mrf.mxu0 }
 0x638   :  { %v2810_v56 = vld [vmem:[%s3684_s8 + $0x54] ss:$8 sps:$4 sm:$0xff]  }
 0x639   :  { %v1223_v38 = vpop.f32.mrf.mxu0 }
 0x63a   :  { %1232 = vrot.lane.b32.xlu0 %v1223_v38, %s2934_s4  ;;  %v2808_v38 = vld [vmem:[%s3684_s8 + $0x50] ss:$8 sps:$4 sm:$0xff]  }
 0x63b   :  { %v2659_v22 = vpop.f32.mrf.mxu0 }
 0x63c   :  { %v2813_v22 = vld [vmem:[%s3684_s8 + $0x44] ss:$8 sps:$4 sm:$0xff]  }
 0x63d   :  { %v1226_v25 = vpop.f32.mrf.mxu0 }
 0x63e   :  { %1234 = vrot.lane.b32.xlu1 %v1226_v25, %s2934_s4  ;;  %v2811_v25 = vld [vmem:[%s3684_s8 + $0x40] ss:$8 sps:$4 sm:$0xff]  }
 0x63f   :  { %v2660_v26 = vpop.f32.mrf.mxu0 }
 0x640   :  { %v2816_v26 = vld [vmem:[%s3684_s8 + $0x34] ss:$8 sps:$4 sm:$0xff]  }
 0x641   :  { %v1359_v15 = vpop.f32.mrf.mxu0 }
 0x642   :  { %1366 = vst.msk [vmem:[#allocation2 + $0x10] sm:$0xff] %vm715_vm4, %v1359_v15  ;;  %v2814_v15 = vld [vmem:[%s3684_s8 + $0x30] ss:$8 sps:$4 sm:$0xff]  }
 0x643   :  { %v2671_v21 = vpop.f32.mrf.mxu0 }
 0x644   :  { %v2817_v21 = vld [vmem:[%s3684_s8 + $0x20] ss:$8 sps:$4 sm:$0xff]  }
 0x645   :  { %v1362_v34 = vpop.f32.mrf.mxu0 }
 0x646   :  { %1367 = vst.msk [vmem:[#allocation2 + $0x18] sm:$0xff] %vm715_vm4, %v1362_v34  ;;  %v2825_v34 = vld [vmem:[%s3684_s8 + $0x4] ss:$8 sps:$4 sm:$0xff]  }
 0x647   :  { %v2672_v35 = vpop.f32.mrf.mxu0 }
 0x648   :  { %v2823_v35 = vld [vmem:[%s3684_s8] ss:$8 sps:$4 sm:$0xff]  }
 0x649   :  { %v1487_v36 = vpop.f32.mrf.mxu0 }
 0x64a   :  { %1496 = vrot.lane.b32.xlu0 %v1487_v36, %s2935_s18  ;;  %v2826_v36 = vld [vmem:[%s3685_s9 + $0x78] sm:$0xff]  }
 0x64b   :  { %v2683_v51 = vpop.f32.mrf.mxu0  ;;  %2545 = vmatprep.subr.bf16.mxu1 %v2826_v36 }
 0x64c   :  { %v2827_v51 = vld [vmem:[%s3685_s9 + $0x38] sm:$0xff]  }
 0x64d   :  { %v1490_v32 = vpop.f32.mrf.mxu0 }
 0x64e   :  { %1498 = vrot.lane.b32.xlu1 %v1490_v32, %s2935_s18  ;;  %v2828_v32 = vld [vmem:[%s3685_s9 + $0x70] sm:$0xff]  }
 0x64f   :  { %v2684_v40 = vpop.f32.mrf.mxu0 }
 0x650   :  { %v2829_v40 = vld [vmem:[%s3685_s9 + $0x30] sm:$0xff]  }
 0x66f   :  { %v965_v63 = vpop.permute.xlu1 %964 }
 0x670   :  { %971 = vst.msk [vmem:[#allocation2] sm:$0xff] %vm970_vm6, %v965_v63  ;;  %v2833_v63 = vld [vmem:[%s3685_s9 + $0x20] sm:$0xff]  }
 0x672   :  { %v1620_v46 = vpop.f32.mrf.mxu0 }
 0x673   :  { %v967_v43 = vpop.permute.xlu1 %966  ;;  %1629 = vrot.lane.b32.xlu0 %v1620_v46, %s2936_s19  ;;  %v2834_v46 = vld [vmem:[%s3685_s9 + $0x58] sm:$0xff]  }
 0x674   :  { %972 = vst.msk [vmem:[#allocation2 + $0x8] sm:$0xff] %vm970_vm6, %v967_v43  ;;  %v2695_v44 = vpop.f32.mrf.mxu0 }
 0x676   :  { %v1623_v48 = vpop.f32.mrf.mxu0 }
 0x677   :  { %1631 = vrot.lane.b32.xlu1 %v1623_v48, %s2936_s19 }
 0x678   :  { %v2696_v37 = vpop.f32.mrf.mxu0 }
 0x67a   :  { %v1753_v50 = vpop.f32.mrf.mxu0 }
 0x67b   :  { %1762 = vrot.lane.b32.xlu0 %v1753_v50, %s2934_s4 }
 0x67c   :  { %v2707_v49 = vpop.f32.mrf.mxu0 }
 0x67e   :  { %v1756_v29 = vpop.f32.mrf.mxu0 }
 0x67f   :  { %1764 = vrot.lane.b32.xlu1 %v1756_v29, %s2934_s4 }
 0x680   :  { %v2708_v27 = vpop.f32.mrf.mxu0 }
 0x6a4   :  { %v1099_v14 = vpop.permute.xlu1 %1098 }
 0x6a5   :  { %1105 = vst.msk [vmem:[#allocation2] sm:$0xff] %vm1104_vm7, %v1099_v14 }
 0x6a8   :  { %v1101_v9 = vpop.permute.xlu1 %1100 }
 0x6a9   :  { %1106 = vst.msk [vmem:[#allocation2 + $0x8] sm:$0xff] %vm1104_vm7, %v1101_v9 }
 0x6ac   :  { %v1233_v45 = vpop.permute.xlu0 %1232 }
 0x6ad   :  { %1239 = vst.msk [vmem:[#allocation2] sm:$0xff] %vm1238_vm8, %v1233_v45 }
 0x6b0   :  { %v1235_v20 = vpop.permute.xlu1 %1234 }
 0x6b1   :  { %1240 = vst.msk [vmem:[#allocation2 + $0x8] sm:$0xff] %vm1238_vm8, %v1235_v20 }
 0x6b4   :  { %v1770_v31 = vld [vmem:[#allocation2] sm:$0xff] }
 0x6b8   :  { %v1771_v41 = vld [vmem:[#allocation2 + $0x8] sm:$0xff] }
 0x6b9   :  { %v1774_v60 = vpack.c.bf16 %v1771_v41, %v1770_v31 }
 0x6bb   :  { %2725 = vmatprep.mubr.bf16.mxu1 %v1774_v60  ;;  %v2421_v60 = vld [vmem:[%s3686_s7] ss:$0 sm:$0xff] }
 0x6bc   :  { %v1497_v61 = vpop.permute.xlu0 %1496 }
 0x6bd   :  { %1502 = vst.msk [vmem:[#allocation2 + $0x10] sm:$0xff] %vm970_vm6, %v1497_v61 }
 0x6c0   :  { %v1499_v2 = vpop.permute.xlu1 %1498 }
 0x6c1   :  { %1503 = vst.msk [vmem:[#allocation2 + $0x18] sm:$0xff] %vm970_vm6, %v1499_v2 }
 0x6e5   :  { %v1630_v47 = vpop.permute.xlu0 %1629 }
 0x6e6   :  { %1635 = vst.msk [vmem:[#allocation2 + $0x10] sm:$0xff] %vm1104_vm7, %v1630_v47 }
 0x6e9   :  { %v1632_v62 = vpop.permute.xlu1 %1631 }
 0x6ea   :  { %1636 = vst.msk [vmem:[#allocation2 + $0x18] sm:$0xff] %vm1104_vm7, %v1632_v62 }
 0x6ed   :  { %v1763_v3 = vpop.permute.xlu0 %1762 }
 0x6ee   :  { %1768 = vst.msk [vmem:[#allocation2 + $0x10] sm:$0xff] %vm1238_vm8, %v1763_v3 }
 0x6f1   :  { %v1765_v42 = vpop.permute.xlu1 %1764 }
 0x6f2   :  { %1769 = vst.msk [vmem:[#allocation2 + $0x18] sm:$0xff] %vm1238_vm8, %v1765_v42 }
 0x6f5   :  { %v1772_v58 = vld [vmem:[#allocation2 + $0x10] sm:$0xff] }
 0x6f9   :  { %v1773_v4 = vld [vmem:[#allocation2 + $0x18] sm:$0xff] }
 0x6fa   :  { %v1775_v7 = vpack.c.bf16 %v1773_v4, %v1772_v58 }
 0x6fc   :  { %2726 = vmatmul.mubr.bf16.vlgmr.msra.gmra.mxu1 %v1775_v7 }
 0x6fd   :  { %2546 = vmatpush3.bf16.msra.mxu1 %v2827_v51 }
 0x6fe   :  { %2547 = vmatprep.subr.bf16.mxu1 %v2828_v32 }
 0x701   :  { %2548 = vmatpush3.bf16.msra.mxu1 %v2829_v40 }
 0x702   :  { %2549 = vmatprep.subr.bf16.mxu1 %v2830_v57 }
 0x705   :  { %2550 = vmatpush3.bf16.msra.mxu1 %v2831_v53 }
 0x706   :  { %2551 = vmatprep.subr.bf16.mxu1 %v2832_v12 }
 0x709   :  { %2552 = vmatpush3.bf16.msra.mxu1 %v2833_v63 }
 0x70a   :  { %2553 = vmatprep.subr.bf16.mxu1 %v2834_v46 }
 0x70d   :  { %2554 = vmatpush3.bf16.msra.mxu1 %v2835_v8 }
 0x7bc   :  { %v2727_v11 = vpop.f32.mrf.mxu1 }
 0x7bd   :  { %v3544_v6 = vadd.f32 %v2727_v11, %v3111_v1  ;;  %v2836_v11 = vld [vmem:[%s3685_s9 + $0x50] sm:$0xff]  }
 0x7be   :  { %v1874_v10 = vpop.f32.mrf.mxu1  ;;  %2555 = vmatprep.subr.bf16.mxu1 %v2836_v11 }
 0x7bf   :  { %v3541_v55 = vadd.f32 %v1874_v10, %v3103_v52  ;;  %v1896_v19 = vmul.f32 %v3544_v6, %v3544_v6  ;;  %v2837_v10 = vld [vmem:[%s3685_s9 + $0x10] sm:$0xff]  }
 0x7c0   :  { %v2728_v24 = vpop.f32.mrf.mxu1  ;;  %2556 = vmatpush3.bf16.msra.mxu1 %v2837_v10 }
 0x7c1   :  { %v1894_v33 = vmul.f32 %v3541_v55, %v3541_v55  ;;  %v3552_v28 = vadd.f32 %v2728_v24, %v3115_v5  ;;  %v2805_v5 = vld [vmem:[%s3684_s8 + $0x60] ss:$8 sps:$4 sm:$0xff]  }
 0x7c2   :  { %v1877_v13 = vpop.f32.mrf.mxu1  ;;  %v2838_v24 = vld [vmem:[%s3685_s9 + $0x48] sm:$0xff]  }
 0x7c3   :  { %v3549_v17 = vadd.f32 %v1877_v13, %v3107_v59  ;;  %1898 = vadd.xlane.f32.xlu0 %v1894_v33  ;;  %v1897_v1 = vmul.f32 %v3552_v28, %v3552_v28  ;;  %v2807_v59 = vld [vmem:[%s3684_s8 + $0x64] ss:$8 sps:$4 sm:$0xff]   ;;  %2557 = vmatprep.subr.bf16.mxu1 %v2838_v24 }
 0x7c4   :  { %2032 = vmatprep.subr.bf16.mxu0 %v2807_v59  ;;  %v2840_v33 = vld [vmem:[%s3685_s9 + $0x40] sm:$0xff]  }
 0x7c5   :  { %v1895_v52 = vmul.f32 %v3549_v17, %v3549_v17  ;;  %2033 = vmatpush1.bf16.msra.mxu0 %v2805_v5  ;;  %v2841_v13 = vld [vmem:[%s3685_s9] sm:$0xff]  }
 0x7c6   :  { %2034 = vmatprep.subr.bf16.mxu0 %v2810_v56 }
 0x7c7   :  { %1902 = vadd.xlane.f32.xlu0 %v1896_v19  ;;  %1900 = vadd.xlane.f32.xlu1 %v1895_v52 }
 0x7c9   :  { %2035 = vmatpush1.bf16.msra.mxu0 %v2808_v38 }
 0x7ca   :  { %2036 = vmatprep.subr.bf16.mxu0 %v2813_v22 }
 0x7cb   :  { %1904 = vadd.xlane.f32.xlu0 %v1897_v1 }
 0x7cd   :  { %2037 = vmatpush1.bf16.msra.mxu0 %v2811_v25 }
 0x7ce   :  { %2038 = vmatprep.subr.bf16.mxu0 %v2816_v26 }
 0x7d1   :  { %2039 = vmatpush1.bf16.msra.mxu0 %v2814_v15 }
 0x7d2   :  { %2040 = vmatprep.subr.bf16.mxu0 %v2819_v23 }
 0x7d5   :  { %2041 = vmatpush1.bf16.msra.mxu0 %v2817_v21 }
 0x7d6   :  { %2042 = vmatprep.subr.bf16.mxu0 %v2822_v54 }
 0x7d9   :  { %2043 = vmatpush1.bf16.msra.mxu0 %v2820_v30 }
 0x7da   :  { %2044 = vmatprep.subr.bf16.mxu0 %v2825_v34 }
 0x7dd   :  { %2045 = vmatpush1.bf16.msra.mxu0 %v2823_v35 }
 0x84c   :  { %v1899_v39 = vpop.xlane.xlu0 %1898 }
 0x84d   :  { %v1906_v43 = vmul.f32 0.0078125, %v1899_v39 }
 0x84f   :  { %v1910_v44 = vadd.f32 1e-06, %v1906_v43 }
 0x850   :  { %v1903_v48 = vpop.xlane.xlu0 %1902  ;;  %v1901_v37 = vpop.xlane.xlu1 %1900 }
 0x851   :  { %v1907_v50 = vmul.f32 0.0078125, %v1901_v37  ;;  %2914 = vrsqrt.f32 %v1910_v44  ;;  %v1908_v49 = vmul.f32 0.0078125, %v1903_v48 }
 0x853   :  { %v1911_v29 = vadd.f32 1e-06, %v1907_v50  ;;  %v1912_v9 = vadd.f32 1e-06, %v1908_v49 }
 0x854   :  { %v1905_v27 = vpop.xlane.xlu0 %1904 }
 0x855   :  { %v1909_v14 = vmul.f32 0.0078125, %v1905_v27  ;;  %2916 = vrsqrt.f32 %v1911_v29 }
 0x857   :  { %v1913_v45 = vadd.f32 1e-06, %v1909_v14 }
 0x859   :  { %2918 = vrsqrt.f32 %v1913_v45 }
 0x85a   :  { %2920 = vrsqrt.f32 %v1912_v9 }
 0x85e   :  { %v2915_v20 = vpop.eup %2914 }
 0x85f   :  { %v1918_v31 = vmul.f32 %v2915_v20, %v3541_v55 }
 0x861   :  { %v1928_v47 = vmul.f32 %v2421_v60, %v1918_v31 }
 0x862   :  { %v2917_v41 = vpop.eup %2916 }
 0x863   :  { %v1919_v61 = vmul.f32 %v2917_v41, %v3549_v17 }
 0x865   :  { %v1929_v62 = vmul.f32 %v2421_v60, %v1919_v61 }
 0x866   :  { %v2919_v2 = vpop.eup %2918 }
 0x867   :  { %v2921_v3 = vpop.eup %2920  ;;  %v1932_v42 = vpack.c.bf16 %v1929_v62, %v1928_v47  ;;  %v1921_v58 = vmul.f32 %v2919_v2, %v3552_v28 }
 0x868   :  { %v1920_v4 = vmul.f32 %v2921_v3, %v3544_v6 }
 0x869   :  { %2063 = vmatmul.mubr.bf16.vlgmr.msra.gmra.mxu0 %v1932_v42  ;;  %v1931_v7 = vmul.f32 %v2421_v60, %v1921_v58  ;;  %v2454_v58 = vld [vmem:[%s3687_s10] ss:$0 sm:$0xff] }
 0x86a   :  { %2072 = vmatprep.mubr.bf16.mxu0 %v2930_v0  ;;  %v1930_v18 = vmul.f32 %v2421_v60, %v1920_v4  ;;  %v2839_v0 = vld [vmem:[%s3685_s9 + $0x8] sm:$0xff]  }
 0x86b   :  { %2558 = vmatpush3.bf16.msra.mxu1 %v2839_v0 }
 0x86c   :  { %v1933_v16 = vpack.c.bf16 %v1931_v7, %v1930_v18  ;;  %2559 = vmatprep.subr.bf16.mxu1 %v2840_v33 }
 0x86f   :  { %2560 = vmatpush3.bf16.msra.mxu1 %v2841_v13 }
 0x871   :  { %2073 = vmatmul.mubr.bf16.gmra.mxu0 %v1933_v16 }
 0x929   :  { %v2064_v19 = vpop.f32.mrf.mxu0 }
 0x92a   :  { %v2083_v22 = vmax.f32 %v2064_v19, 0.0 }
 0x92b   :  { %v2066_v52 = vpop.f32.mrf.mxu0 }
 0x92c   :  { %v2084_v56 = vmax.f32 %v2066_v52, 0.0 }
 0x92d   :  { %v2068_v1 = vpop.f32.mrf.mxu0 }
 0x92e   :  { %v2085_v59 = vmax.f32 %v2068_v1, 0.0 }
 0x92f   :  { %v2070_v5 = vpop.f32.mrf.mxu0 }
 0x930   :  { %v2086_v38 = vmax.f32 %v2070_v5, 0.0  ;;  %v2091_v15 = vpack.c.bf16 %v2085_v59, %v2083_v22 }
 0x931   :  { %v2074_v25 = vpop.f32.mrf.mxu0 }
 0x932   :  { %v2092_v26 = vpack.c.bf16 %v2086_v38, %v2084_v56  ;;  %v2087_v36 = vmax.f32 %v2074_v25, 0.0 }
 0x933   :  { %v2076_v23 = vpop.f32.mrf.mxu0 }
 0x934   :  { %2255 = vmatprep.mubr.bf16.mxu1 %v2092_v26  ;;  %v2088_v34 = vmax.f32 %v2076_v23, 0.0 }
 0x935   :  { %v2078_v21 = vpop.f32.mrf.mxu0  ;;  %2256 = vmatmul.mubr.bf16.vlgmr.msra.gmra.mxu1 %v2091_v15 }
 0x936   :  { %v2089_v54 = vmax.f32 %v2078_v21, 0.0 }
 0x937   :  { %v2080_v30 = vpop.f32.mrf.mxu0 }
 0x938   :  { %v2090_v35 = vmax.f32 %v2080_v30, 0.0  ;;  %v2093_v32 = vpack.c.bf16 %v2089_v54, %v2087_v36 }
 0x93a   :  { %v2094_v51 = vpack.c.bf16 %v2090_v35, %v2088_v34 }
 0x93c   :  { %2263 = vmatprep.mubr.bf16.mxu1 %v2094_v51 }
 0x93d   :  { %2264 = vmatmul.mubr.bf16.gmra.mxu1 %v2093_v32 }
 0x9f5   :  { %v2561_v40 = vpop.f32.mrf.mxu1 }
 0x9f7   :  { %v2562_v57 = vpop.f32.mrf.mxu1 }
 0x9f8   :  { %v2563_v53 = vadd.f32 %v2562_v57, %v2561_v40 }
 0x9f9   :  { %v2564_v12 = vpop.f32.mrf.mxu1 }
 0x9fa   :  { %v2272_v63 = vadd.f32 %v2563_v53, %v3541_v55 }
 0x9fb   :  { %v2565_v46 = vpop.f32.mrf.mxu1 }
 0x9fc   :  { %v2566_v8 = vadd.f32 %v2565_v46, %v2564_v12  ;;  %v2277_v39 = vmul.f32 %v2272_v63, %v2272_v63 }
 0x9fd   :  { %v2567_v43 = vpop.f32.mrf.mxu1 }
 0x9fe   :  { %v2273_v44 = vadd.f32 %v2566_v8, %v3549_v17  ;;  %2281 = vadd.xlane.f32.xlu1 %v2277_v39 }
 0x9ff   :  { %v2568_v48 = vpop.f32.mrf.mxu1 }
 0xa00   :  { %v2569_v37 = vadd.f32 %v2568_v48, %v2567_v43  ;;  %v2278_v50 = vmul.f32 %v2273_v44, %v2273_v44 }
 0xa01   :  { %v2570_v49 = vpop.f32.mrf.mxu1 }
 0xa02   :  { %v2274_v29 = vadd.f32 %v2569_v37, %v3544_v6  ;;  %2283 = vadd.xlane.f32.xlu0 %v2278_v50 }
 0xa03   :  { %v2571_v27 = vpop.f32.mrf.mxu1 }
 0xa04   :  { %v2572_v14 = vadd.f32 %v2571_v27, %v2570_v49  ;;  %v2279_v9 = vmul.f32 %v2274_v29, %v2274_v29 }
 0xa06   :  { %v2275_v45 = vadd.f32 %v2572_v14, %v3552_v28  ;;  %2285 = vadd.xlane.f32.xlu1 %v2279_v9 }
 0xa08   :  { %v2280_v55 = vmul.f32 %v2275_v45, %v2275_v45 }
 0xa0a   :  { %2287 = vadd.xlane.f32.xlu0 %v2280_v55 }
 0xa87   :  { %v2282_v20 = vpop.xlane.xlu1 %2281 }
 0xa88   :  { %v2289_v31 = vmul.f32 0.0078125, %v2282_v20 }
 0xa8a   :  { %v2293_v41 = vadd.f32 1e-06, %v2289_v31 }
 0xa8b   :  { %v2284_v17 = vpop.xlane.xlu0 %2283 }
 0xa8c   :  { %2922 = vrsqrt.f32 %v2293_v41  ;;  %v2290_v60 = vmul.f32 0.0078125, %v2284_v17 }
 0xa8e   :  { %v2294_v61 = vadd.f32 1e-06, %v2290_v60 }
 0xa8f   :  { %v2286_v2 = vpop.xlane.xlu1 %2285 }
 0xa90   :  { %2924 = vrsqrt.f32 %v2294_v61  ;;  %v2291_v47 = vmul.f32 0.0078125, %v2286_v2 }
 0xa92   :  { %v2295_v6 = vadd.f32 1e-06, %v2291_v47 }
 0xa93   :  { %v2288_v62 = vpop.xlane.xlu0 %2287 }
 0xa94   :  { %2926 = vrsqrt.f32 %v2295_v6  ;;  %v2292_v3 = vmul.f32 0.0078125, %v2288_v62 }
 0xa96   :  { %v2296_v42 = vadd.f32 1e-06, %v2292_v3 }
 0xa98   :  { %2928 = vrsqrt.f32 %v2296_v42 }
 0xa99   :  { %v2923_v28 = vpop.eup %2922 }
 0xa9a   :  { %v2301_v4 = vmul.f32 %v2923_v28, %v2272_v63 }
 0xa9c   :  { %v2311_v7 = vmul.f32 %v2454_v58, %v2301_v4 }
 0xa9d   :  { %v2925_v18 = vpop.eup %2924 }
 0xa9e   :  { %2315 = vst [vmem:[%s3688_s11] sm:$0xff] %v2311_v7  ;;  %v2302_v16 = vmul.f32 %v2925_v18, %v2273_v44 }
 0xaa0   :  { %v2312_v11 = vmul.f32 %v2454_v58, %v2302_v16 }
 0xaa1   :  { %v2927_v10 = vpop.eup %2926 }
 0xaa2   :  { %2316 = vst [vmem:[%s3688_s11 + $0x8] sm:$0xff] %v2312_v11  ;;  %v2303_v24 = vmul.f32 %v2927_v10, %v2274_v29 }
 0xaa4   :  { %v2313_v0 = vmul.f32 %v2454_v58, %v2303_v24 }
 0xaa5   :  { %v2929_v33 = vpop.eup %2928 }
 0xaa6   :  { %2317 = vst [vmem:[%s3688_s11 + $0x10] sm:$0xff] %v2313_v0  ;;  %v2304_v13 = vmul.f32 %v2929_v33, %v2275_v45 }
 0xaa8   :  { %v2314_v19 = vmul.f32 %v2454_v58, %v2304_v13 }
 0xaaa   :  { %2318 = vst [vmem:[%s3688_s11 + $0x18] sm:$0xff] %v2314_v19 }

// kernel: t5_loss.4
= control target key start
LH: loop header
LB: loop body
LE: loop exit
PB: predicated region body
PF: predicated region fallthrough
CT: control target
= control target key end

     0   :  { %v4215_v0 = vmov 0   ;;  %v4216_v3 = vmov 0.0   ;;  %vm4217_vm0 = vmmov 0   ;;  %v56_v28 = vlaneseq  ;;  %s4220_s17 = smov 32   ;;  %s4221_s18 = smov 64   ;;  %s5175_s0 = inlined_call_operand.vmem [shape: s32[16,1], index: 0, kind: input, shape index: {}]   ;;  %s5176_s4 = inlined_call_operand.vmem [shape: bf16[384,128], index: 4, kind: input, shape index: {}]   ;;  %s5177_s7 = inlined_call_operand.vmem [shape: bf16[128,384], index: 7, kind: input, shape index: {}]   ;;  %s5178_s6 = inlined_call_operand.vmem [shape: f32[1,128], index: 6, kind: input, shape index: {}]   ;;  %s5179_s1 = inlined_call_operand.vmem [shape: s32[2,8], index: 1, kind: input, shape index: {}]   ;;  %s5180_s5 = inlined_call_operand.vmem [shape: f32[4,8,8], index: 5, kind: input, shape index: {}]   ;;  %s5181_s8 = inlined_call_operand.vmem [shape: bf16[128,128], index: 8, kind: input, shape index: {}]   ;;  %s5182_s10 = inlined_call_operand.vmem [shape: bf16[128,384], index: 10, kind: input, shape index: {}]   ;;  %s5183_s3 = inlined_call_operand.vmem [shape: f32[32,128], index: 3, kind: input, shape index: {}]   ;;  %s5184_s9 = inlined_call_operand.vmem [shape: f32[1,128], index: 9, kind: input, shape index: {}]   ;;  %s5185_s2 = inlined_call_operand.vmem [shape: s32[2,16], index: 2, kind: input, shape index: {}]   ;;  %s5186_s11 = inlined_call_operand.vmem [shape: bf16[128,128], index: 11, kind: input, shape index: {}]   ;;  %s5187_s13 = inlined_call_operand.vmem [shape: bf16[128,256], index: 13, kind: input, shape index: {}]   ;;  %s5188_s14 = inlined_call_operand.vmem [shape: bf16[256,128], index: 14, kind: input, shape index: {}]   ;;  %s5189_s12 = inlined_call_operand.vmem [shape: f32[1,128], index: 12, kind: input, shape index: {}]   ;;  %s5190_s15 = inlined_call_operand.vmem [shape: f32[1,128], index: 15, kind: input, shape index: {}]   ;;  %s5191_s16 = inlined_call_operand.vmem [shape: f32[16,128], index: 16, kind: output, shape index: {}]  }
   0x1   :  { %5193 = sst [smem:[#allocation3_spill]] %s5175_s0  ;;  %3990 = vset.pattern.permute.xlu0 %v4215_v0  ;;  %3691 = vmatprep.subr.bf16.mxu1 %v4216_v3  ;;  %v3991_v4 = vld [vmem:[%s5176_s4 + $0x78] sm:$0xff]   ;;  %v3994_v7 = vld [vmem:[%s5176_s4 + $0x70] sm:$0xff]   ;;  %v3997_v10 = vld [vmem:[%s5176_s4 + $0x68] sm:$0xff]   ;;  %v4218_v34 = vmov 1.0|1.0  }
   0x2   :  { %s5194_s23 = sld [smem:[#allocation3_spill]]  ;;  %v3992_v5 = vld [vmem:[%s5176_s4 + $0xb8] sm:$0xff]   ;;  %3538 = vmatprep.subr.bf16.mxu0 %v3991_v4  ;;  %3707 = vmatprep.mubr.msk.bf16.mxu1 %vm4217_vm0, %v4216_v3  ;;  %v3995_v8 = vld [vmem:[%s5176_s4 + $0xb0] sm:$0xff]   ;;  %v3998_v11 = vld [vmem:[%s5176_s4 + $0xa8] sm:$0xff]   ;;  %v4398_v29 = vand.u32 127, %v56_v28  ;;  %vm656_vm10 = vcmask 261120  }
   0x3   :  { %v3993_v6 = vld [vmem:[%s5176_s4 + $0x38] sm:$0xff]   ;;  %3692 = vmatpush3.bf16.msra.mxu1 %v3992_v5  ;;  %v3996_v9 = vld [vmem:[%s5176_s4 + $0x30] sm:$0xff]   ;;  %v3999_v12 = vld [vmem:[%s5176_s4 + $0x28] sm:$0xff]   ;;  %vm721_vm11 = vcmask 1043456   ;;  %vm704_vm14 = vcmask 64512   ;;  %vm884_vm15 = vcmask 523520  }
   0x4   :  { %3539 = vmatpush3.bf16.msra.mxu0 %v3993_v6  ;;  %3693 = vmatprep.subr.bf16.mxu1 %v4216_v3  ;;  %v4000_v13 = vld [vmem:[%s5176_s4 + $0x60] sm:$0xff]   ;;  %v4003_v16 = vld [vmem:[%s5176_s4 + $0x58] sm:$0xff]   ;;  %v4006_v19 = vld [vmem:[%s5176_s4 + $0x50] sm:$0xff]   ;;  %v58_v31 = vadd.s32 128, %v4398_v29  ;;  %v59_v32 = vadd.s32 256, %v4398_v29 }
   0x5   :  { %3540 = vmatprep.subr.bf16.mxu0 %v3994_v7  ;;  %v4001_v14 = vld [vmem:[%s5176_s4 + $0xa0] sm:$0xff]   ;;  %v4004_v17 = vld [vmem:[%s5176_s4 + $0x98] sm:$0xff]   ;;  %v4007_v20 = vld [vmem:[%s5176_s4 + $0x90] sm:$0xff]  }
   0x6   :  { %v4002_v15 = vld [vmem:[%s5176_s4 + $0x20] sm:$0xff]   ;;  %v4005_v18 = vld [vmem:[%s5176_s4 + $0x18] sm:$0xff]   ;;  %v4008_v21 = vld [vmem:[%s5176_s4 + $0x10] sm:$0xff]  }
   0x7   :  { %3694 = vmatpush3.bf16.msra.mxu1 %v3995_v8  ;;  %v4009_v22 = vld [vmem:[%s5176_s4 + $0x48] sm:$0xff]   ;;  %v4012_v25 = vld [vmem:[%s5176_s4 + $0x40] sm:$0xff]   ;;  %v4018_v37 = vld [vmem:[%s5177_s7 + $0xb0] ss:$12 sps:$4 sm:$0xff]  }
   0x8   :  { %v54_v1 = vld [vmem:[%s5194_s23] sm:$0xff]  ;;  %v55_v2 = vld [vmem:[%s5194_s23 + $0x8] sm:$0xff]  ;;  %3541 = vmatpush3.bf16.msra.mxu0 %v3996_v9  ;;  %3695 = vmatprep.subr.bf16.mxu1 %v4216_v3  ;;  %v4019_v53 = vld [vmem:[%s5177_s7 + $0x90] ss:$12 sps:$4 sm:$0xff]  }
   0x9   :  { %61 = vperm.xlu0 %3990, %v54_v1   ;;  %3542 = vmatprep.subr.bf16.mxu0 %v3997_v10  ;;  %v4010_v23 = vld [vmem:[%s5176_s4 + $0x88] sm:$0xff]   ;;  %v4013_v26 = vld [vmem:[%s5176_s4 + $0x80] sm:$0xff]   ;;  %v4034_v63 = vld [vmem:[%s5177_s7 + $0x50] ss:$12 sps:$4 sm:$0xff]  }
   0xa   :  { %v4011_v24 = vld [vmem:[%s5176_s4 + $0x8] sm:$0xff]   ;;  %v4014_v27 = vld [vmem:[%s5176_s4] sm:$0xff]  }
   0xb   :  { %3696 = vmatpush3.bf16.msra.mxu1 %v3998_v11  ;;  %v4015_v35 = vld [vmem:[%s5177_s7 + $0xa8] ss:$12 sps:$4 sm:$0xff]   ;;  %v4017_v36 = vld [vmem:[%s5177_s7 + $0xac] ss:$12 sps:$4 sm:$0xff]   ;;  %v4029_v58 = vld [vmem:[%s5177_s7 + $0x64] ss:$12 sps:$4 sm:$0xff]  }
   0xc   :  { %3543 = vmatpush3.bf16.msra.mxu0 %v3999_v12  ;;  %3697 = vmatprep.subr.bf16.mxu1 %v4216_v3  ;;  %v4021_v52 = vld [vmem:[%s5177_s7 + $0x94] ss:$12 sps:$4 sm:$0xff]   ;;  %v4022_v54 = vld [vmem:[%s5177_s7 + $0x98] ss:$12 sps:$4 sm:$0xff]   ;;  %v4025_v55 = vld [vmem:[%s5177_s7 + $0x7c] ss:$12 sps:$4 sm:$0xff]  }
   0xd   :  { %64 = vperm.xlu0 %3990, %v55_v2   ;;  %3544 = vmatprep.subr.bf16.mxu0 %v4000_v13  ;;  %v4023_v56 = vld [vmem:[%s5177_s7 + $0x78] ss:$12 sps:$4 sm:$0xff]   ;;  %v4026_v57 = vld [vmem:[%s5177_s7 + $0x80] ss:$12 sps:$4 sm:$0xff]   ;;  %v4030_v60 = vld [vmem:[%s5177_s7 + $0x68] ss:$12 sps:$4 sm:$0xff]  }
   0xe   :  { %v4027_v59 = vld [vmem:[%s5177_s7 + $0x60] ss:$12 sps:$4 sm:$0xff]   ;;  %v4031_v62 = vld [vmem:[%s5177_s7 + $0x48] ss:$12 sps:$4 sm:$0xff]   ;;  %v4035_v2 = vld [vmem:[%s5177_s7 + $0x30] ss:$12 sps:$4 sm:$0xff]  }
   0xf   :  { %3698 = vmatpush3.bf16.msra.mxu1 %v4001_v14  ;;  %v4033_v61 = vld [vmem:[%s5177_s7 + $0x4c] ss:$12 sps:$4 sm:$0xff]   ;;  %v4037_v1 = vld [vmem:[%s5177_s7 + $0x34] ss:$12 sps:$4 sm:$0xff]   ;;  %v4041_v5 = vld [vmem:[%s5177_s7 + $0x1c] ss:$12 sps:$4 sm:$0xff]  }
  0x10   :  { %3545 = vmatpush3.bf16.msra.mxu0 %v4002_v15  ;;  %3699 = vmatprep.subr.bf16.mxu1 %v4216_v3  ;;  %v4038_v4 = vld [vmem:[%s5177_s7 + $0x38] ss:$12 sps:$4 sm:$0xff]   ;;  %v4042_v7 = vld [vmem:[%s5177_s7 + $0x20] ss:$12 sps:$4 sm:$0xff]   ;;  %v4046_v10 = vld [vmem:[%s5177_s7 + $0x8] ss:$12 sps:$4 sm:$0xff]  }
  0x11   :  { %3546 = vmatprep.subr.bf16.mxu0 %v4003_v16  ;;  %v4039_v6 = vld [vmem:[%s5177_s7 + $0x18] ss:$12 sps:$4 sm:$0xff]   ;;  %v4043_v9 = vld [vmem:[%s5177_s7] ss:$12 sps:$4 sm:$0xff]  }
  0x12   :  { %v4045_v8 = vld [vmem:[%s5177_s7 + $0x4] ss:$12 sps:$4 sm:$0xff]  }
  0x13   :  { %3700 = vmatpush3.bf16.msra.mxu1 %v4004_v17 }
  0x14   :  { %3547 = vmatpush3.bf16.msra.mxu0 %v4005_v18  ;;  %3701 = vmatprep.subr.bf16.mxu1 %v4216_v3 }
  0x15   :  { %3548 = vmatprep.subr.bf16.mxu0 %v4006_v19 }
  0x17   :  { %3702 = vmatpush3.bf16.msra.mxu1 %v4007_v20  ;;  %v3405_v20 = vld [vmem:[%s5178_s6] ss:$0 sm:$0xff]  ;;  %s4219_s6 = smov 96  }
  0x18   :  { %3549 = vmatpush3.bf16.msra.mxu0 %v4008_v21  ;;  %3703 = vmatprep.subr.bf16.mxu1 %v4216_v3 }
  0x19   :  { %3550 = vmatprep.subr.bf16.mxu0 %v4009_v22 }
  0x1b   :  { %3704 = vmatpush3.bf16.msra.mxu1 %v4010_v23 }
  0x1c   :  { %3551 = vmatpush3.bf16.msra.mxu0 %v4011_v24  ;;  %3705 = vmatprep.subr.bf16.mxu1 %v4216_v3 }
  0x1d   :  { %3552 = vmatprep.subr.bf16.mxu0 %v4012_v25 }
  0x1f   :  { %3706 = vmatpush3.bf16.msra.mxu1 %v4013_v26 }
  0x20   :  { %3553 = vmatpush3.bf16.msra.mxu0 %v4014_v27  ;;  %3711 = vmatprep.subr.bf16.mxu1 %v4216_v3 }
  0x21   :  { %554 = vmatprep.subr.bf16.mxu0 %v4017_v36 }
  0x84   :  { %v62_v30 = vpop.permute.xlu0 %61 }
  0x85   :  { %vm67_vm3 = vcmp.eq.s32.totalorder %v58_v31, %v62_v30  ;;  %vm68_vm5 = vcmp.eq.s32.totalorder %v59_v32, %v62_v30  ;;  %vm66_vm7 = vcmp.eq.s32.totalorder %v4398_v29, %v62_v30 }
  0x88   :  { %v65_v33 = vpop.permute.xlu0 %64 }
  0x89   :  { %vm69_vm1 = vcmp.eq.s32.totalorder %v4398_v29, %v65_v33  ;;  %vm71_vm2 = vcmp.eq.s32.totalorder %v59_v32, %v65_v33  ;;  %vm70_vm4 = vcmp.eq.s32.totalorder %v58_v31, %v65_v33 }
  0x8a   :  { %vm3397_vm6 = vmpackc.low %vm70_vm4, %vm67_vm3  ;;  %vm2035_vm4 = vcmask 130048  }
  0x8b   :  { %3398 = vmatprep.mubr.msk.bf16.mxu0 %vm3397_vm6, %v4218_v34  ;;  %vm3401_vm8 = vmpackc.low %vm71_vm2, %vm68_vm5  ;;  %vm1118_vm2 = vcmask 1048320  }
  0x8c   :  { %3708 = vmatmul.mubr.msk.bf16.vlgmr.msra.gmra.mxu1 %vm3401_vm8, %v4218_v34  ;;  %vm3399_vm9 = vmpackc.low %vm69_vm1, %vm66_vm7  ;;  %vm1001_vm1 = vcmask 785920  }
  0x8d   :  { %3400 = vmatmul.mubr.msk.bf16.vlgmr.msra.gmra.mxu0 %vm3399_vm9, %v4218_v34  ;;  %3727 = vmatprep.mubr.msk.bf16.mxu1 %vm4217_vm0, %v4216_v3 }
  0x8e   :  { %586 = vmatprep.mubr.bf16.mxu0 %v4215_v0  ;;  %555 = vmatpush1.bf16.msra.mxu0 %v4015_v35 }
  0x8f   :  { %3712 = vmatpush3.bf16.msra.mxu1 %v4018_v37  ;;  %556 = vmatprep.subr.bf16.mxu0 %v4021_v52 }
  0x90   :  { %3713 = vmatprep.subr.bf16.mxu1 %v4216_v3 }
  0x92   :  { %557 = vmatpush1.bf16.msra.mxu0 %v4019_v53 }
  0x93   :  { %3714 = vmatpush3.bf16.msra.mxu1 %v4022_v54  ;;  %558 = vmatprep.subr.bf16.mxu0 %v4025_v55 }
  0x94   :  { %3715 = vmatprep.subr.bf16.mxu1 %v4216_v3 }
  0x96   :  { %559 = vmatpush1.bf16.msra.mxu0 %v4023_v56 }
  0x97   :  { %3716 = vmatpush3.bf16.msra.mxu1 %v4026_v57  ;;  %560 = vmatprep.subr.bf16.mxu0 %v4029_v58 }
  0x98   :  { %3717 = vmatprep.subr.bf16.mxu1 %v4216_v3 }
  0x9a   :  { %561 = vmatpush1.bf16.msra.mxu0 %v4027_v59 }
  0x9b   :  { %3718 = vmatpush3.bf16.msra.mxu1 %v4030_v60  ;;  %562 = vmatprep.subr.bf16.mxu0 %v4033_v61 }
  0x9c   :  { %3719 = vmatprep.subr.bf16.mxu1 %v4216_v3 }
  0x9e   :  { %563 = vmatpush1.bf16.msra.mxu0 %v4031_v62 }
  0x9f   :  { %3720 = vmatpush3.bf16.msra.mxu1 %v4034_v63  ;;  %564 = vmatprep.subr.bf16.mxu0 %v4037_v1 }
  0xa0   :  { %3721 = vmatprep.subr.bf16.mxu1 %v4216_v3 }
  0xa2   :  { %565 = vmatpush1.bf16.msra.mxu0 %v4035_v2 }
  0xa3   :  { %3722 = vmatpush3.bf16.msra.mxu1 %v4038_v4  ;;  %566 = vmatprep.subr.bf16.mxu0 %v4041_v5 }
  0xa4   :  { %3723 = vmatprep.subr.bf16.mxu1 %v4216_v3 }
  0xa6   :  { %567 = vmatpush1.bf16.msra.mxu0 %v4039_v6 }
  0xa7   :  { %3724 = vmatpush3.bf16.msra.mxu1 %v4042_v7  ;;  %568 = vmatprep.subr.bf16.mxu0 %v4045_v8 }
  0xa8   :  { %3725 = vmatprep.subr.bf16.mxu1 %v4216_v3 }
  0xaa   :  { %569 = vmatpush1.bf16.msra.mxu0 %v4043_v9 }
  0xab   :  { %3726 = vmatpush3.bf16.msra.mxu1 %v4046_v10  ;;  %3731 = vmatprep.subr.bf16.mxu0 %v4216_v3 }
  0xac   :  { %3749 = vmatprep.subr.bf16.mxu1 %v4216_v3 }
 0x14c   :  { %v354_v38 = vpop.f32.mrf.mxu1 }
 0x14d   :  { %v3554_v39 = vpop.f32.mrf.mxu0 }
 0x14e   :  { %v3709_v40 = vpop.f32.mrf.mxu1 }
 0x14f   :  { %v3555_v41 = vpop.f32.mrf.mxu0 }
 0x150   :  { %v3556_v42 = vadd.f32 %v3555_v41, %v3554_v39  ;;  %v357_v43 = vpop.f32.mrf.mxu1  ;;  %v4522_v39 = vshrl.u32 %v56_v28, 7 }
 0x151   :  { %v3557_v44 = vpop.f32.mrf.mxu0 }
 0x152   :  { %v4417_v45 = vadd.f32 %v3556_v42, %v354_v38  ;;  %v3710_v46 = vpop.f32.mrf.mxu1  ;;  %v361_v38 = vld [vmem:[%s5179_s1] sm:$0x3]  ;;  %v649_v40 = vsub.s32 0, %v4522_v39  ;;  %vm644_vm13 = vcmp.le.s32.totalorder %v4398_v29, %v4522_v39 }
 0x153   :  { %v3558_v47 = vpop.f32.mrf.mxu0  ;;  %vm362_vm12 = vcmp.ne.s32.totalorder %v361_v38, 0 }
 0x154   :  { %v3559_v48 = vadd.f32 %v3558_v47, %v3557_v44  ;;  %v370_v49 = vmul.f32 %v4417_v45, %v4417_v45  ;;  %v4526_v41 = vsel %vm362_vm12, 1.0, %v4216_v3 }
 0x155   :  { %v650_v42 = vrot.slane %v4526_v41, %v649_v40 }
 0x156   :  { %v4421_v50 = vadd.f32 %v3559_v48, %v357_v43  ;;  %372 = vadd.xlane.f32.xlu1 %v370_v49  ;;  %v4534_v43 = vsel %vm644_vm13, 1.0, %v4216_v3  ;;  %v4540_v48 = vld [vmem:[%s5180_s5] sm:$0xff] }
 0x157   :  { %v651_v44 = vmul.f32 %v4534_v43, %v650_v42 }
 0x158   :  { %v371_v51 = vmul.f32 %v4421_v50, %v4421_v50 }
 0x159   :  { %v652_v46 = vsub.f32 1.0, %v651_v44 }
 0x15a   :  { %374 = vadd.xlane.f32.xlu1 %v371_v51 }
 0x15b   :  { %v4542_v49 = vmul.f32 -1e+09, %v652_v46  ;;  %v1122_v46 = vsub.s32 1, %v4522_v39 }
 0x1df   :  { %v373_v11 = vpop.xlane.xlu1 %372 }
 0x1e0   :  { %v377_v12 = vmul.f32 0.0078125, %v373_v11 }
 0x1e2   :  { %v379_v13 = vadd.f32 1e-06, %v377_v12 }
 0x1e3   :  { %v375_v14 = vpop.xlane.xlu1 %374 }
 0x1e4   :  { %4135 = vrsqrt.f32 %v379_v13  ;;  %v378_v15 = vmul.f32 0.0078125, %v375_v14 }
 0x1e6   :  { %v380_v16 = vadd.f32 1e-06, %v378_v15 }
 0x1e8   :  { %4137 = vrsqrt.f32 %v380_v16 }
 0x1f1   :  { %v4136_v17 = vpop.eup %4135 }
 0x1f2   :  { %v383_v18 = vmul.f32 %v4136_v17, %v4417_v45 }
 0x1f4   :  { %v391_v22 = vmul.f32 %v3405_v20, %v383_v18 }
 0x1f5   :  { %v4138_v19 = vpop.eup %4137 }
 0x1f6   :  { %v384_v21 = vmul.f32 %v4138_v19, %v4421_v50 }
 0x1f8   :  { %v392_v23 = vmul.f32 %v3405_v20, %v384_v21 }
 0x1fa   :  { %v393_v24 = vpack.c.bf16 %v392_v23, %v391_v22 }
 0x1fc   :  { %587 = vmatmul.mubr.bf16.vlgmr.msra.gmra.mxu0 %v393_v24  ;;  %3728 = vmatmul.mubr.bf16.vlgmr.msra.gmra.mxu1 %v393_v24 }
 0x1fd   :  { %3733 = vmatprep.mubr.msk.bf16.mxu0 %vm4217_vm0, %v4216_v3  ;;  %3751 = vmatprep.mubr.msk.bf16.mxu1 %vm4217_vm0, %v4216_v3 }
 0x2bc   :  { %v588_v25 = vpop.f32.mrf.mxu0  ;;  %v631_v26 = vpop.f32.mrf.mxu1 }
 0x2bd   :  { %v4510_v35 = vpack.c.bf16 %v631_v26, %v631_v26  ;;  %v654_v36 = vpack.c.bf16 %v588_v25, %v588_v25 }
 0x2be   :  { %v590_v27 = vpop.f32.mrf.mxu0  ;;  %v3729_v30 = vpop.f32.mrf.mxu1 }
 0x2bf   :  { %v655_v31 = vpack.c.bf16 %v590_v27, %v590_v27  ;;  %v723_v37 = vsel %vm721_vm11, %v4510_v35, 0 }
 0x2c0   :  { %v4505_v32 = vpop.f32.mrf.mxu1  ;;  %v592_v28 = vpop.f32.mrf.mxu0 }
 0x2c1   :  { %770 = vrot.lane.b32.xlu1 %v655_v31, %s4219_s6  ;;  %v661_v33 = vsel %vm656_vm10, %v655_v31, 0  ;;  %v1127_v63 = vpack.c.bf16 %v592_v28, %v592_v28  ;;  %v640_v28 = vld [vmem:[%s5180_s5 + $0x10] sm:$0xff] }
 0x2c2   :  { %v3730_v34 = vpop.f32.mrf.mxu1  ;;  %3732 = vmatpush3.bf16.xpose.msra.mxu0 %v661_v33  ;;  %v594_v47 = vpop.f32.mrf.mxu0 }
 0x2c3   :  { %3737 = vmatprep.subr.bf16.mxu0 %v4216_v3  ;;  %v1128_v57 = vpack.c.bf16 %v594_v47, %v594_v47 }
 0x2c5   :  { %v1133_v15 = vsel %vm656_vm10, %v1128_v57, 0 }
 0x2c9   :  { %3734 = vmatmul.mubr.msk.bf16.vlgmr.msra.gmra.mxu0 %vm656_vm10, %v654_v36 }
 0x2ca   :  { %3738 = vmatpush3.bf16.msra.mxu0 %v723_v37  ;;  %3739 = vmatprep.mubr.msk.bf16.mxu0 %vm4217_vm0, %v4216_v3 }
 0x2cb   :  { %3743 = vmatprep.subr.bf16.mxu0 %v4216_v3 }
 0x333   :  { %v771_v1 = vpop.permute.xlu1 %770 }
 0x334   :  { %v776_v8 = vsel %vm656_vm10, %v771_v1, 0 }
 0x389   :  { %v697_v29 = vpop.f32.mrf.mxu0 }
 0x38a   :  { %v698_v51 = vadd.f32 %v697_v29, %v4540_v48 }
 0x38b   :  { %v3735_v52 = vpop.f32.mrf.mxu0 }
 0x38c   :  { %v703_v53 = vadd.f32 %v698_v51, %v4542_v49 }
 0x38d   :  { %v700_v54 = vpop.f32.mrf.mxu0 }
 0x38e   :  { %v705_v55 = vsel %vm704_vm14, %v703_v53, -inf }
 0x38f   :  { %706 = vmax.xlane.f32.xlu0 %v705_v55  ;;  %v3736_v56 = vpop.f32.mrf.mxu0 }
 0x3a5   :  { %1005 = vrot.lane.b32.xlu0 %v655_v31, %s4220_s17 }
 0x3a9   :  { %1473 = vrot.lane.b32.xlu0 %v1128_v57, %s4220_s17 }
 0x418   :  { %v707_v58 = vpop.xlane.xlu0 %706 }
 0x419   :  { %v708_v59 = vsub.f32 %v703_v53, %v707_v58  ;;  %v1123_v53 = vrot.slane %v4526_v41, %v1122_v46 }
 0x41b   :  { %v709_v60 = vmul.f32 1.442695, %v708_v59  ;;  %v1124_v58 = vmul.f32 %v4534_v43, %v1123_v53 }
 0x41c   :  { %v1006_v11 = vpop.permute.xlu0 %1005 }
 0x41d   :  { %4139 = vpow2.f32 %v709_v60  ;;  %v1011_v13 = vsel %vm656_vm10, %v1006_v11, 0 }
 0x420   :  { %v1474_v21 = vpop.permute.xlu0 %1473 }
 0x421   :  { %v1479_v23 = vsel %vm656_vm10, %v1474_v21, 0 }
 0x42a   :  { %v4140_v61 = vpop.eup %4139 }
 0x42b   :  { %v711_v62 = vsel %vm704_vm14, %v4140_v61, 0.0 }
 0x42c   :  { %712 = vadd.xlane.f32.xlu1 %v711_v62 }
 0x43d   :  { %767 = vrot.lane.b32.xlu1 %v654_v36, %s4219_s6 }
 0x441   :  { %888 = vrot.lane.b32.xlu1 %v655_v31, %s4221_s18  ;;  %v639_v31 = vld [vmem:[%s5180_s5 + $0x8] sm:$0xff] }
 0x445   :  { %886 = vrot.lane.b32.xlu1 %v654_v36, %s4221_s18 }
 0x449   :  { %1003 = vrot.lane.b32.xlu1 %v654_v36, %s4220_s17 }
 0x44d   :  { %1240 = vrot.lane.b32.xlu1 %v1128_v57, %s4219_s6 }
 0x451   :  { %1237 = vrot.lane.b32.xlu1 %v1127_v63, %s4219_s6 }
 0x455   :  { %1357 = vrot.lane.b32.xlu1 %v1128_v57, %s4221_s18  ;;  %v641_v57 = vld [vmem:[%s5180_s5 + $0x18] sm:$0xff] }
 0x459   :  { %1355 = vrot.lane.b32.xlu1 %v1127_v63, %s4221_s18 }
 0x45d   :  { %1471 = vrot.lane.b32.xlu1 %v1127_v63, %s4220_s17 }
 0x4b5   :  { %v713_v2 = vpop.xlane.xlu1 %712 }
 0x4b6   :  { %4141 = vrcp.f32 %v713_v2 }
 0x4b9   :  { %v768_v7 = vpop.permute.xlu1 %767 }
 0x4bd   :  { %v889_v9 = vpop.permute.xlu1 %888 }
 0x4be   :  { %v894_v10 = vsel %vm656_vm10, %v889_v9, 0 }
 0x4c1   :  { %v887_v12 = vpop.permute.xlu1 %886 }
 0x4c3   :  { %v4142_v4 = vpop.eup %4141 }
 0x4c4   :  { %v715_v5 = vmul.f32 %v4142_v4, %v4140_v61 }
 0x4c5   :  { %v1004_v14 = vpop.permute.xlu1 %1003 }
 0x4c6   :  { %v716_v6 = vpack.c.bf16 %v715_v5, %v715_v5 }
 0x4c8   :  { %3740 = vmatmul.mubr.msk.bf16.vlgmr.msra.gmra.mxu0 %vm704_vm14, %v716_v6 }
 0x4c9   :  { %3744 = vmatpush3.bf16.xpose.msra.mxu0 %v776_v8  ;;  %3745 = vmatprep.mubr.msk.bf16.mxu0 %vm4217_vm0, %v4216_v3  ;;  %v1241_v16 = vpop.permute.xlu1 %1240 }
 0x4ca   :  { %3755 = vmatprep.subr.bf16.mxu0 %v4216_v3  ;;  %v1246_v18 = vsel %vm656_vm10, %v1241_v16, 0 }
 0x4cd   :  { %v1238_v17 = vpop.permute.xlu1 %1237 }
 0x4d0   :  { %3746 = vmatmul.mubr.msk.bf16.vlgmr.msra.gmra.mxu0 %vm656_vm10, %v768_v7 }
 0x4d1   :  { %3756 = vmatpush3.bf16.xpose.msra.mxu0 %v894_v10  ;;  %3757 = vmatprep.mubr.msk.bf16.mxu0 %vm4217_vm0, %v4216_v3  ;;  %v1358_v19 = vpop.permute.xlu1 %1357 }
 0x4d2   :  { %3767 = vmatprep.subr.bf16.mxu0 %v4216_v3  ;;  %v1363_v20 = vsel %vm656_vm10, %v1358_v19, 0 }
 0x4d5   :  { %v1356_v22 = vpop.permute.xlu1 %1355 }
 0x4d8   :  { %3758 = vmatmul.mubr.msk.bf16.vlgmr.msra.gmra.mxu0 %vm656_vm10, %v887_v12 }
 0x4d9   :  { %3768 = vmatpush3.bf16.xpose.msra.mxu0 %v1011_v13  ;;  %3769 = vmatprep.mubr.msk.bf16.mxu0 %vm4217_vm0, %v4216_v3  ;;  %v1472_v24 = vpop.permute.xlu1 %1471 }
 0x4da   :  { %3779 = vmatprep.subr.bf16.mxu0 %v4216_v3 }
 0x4e0   :  { %3770 = vmatmul.mubr.msk.bf16.vlgmr.msra.gmra.mxu0 %vm656_vm10, %v1004_v14 }
 0x4e1   :  { %3780 = vmatpush3.bf16.xpose.msra.mxu0 %v1133_v15  ;;  %3781 = vmatprep.mubr.msk.bf16.mxu0 %vm4217_vm0, %v4216_v3 }
 0x4e2   :  { %3791 = vmatprep.subr.bf16.mxu0 %v4216_v3 }
 0x4e8   :  { %3782 = vmatmul.mubr.msk.bf16.vlgmr.msra.gmra.mxu0 %vm656_vm10, %v1127_v63  ;;  %v1125_v63 = vsub.f32 1.0, %v1124_v58 }
 0x4e9   :  { %3792 = vmatpush3.bf16.xpose.msra.mxu0 %v1246_v18  ;;  %3793 = vmatprep.mubr.msk.bf16.mxu0 %vm4217_vm0, %v4216_v3 }
 0x4ea   :  { %3803 = vmatprep.subr.bf16.mxu0 %v4216_v3  ;;  %v1126_v4 = vmul.f32 -1e+09, %v1125_v63 }
 0x4f0   :  { %3794 = vmatmul.mubr.msk.bf16.vlgmr.msra.gmra.mxu0 %vm656_vm10, %v1238_v17 }
 0x4f1   :  { %3804 = vmatpush3.bf16.xpose.msra.mxu0 %v1363_v20  ;;  %3805 = vmatprep.mubr.msk.bf16.mxu0 %vm4217_vm0, %v4216_v3 }
 0x4f2   :  { %3815 = vmatprep.subr.bf16.mxu0 %v4216_v3 }
 0x4f8   :  { %3806 = vmatmul.mubr.msk.bf16.vlgmr.msra.gmra.mxu0 %vm656_vm10, %v1356_v22 }
 0x4f9   :  { %3816 = vmatpush3.bf16.xpose.msra.mxu0 %v1479_v23  ;;  %3817 = vmatprep.mubr.msk.bf16.mxu0 %vm4217_vm0, %v4216_v3 }
 0x4fa   :  { %3827 = vmatprep.subr.bf16.mxu0 %v4216_v3 }
 0x500   :  { %3818 = vmatmul.mubr.msk.bf16.vlgmr.msra.gmra.mxu0 %vm656_vm10, %v1472_v24 }
 0x501   :  { %3843 = vmatprep.mubr.msk.bf16.mxu0 %vm4217_vm0, %v4216_v3 }
 0x588   :  { %v759_v25 = vpop.f32.mrf.mxu0 }
 0x589   :  { %765 = vst.msk [vmem:[#allocation2] sm:$0xff] %vm656_vm10, %v759_v25 }
 0x58a   :  { %v3741_v26 = vpop.f32.mrf.mxu0 }
 0x58c   :  { %v762_v27 = vpop.f32.mrf.mxu0 }
 0x58e   :  { %v3742_v30 = vpop.f32.mrf.mxu0 }
 0x590   :  { %v812_v33 = vpop.f32.mrf.mxu0 }
 0x591   :  { %v813_v34 = vadd.f32 %v812_v33, %v639_v31 }
 0x592   :  { %v3747_v36 = vpop.f32.mrf.mxu0 }
 0x593   :  { %v818_v37 = vadd.f32 %v813_v34, %v4542_v49 }
 0x594   :  { %v815_v38 = vpop.f32.mrf.mxu0 }
 0x595   :  { %v819_v42 = vsel %vm704_vm14, %v818_v37, -inf }
 0x596   :  { %820 = vmax.xlane.f32.xlu0 %v819_v42  ;;  %v3748_v44 = vpop.f32.mrf.mxu0 }
 0x598   :  { %v930_v47 = vpop.f32.mrf.mxu0 }
 0x599   :  { %v931_v29 = vadd.f32 %v930_v47, %v640_v28 }
 0x59a   :  { %v3759_v51 = vpop.f32.mrf.mxu0 }
 0x59b   :  { %v936_v52 = vadd.f32 %v931_v29, %v4542_v49 }
 0x59c   :  { %v933_v54 = vpop.f32.mrf.mxu0 }
 0x59d   :  { %v937_v55 = vsel %vm704_vm14, %v936_v52, -inf }
 0x59e   :  { %938 = vmax.xlane.f32.xlu1 %v937_v55  ;;  %v3760_v56 = vpop.f32.mrf.mxu0 }
 0x5a0   :  { %v1047_v59 = vpop.f32.mrf.mxu0 }
 0x5a1   :  { %v1048_v60 = vadd.f32 %v1047_v59, %v641_v57 }
 0x5a2   :  { %v3771_v61 = vpop.f32.mrf.mxu0 }
 0x5a3   :  { %v1053_v62 = vadd.f32 %v1048_v60, %v4542_v49 }
 0x5a4   :  { %v1050_v1 = vpop.f32.mrf.mxu0 }
 0x5a5   :  { %v1054_v41 = vsel %vm704_vm14, %v1053_v62, -inf }
 0x5a6   :  { %1055 = vmax.xlane.f32.xlu0 %v1054_v41  ;;  %v3772_v2 = vpop.f32.mrf.mxu0 }
 0x5a8   :  { %v1169_v5 = vpop.f32.mrf.mxu0 }
 0x5a9   :  { %v1170_v6 = vadd.f32 %v1169_v5, %v4540_v48 }
 0x5aa   :  { %v3783_v7 = vpop.f32.mrf.mxu0 }
 0x5ab   :  { %v1175_v8 = vadd.f32 %v1170_v6, %v1126_v4 }
 0x5ac   :  { %v1172_v9 = vpop.f32.mrf.mxu0 }
 0x5ad   :  { %v1176_v43 = vsel %vm704_vm14, %v1175_v8, -inf }
 0x5ae   :  { %1177 = vmax.xlane.f32.xlu0 %v1176_v43  ;;  %v3784_v10 = vpop.f32.mrf.mxu0 }
 0x5b0   :  { %v1282_v11 = vpop.f32.mrf.mxu0 }
 0x5b1   :  { %v1283_v12 = vadd.f32 %v1282_v11, %v639_v31  ;;  %v1188_v11 = vpack.c.bf16 %v4505_v32, %v4505_v32 }
 0x5b2   :  { %v3795_v49 = vpop.f32.mrf.mxu0 }
 0x5b3   :  { %v1288_v13 = vadd.f32 %v1283_v12, %v1126_v4 }
 0x5b4   :  { %v1285_v14 = vpop.f32.mrf.mxu0 }
 0x5b5   :  { %v1289_v15 = vsel %vm704_vm14, %v1288_v13, -inf }
 0x5b6   :  { %1290 = vmax.xlane.f32.xlu1 %v1289_v15  ;;  %v3796_v16 = vpop.f32.mrf.mxu0 }
 0x5b8   :  { %v1399_v17 = vpop.f32.mrf.mxu0 }
 0x5b9   :  { %v1400_v18 = vadd.f32 %v1399_v17, %v640_v28 }
 0x5ba   :  { %v3807_v19 = vpop.f32.mrf.mxu0 }
 0x5bb   :  { %v1405_v48 = vadd.f32 %v1400_v18, %v1126_v4 }
 0x5bc   :  { %v1402_v20 = vpop.f32.mrf.mxu0 }
 0x5bd   :  { %v1406_v21 = vsel %vm704_vm14, %v1405_v48, -inf }
 0x5be   :  { %1407 = vmax.xlane.f32.xlu0 %v1406_v21  ;;  %v3808_v22 = vpop.f32.mrf.mxu0 }
 0x5c0   :  { %v1515_v23 = vpop.f32.mrf.mxu0 }
 0x5c1   :  { %v1516_v24 = vadd.f32 %v1515_v23, %v641_v57 }
 0x5c2   :  { %v3819_v25 = vpop.f32.mrf.mxu0 }
 0x5c3   :  { %v1521_v26 = vadd.f32 %v1516_v24, %v1126_v4 }
 0x5c4   :  { %v1518_v27 = vpop.f32.mrf.mxu0 }
 0x5c5   :  { %v1522_v30 = vsel %vm704_vm14, %v1521_v26, -inf  ;;  %v1193_v27 = vsel %vm721_vm11, %v1188_v11, 0 }
 0x5c6   :  { %1523 = vmax.xlane.f32.xlu1 %v1522_v30  ;;  %v3820_v31 = vpop.f32.mrf.mxu0 }
 0x61f   :  { %v821_v33 = vpop.xlane.xlu0 %820 }
 0x620   :  { %v822_v34 = vsub.f32 %v818_v37, %v821_v33 }
 0x622   :  { %v823_v36 = vmul.f32 1.442695, %v822_v34 }
 0x624   :  { %4143 = vpow2.f32 %v823_v36 }
 0x627   :  { %v939_v38 = vpop.xlane.xlu1 %938 }
 0x628   :  { %v940_v42 = vsub.f32 %v936_v52, %v939_v38 }
 0x62a   :  { %v941_v44 = vmul.f32 1.442695, %v940_v42 }
 0x62c   :  { %4145 = vpow2.f32 %v941_v44 }
 0x62f   :  { %v1056_v28 = vpop.xlane.xlu0 %1055 }
 0x630   :  { %v1057_v47 = vsub.f32 %v1053_v62, %v1056_v28 }
 0x631   :  { %v4144_v29 = vpop.eup %4143 }
 0x632   :  { %v1058_v51 = vmul.f32 1.442695, %v1057_v47  ;;  %v825_v53 = vsel %vm704_vm14, %v4144_v29, 0.0 }
 0x633   :  { %826 = vadd.xlane.f32.xlu0 %v825_v53 }
 0x634   :  { %4147 = vpow2.f32 %v1058_v51 }
 0x637   :  { %v1178_v52 = vpop.xlane.xlu0 %1177 }
 0x638   :  { %v1179_v57 = vsub.f32 %v1175_v8, %v1178_v52 }
 0x639   :  { %v4146_v54 = vpop.eup %4145 }
 0x63a   :  { %v943_v55 = vsel %vm704_vm14, %v4146_v54, 0.0  ;;  %v1180_v61 = vmul.f32 1.442695, %v1179_v57 }
 0x63b   :  { %944 = vadd.xlane.f32.xlu1 %v943_v55 }
 0x63c   :  { %4149 = vpow2.f32 %v1180_v61 }
 0x63f   :  { %v1291_v58 = vpop.xlane.xlu1 %1290 }
 0x640   :  { %v1292_v60 = vsub.f32 %v1288_v13, %v1291_v58 }
 0x641   :  { %v4625_v56 = vpop.eup %4147 }
 0x642   :  { %v1060_v37 = vsel %vm704_vm14, %v4625_v56, 0.0  ;;  %v1293_v1 = vmul.f32 1.442695, %v1292_v60 }
 0x643   :  { %1061 = vadd.xlane.f32.xlu0 %v1060_v37 }
 0x644   :  { %4151 = vpow2.f32 %v1293_v1  ;;  %v4047_v1 = vld [vmem:[%s5181_s8 + $0x38] sm:$0xff]  }
 0x645   :  { %3828 = vmatpush3.bf16.msra.mxu0 %v4047_v1 }
 0x646   :  { %3829 = vmatprep.subr.bf16.mxu0 %v4216_v3 }
 0x647   :  { %v1408_v59 = vpop.xlane.xlu0 %1407 }
 0x648   :  { %v1409_v62 = vsub.f32 %v1405_v48, %v1408_v59 }
 0x649   :  { %v4150_v5 = vpop.eup %4149 }
 0x64a   :  { %v1410_v41 = vmul.f32 1.442695, %v1409_v62 }
 0x64c   :  { %949 = vrot.lane.b32.xlu1 %v4510_v35, %s4221_s18  ;;  %4153 = vpow2.f32 %v1410_v41 }
 0x64f   :  { %v1524_v63 = vpop.xlane.xlu1 %1523 }
 0x650   :  { %1066 = vrot.lane.b32.xlu1 %v4510_v35, %s4220_s17  ;;  %v1525_v2 = vsub.f32 %v1521_v26, %v1524_v63 }
 0x651   :  { %v4635_v6 = vpop.eup %4151 }
 0x652   :  { %v1526_v4 = vmul.f32 1.442695, %v1525_v2  ;;  %v1295_v9 = vsel %vm704_vm14, %v4635_v6, 0.0  ;;  %v4048_v2 = vld [vmem:[%s5181_s8 + $0x30] sm:$0xff]  }
 0x653   :  { %3830 = vmatpush3.bf16.msra.mxu0 %v4048_v2 }
 0x654   :  { %4155 = vpow2.f32 %v1526_v4  ;;  %3831 = vmatprep.subr.bf16.mxu0 %v4216_v3 }
 0x659   :  { %832 = vrot.lane.b32.xlu0 %v4510_v35, %s4219_s6  ;;  %v1182_v35 = vsel %vm704_vm14, %v4150_v5, 0.0  ;;  %v4638_v7 = vpop.eup %4153 }
 0x65a   :  { %v1412_v8 = vsel %vm704_vm14, %v4638_v7, 0.0 }
 0x661   :  { %v4644_v43 = vpop.eup %4155 }
 0x662   :  { %v1528_v10 = vsel %vm704_vm14, %v4644_v43, 0.0 }
 0x674   :  { %1183 = vadd.xlane.f32.xlu1 %v1182_v35 }
 0x678   :  { %1413 = vadd.xlane.f32.xlu0 %v1412_v8  ;;  %1296 = vadd.xlane.f32.xlu1 %v1295_v9 }
 0x67c   :  { %1529 = vadd.xlane.f32.xlu1 %v1528_v10  ;;  %v4049_v10 = vld [vmem:[%s5181_s8 + $0x28] sm:$0xff]  }
 0x67d   :  { %3832 = vmatpush3.bf16.msra.mxu0 %v4049_v10  ;;  %v1826_v10 = vld [vmem:[%s5183_s3] sm:$0xff] }
 0x67e   :  { %3833 = vmatprep.subr.bf16.mxu0 %v4216_v3 }
 0x68d   :  { %1418 = vrot.lane.b32.xlu1 %v1188_v11, %s4221_s18 }
 0x68e   :  { %1302 = vrot.lane.b32.xlu0 %v1188_v11, %s4219_s6 }
 0x692   :  { %1534 = vrot.lane.b32.xlu0 %v1188_v11, %s4220_s17  ;;  %v4050_v11 = vld [vmem:[%s5181_s8 + $0x20] sm:$0xff]  }
 0x693   :  { %3834 = vmatpush3.bf16.msra.mxu0 %v4050_v11  ;;  %v1827_v11 = vld [vmem:[%s5183_s3 + $0x8] sm:$0xff] }
 0x694   :  { %3835 = vmatprep.subr.bf16.mxu0 %v4216_v3 }
 0x6bc   :  { %v827_v12 = vpop.xlane.xlu0 %826 }
 0x6bd   :  { %4157 = vrcp.f32 %v827_v12 }
 0x6c4   :  { %v945_v49 = vpop.xlane.xlu1 %944 }
 0x6c5   :  { %4159 = vrcp.f32 %v945_v49 }
 0x6c8   :  { %v950_v18 = vpop.permute.xlu1 %949 }
 0x6c9   :  { %v955_v48 = vsel %vm721_vm11, %v950_v18, 0 }
 0x6ca   :  { %v4158_v13 = vpop.eup %4157 }
 0x6cb   :  { %v829_v15 = vmul.f32 %v4158_v13, %v4144_v29 }
 0x6cc   :  { %v1062_v14 = vpop.xlane.xlu0 %1061  ;;  %v1067_v21 = vpop.permute.xlu1 %1066 }
 0x6cd   :  { %4161 = vrcp.f32 %v1062_v14  ;;  %v830_v32 = vpack.c.bf16 %v829_v15, %v829_v15  ;;  %v1072_v24 = vsel %vm721_vm11, %v1067_v21, 0  ;;  %v4051_v14 = vld [vmem:[%s5181_s8 + $0x18] sm:$0xff]  }
 0x6ce   :  { %3836 = vmatpush3.bf16.msra.mxu0 %v4051_v14  ;;  %v4085_v14 = vld [vmem:[%s5182_s10 + $0x18] ss:$12 sps:$4 sm:$0xff]  }
 0x6cf   :  { %3837 = vmatprep.subr.bf16.mxu0 %v4216_v3 }
 0x6d0   :  { %v833_v16 = vpop.permute.xlu0 %832 }
 0x6d1   :  { %v838_v17 = vsel %vm721_vm11, %v833_v16, 0  ;;  %v4052_v16 = vld [vmem:[%s5181_s8 + $0x10] sm:$0xff]  }
 0x6d2   :  { %3750 = vmatpush3.bf16.msra.mxu1 %v838_v17  ;;  %v4160_v19 = vpop.eup %4159  ;;  %3838 = vmatpush3.bf16.msra.mxu0 %v4052_v16 }
 0x6d3   :  { %3761 = vmatprep.subr.bf16.mxu1 %v4216_v3  ;;  %v947_v20 = vmul.f32 %v4160_v19, %v4146_v54  ;;  %3839 = vmatprep.subr.bf16.mxu0 %v4216_v3  ;;  %v4053_v19 = vld [vmem:[%s5181_s8 + $0x8] sm:$0xff]  }
 0x6d5   :  { %3752 = vmatmul.mubr.msk.bf16.vlgmr.msra.gmra.mxu1 %vm704_vm14, %v830_v32  ;;  %v948_v22 = vpack.c.bf16 %v947_v20, %v947_v20  ;;  %v4054_v20 = vld [vmem:[%s5181_s8] sm:$0xff]  }
 0x6d6   :  { %3762 = vmatpush3.bf16.msra.mxu1 %v955_v48  ;;  %3763 = vmatprep.mubr.msk.bf16.mxu1 %vm4217_vm0, %v4216_v3 }
 0x6d7   :  { %3773 = vmatprep.subr.bf16.mxu1 %v4216_v3  ;;  %3840 = vmatpush3.bf16.msra.mxu0 %v4053_v19 }
 0x6d8   :  { %3841 = vmatprep.subr.bf16.mxu0 %v4216_v3 }
 0x6da   :  { %v4162_v23 = vpop.eup %4161 }
 0x6db   :  { %v1064_v25 = vmul.f32 %v4162_v23, %v4625_v56  ;;  %3842 = vmatpush3.bf16.msra.mxu0 %v4054_v20 }
 0x6dd   :  { %3764 = vmatmul.mubr.msk.bf16.vlgmr.msra.gmra.mxu1 %vm704_vm14, %v948_v22  ;;  %v1065_v26 = vpack.c.bf16 %v1064_v25, %v1064_v25 }
 0x6de   :  { %3774 = vmatpush3.bf16.msra.mxu1 %v1072_v24  ;;  %3775 = vmatprep.mubr.msk.bf16.mxu1 %vm4217_vm0, %v4216_v3 }
 0x6df   :  { %3785 = vmatprep.subr.bf16.mxu1 %v4216_v3 }
 0x6e5   :  { %3776 = vmatmul.mubr.msk.bf16.vlgmr.msra.gmra.mxu1 %vm704_vm14, %v1065_v26 }
 0x6e6   :  { %3786 = vmatpush3.bf16.msra.mxu1 %v1193_v27  ;;  %3787 = vmatprep.mubr.msk.bf16.mxu1 %vm4217_vm0, %v4216_v3 }
 0x6e7   :  { %3797 = vmatprep.subr.bf16.mxu1 %v4216_v3 }
 0x6fd   :  { %v1184_v30 = vpop.xlane.xlu1 %1183 }
 0x6fe   :  { %4163 = vrcp.f32 %v1184_v30 }
 0x701   :  { %v1297_v31 = vpop.xlane.xlu1 %1296  ;;  %v1414_v33 = vpop.xlane.xlu0 %1413 }
 0x702   :  { %4165 = vrcp.f32 %v1297_v31 }
 0x703   :  { %4167 = vrcp.f32 %v1414_v33 }
 0x705   :  { %v1303_v38 = vpop.permute.xlu0 %1302  ;;  %v1530_v44 = vpop.xlane.xlu1 %1529 }
 0x706   :  { %v1308_v47 = vsel %vm721_vm11, %v1303_v38, 0  ;;  %4169 = vrcp.f32 %v1530_v44 }
 0x709   :  { %v1419_v51 = vpop.permute.xlu1 %1418  ;;  %v1535_v37 = vpop.permute.xlu0 %1534 }
 0x70a   :  { %v1424_v55 = vsel %vm721_vm11, %v1419_v51, 0  ;;  %v1540_v58 = vsel %vm721_vm11, %v1535_v37, 0  ;;  %v4057_v51 = vld [vmem:[%s5182_s10 + $0xb0] ss:$12 sps:$4 sm:$0xff]  }
 0x70b   :  { %v4164_v34 = vpop.eup %4163  ;;  %1928 = vmatprep.subr.bf16.mxu0 %v4057_v51  ;;  %v4061_v37 = vld [vmem:[%s5182_s10 + $0x7c] ss:$12 sps:$4 sm:$0xff]  }
 0x70c   :  { %v1186_v36 = vmul.f32 %v4164_v34, %v4150_v5 }
 0x70e   :  { %v1187_v42 = vpack.c.bf16 %v1186_v36, %v1186_v36 }
 0x70f   :  { %v4166_v28 = vpop.eup %4165 }
 0x710   :  { %3788 = vmatmul.mubr.msk.bf16.vlgmr.msra.gmra.mxu1 %vm704_vm14, %v1187_v42  ;;  %v1299_v29 = vmul.f32 %v4166_v28, %v4635_v6  ;;  %v4168_v54 = vpop.eup %4167 }
 0x711   :  { %3798 = vmatpush3.bf16.msra.mxu1 %v1308_v47  ;;  %3799 = vmatprep.mubr.msk.bf16.mxu1 %vm4217_vm0, %v4216_v3  ;;  %v1416_v56 = vmul.f32 %v4168_v54, %v4638_v7  ;;  %v4058_v54 = vld [vmem:[%s5182_s10 + $0x94] ss:$12 sps:$4 sm:$0xff]  }
 0x712   :  { %3809 = vmatprep.subr.bf16.mxu1 %v4216_v3  ;;  %v1300_v53 = vpack.c.bf16 %v1299_v29, %v1299_v29  ;;  %v4055_v29 = vld [vmem:[%s5182_s10 + $0xac] ss:$12 sps:$4 sm:$0xff]  }
 0x713   :  { %v1417_v52 = vpack.c.bf16 %v1416_v56, %v1416_v56  ;;  %v4170_v57 = vpop.eup %4169  ;;  %v4070_v56 = vld [vmem:[%s5182_s10 + $0xa8] ss:$12 sps:$4 sm:$0xff]  }
 0x714   :  { %v1532_v59 = vmul.f32 %v4170_v57, %v4644_v43  ;;  %v4064_v57 = vld [vmem:[%s5182_s10 + $0x64] ss:$12 sps:$4 sm:$0xff]  }
 0x716   :  { %v1533_v60 = vpack.c.bf16 %v1532_v59, %v1532_v59  ;;  %v4067_v59 = vld [vmem:[%s5182_s10 + $0x4c] ss:$12 sps:$4 sm:$0xff]  }
 0x718   :  { %3800 = vmatmul.mubr.msk.bf16.vlgmr.msra.gmra.mxu1 %vm704_vm14, %v1300_v53  ;;  %v4060_v53 = vld [vmem:[%s5182_s10 + $0x98] ss:$12 sps:$4 sm:$0xff]  }
 0x719   :  { %3810 = vmatpush3.bf16.msra.mxu1 %v1424_v55  ;;  %3811 = vmatprep.mubr.msk.bf16.mxu1 %vm4217_vm0, %v4216_v3  ;;  %v4063_v55 = vld [vmem:[%s5182_s10 + $0x80] ss:$12 sps:$4 sm:$0xff]  }
 0x71a   :  { %3821 = vmatprep.subr.bf16.mxu1 %v4216_v3 }
 0x720   :  { %3812 = vmatmul.mubr.msk.bf16.vlgmr.msra.gmra.mxu1 %vm704_vm14, %v1417_v52  ;;  %v4066_v52 = vld [vmem:[%s5182_s10 + $0x68] ss:$12 sps:$4 sm:$0xff]  }
 0x721   :  { %3822 = vmatpush3.bf16.msra.mxu1 %v1540_v58  ;;  %3823 = vmatprep.mubr.msk.bf16.mxu1 %vm4217_vm0, %v4216_v3  ;;  %v4069_v58 = vld [vmem:[%s5182_s10 + $0x50] ss:$12 sps:$4 sm:$0xff]  }
 0x722   :  { %3847 = vmatprep.subr.bf16.mxu1 %v4216_v3 }
 0x728   :  { %3824 = vmatmul.mubr.msk.bf16.vlgmr.msra.gmra.mxu1 %vm704_vm14, %v1533_v60  ;;  %v4073_v60 = vld [vmem:[%s5182_s10 + $0x38] ss:$12 sps:$4 sm:$0xff]  }
 0x729   :  { %3863 = vmatprep.mubr.msk.bf16.mxu1 %vm4217_vm0, %v4216_v3  ;;  %3848 = vmatpush3.bf16.msra.mxu1 %v4070_v56 }
 0x72a   :  { %3849 = vmatprep.subr.bf16.mxu1 %v4216_v3 }
 0x795   :  { %v874_v61 = vpop.f32.mrf.mxu1 }
 0x796   :  { %881 = vrot.lane.b32.xlu0 %v874_v61, %s4220_s17  ;;  %v4071_v61 = vld [vmem:[%s5182_s10 + $0x34] ss:$12 sps:$4 sm:$0xff]  }
 0x797   :  { %v3753_v62 = vpop.f32.mrf.mxu1 }
 0x799   :  { %v877_v63 = vpop.f32.mrf.mxu1 }
 0x79b   :  { %v3754_v41 = vpop.f32.mrf.mxu1 }
 0x79d   :  { %v991_v4 = vpop.f32.mrf.mxu1 }
 0x79e   :  { %998 = vrot.lane.b32.xlu0 %v991_v4, %s4221_s18 }
 0x79f   :  { %v3765_v5 = vpop.f32.mrf.mxu1 }
 0x7a1   :  { %v994_v6 = vpop.f32.mrf.mxu1 }
 0x7a3   :  { %v3766_v35 = vpop.f32.mrf.mxu1 }
 0x7a4   :  { %v4074_v35 = vld [vmem:[%s5182_s10 + $0x90] ss:$12 sps:$4 sm:$0xff]  }
 0x7a5   :  { %v1108_v7 = vpop.f32.mrf.mxu1  ;;  %3850 = vmatpush3.bf16.msra.mxu1 %v4074_v35 }
 0x7a6   :  { %1115 = vrot.lane.b32.xlu0 %v1108_v7, %s4219_s6  ;;  %3851 = vmatprep.subr.bf16.mxu1 %v4216_v3  ;;  %v4078_v7 = vld [vmem:[%s5182_s10 + $0x78] ss:$12 sps:$4 sm:$0xff]  }
 0x7a7   :  { %v3777_v8 = vpop.f32.mrf.mxu1 }
 0x7a8   :  { %v4081_v8 = vld [vmem:[%s5182_s10 + $0x8] ss:$12 sps:$4 sm:$0xff]  }
 0x7a9   :  { %v1111_v9 = vpop.f32.mrf.mxu1  ;;  %3852 = vmatpush3.bf16.msra.mxu1 %v4078_v7 }
 0x7aa   :  { %v4079_v9 = vld [vmem:[%s5182_s10 + $0x4] ss:$12 sps:$4 sm:$0xff]   ;;  %3853 = vmatprep.subr.bf16.mxu1 %v4216_v3 }
 0x7ab   :  { %v3778_v43 = vpop.f32.mrf.mxu1 }
 0x7ac   :  { %v4082_v43 = vld [vmem:[%s5182_s10 + $0x60] ss:$12 sps:$4 sm:$0xff]  }
 0x7ad   :  { %3854 = vmatpush3.bf16.msra.mxu1 %v4082_v43  ;;  %v1829_v43 = vld [vmem:[%s5183_s3 + $0x18] sm:$0xff] }
 0x7ae   :  { %3855 = vmatprep.subr.bf16.mxu1 %v4216_v3 }
 0x7d0   :  { %v1229_v12 = vpop.f32.mrf.mxu1 }
 0x7d1   :  { %1235 = vst.msk [vmem:[#allocation2 + $0x8] sm:$0xff] %vm656_vm10, %v1229_v12  ;;  %v1830_v12 = vpack.c.bf16 %v1827_v11, %v1826_v10 }
 0x7d2   :  { %v3789_v49 = vpop.f32.mrf.mxu1 }
 0x7d3   :  { %v4083_v49 = vld [vmem:[%s5182_s10 + $0x48] ss:$12 sps:$4 sm:$0xff]  }
 0x7d4   :  { %v1232_v13 = vpop.f32.mrf.mxu1  ;;  %3856 = vmatpush3.bf16.msra.mxu1 %v4083_v49 }
 0x7d5   :  { %v4084_v13 = vld [vmem:[%s5182_s10 + $0x30] ss:$12 sps:$4 sm:$0xff]   ;;  %3857 = vmatprep.subr.bf16.mxu1 %v4216_v3 }
 0x7d6   :  { %v3790_v15 = vpop.f32.mrf.mxu1 }
 0x7d7   :  { %v4086_v15 = vld [vmem:[%s5182_s10] ss:$12 sps:$4 sm:$0xff]  }
 0x7d8   :  { %v1344_v17 = vpop.f32.mrf.mxu1  ;;  %3858 = vmatpush3.bf16.msra.mxu1 %v4084_v13 }
 0x7d9   :  { %1351 = vrot.lane.b32.xlu1 %v1344_v17, %s4220_s17  ;;  %3859 = vmatprep.subr.bf16.mxu1 %v4216_v3 }
 0x7da   :  { %v3801_v18 = vpop.f32.mrf.mxu1 }
 0x7dc   :  { %v1347_v32 = vpop.f32.mrf.mxu1  ;;  %3860 = vmatpush3.bf16.msra.mxu1 %v4085_v14 }
 0x7dd   :  { %3861 = vmatprep.subr.bf16.mxu1 %v4216_v3 }
 0x7de   :  { %v3802_v48 = vpop.f32.mrf.mxu1 }
 0x7e0   :  { %v1460_v21 = vpop.f32.mrf.mxu1  ;;  %3862 = vmatpush3.bf16.msra.mxu1 %v4086_v15 }
 0x7e1   :  { %1467 = vrot.lane.b32.xlu1 %v1460_v21, %s4221_s18  ;;  %3867 = vmatprep.subr.bf16.mxu1 %v4216_v3 }
 0x7e2   :  { %v3813_v22 = vpop.f32.mrf.mxu1 }
 0x7e4   :  { %v1463_v23 = vpop.f32.mrf.mxu1 }
 0x7e5   :  { %v3455_v23 = vld [vmem:[%s5184_s9] ss:$0 sm:$0xff] }
 0x7e6   :  { %v3814_v24 = vpop.f32.mrf.mxu1 }
 0x7e8   :  { %v1576_v25 = vpop.f32.mrf.mxu1 }
 0x7e9   :  { %1583 = vrot.lane.b32.xlu1 %v1576_v25, %s4219_s6 }
 0x7ea   :  { %v3825_v26 = vpop.f32.mrf.mxu1 }
 0x7ec   :  { %v1579_v27 = vpop.f32.mrf.mxu1 }
 0x7ee   :  { %v3826_v30 = vpop.f32.mrf.mxu1 }
 0x808   :  { %v882_v31 = vpop.permute.xlu0 %881 }
 0x809   :  { %885 = vst.msk [vmem:[#allocation2] sm:$0xff] %vm884_vm15, %v882_v31 }
 0x810   :  { %v999_v33 = vpop.permute.xlu0 %998 }
 0x811   :  { %1002 = vst.msk [vmem:[#allocation2] sm:$0xff] %vm1001_vm1, %v999_v33 }
 0x818   :  { %v1116_v34 = vpop.permute.xlu0 %1115 }
 0x819   :  { %1119 = vst.msk [vmem:[#allocation2] sm:$0xff] %vm1118_vm2, %v1116_v34 }
 0x820   :  { %v1587_v44 = vld [vmem:[#allocation2] sm:$0xff] }
 0x84b   :  { %v1352_v36 = vpop.permute.xlu1 %1351 }
 0x84c   :  { %1354 = vst.msk [vmem:[#allocation2 + $0x8] sm:$0xff] %vm884_vm15, %v1352_v36 }
 0x853   :  { %v1468_v38 = vpop.permute.xlu1 %1467 }
 0x854   :  { %1470 = vst.msk [vmem:[#allocation2 + $0x8] sm:$0xff] %vm1001_vm1, %v1468_v38 }
 0x85b   :  { %v1584_v42 = vpop.permute.xlu1 %1583 }
 0x85c   :  { %1586 = vst.msk [vmem:[#allocation2 + $0x8] sm:$0xff] %vm1118_vm2, %v1584_v42 }
 0x863   :  { %v1588_v28 = vld [vmem:[#allocation2 + $0x8] sm:$0xff] }
 0x864   :  { %v1589_v47 = vpack.c.bf16 %v1588_v28, %v1587_v44 }
 0x866   :  { %3844 = vmatmul.mubr.bf16.vlgmr.msra.gmra.mxu0 %v1589_v47 }
 0x867   :  { %1960 = vmatprep.mubr.bf16.mxu0 %v4215_v0  ;;  %1929 = vmatpush1.bf16.msra.mxu0 %v4055_v29 }
 0x868   :  { %1930 = vmatprep.subr.bf16.mxu0 %v4060_v53  ;;  %v365_v53 = vld [vmem:[%s5185_s2] sm:$0x3] }
 0x869   :  { %vm366_vm3 = vcmp.ne.s32.totalorder %v365_v53, 0 }
 0x86b   :  { %1931 = vmatpush1.bf16.msra.mxu0 %v4058_v54  ;;  %v4865_v54 = vsel %vm366_vm3, 1.0, %v4216_v3 }
 0x86c   :  { %1932 = vmatprep.subr.bf16.mxu0 %v4063_v55  ;;  %v1984_v55 = vrot.slane %v4865_v54, %v649_v40 }
 0x86e   :  { %v1985_v56 = vsub.f32 1.0, %v1984_v55 }
 0x86f   :  { %1933 = vmatpush1.bf16.msra.mxu0 %v4061_v37 }
 0x870   :  { %1934 = vmatprep.subr.bf16.mxu0 %v4066_v52  ;;  %v4870_v37 = vmul.f32 -1e+09, %v1985_v56 }
 0x873   :  { %1935 = vmatpush1.bf16.msra.mxu0 %v4064_v57 }
 0x874   :  { %1936 = vmatprep.subr.bf16.mxu0 %v4069_v58 }
 0x877   :  { %1937 = vmatpush1.bf16.msra.mxu0 %v4067_v59 }
 0x878   :  { %1938 = vmatprep.subr.bf16.mxu0 %v4073_v60 }
 0x87b   :  { %1939 = vmatpush1.bf16.msra.mxu0 %v4071_v61 }
 0x926   :  { %v1688_v62 = vpop.f32.mrf.mxu0 }
 0x927   :  { %v4778_v63 = vadd.f32 %v1688_v62, %v4417_v45  ;;  %v4077_v45 = vld [vmem:[%s5182_s10 + $0x20] ss:$12 sps:$4 sm:$0xff]  }
 0x928   :  { %v3845_v1 = vpop.f32.mrf.mxu0  ;;  %1940 = vmatprep.subr.bf16.mxu0 %v4077_v45 }
 0x929   :  { %v1698_v41 = vmul.f32 %v4778_v63, %v4778_v63 }
 0x92a   :  { %v1691_v2 = vpop.f32.mrf.mxu0 }
 0x92b   :  { %v4783_v4 = vadd.f32 %v1691_v2, %v4421_v50  ;;  %1700 = vadd.xlane.f32.xlu0 %v1698_v41  ;;  %v4075_v50 = vld [vmem:[%s5182_s10 + $0x1c] ss:$12 sps:$4 sm:$0xff]  }
 0x92c   :  { %v3846_v5 = vpop.f32.mrf.mxu0  ;;  %1941 = vmatpush1.bf16.msra.mxu0 %v4075_v50 }
 0x92d   :  { %v1699_v6 = vmul.f32 %v4783_v4, %v4783_v4  ;;  %1942 = vmatprep.subr.bf16.mxu0 %v4081_v8 }
 0x92f   :  { %1702 = vadd.xlane.f32.xlu1 %v1699_v6 }
 0x930   :  { %1943 = vmatpush1.bf16.msra.mxu0 %v4079_v9  ;;  %v1828_v9 = vld [vmem:[%s5183_s3 + $0x10] sm:$0xff] }
 0x931   :  { %3897 = vmatprep.subr.bf16.mxu0 %v4216_v3  ;;  %v1831_v10 = vpack.c.bf16 %v1829_v43, %v1828_v9 }
 0x933   :  { %1961 = vmatmul.mubr.bf16.vlgmr.msra.gmra.mxu0 %v1830_v12 }
 0x934   :  { %1970 = vmatprep.mubr.bf16.mxu0 %v4215_v0 }
 0x93b   :  { %1971 = vmatmul.mubr.bf16.gmra.mxu0 %v1831_v10 }
 0x93c   :  { %3899 = vmatprep.mubr.msk.bf16.mxu0 %vm4217_vm0, %v4216_v3 }
 0x9b4   :  { %v1701_v16 = vpop.xlane.xlu0 %1700 }
 0x9b5   :  { %v1704_v17 = vmul.f32 0.0078125, %v1701_v16 }
 0x9b7   :  { %v1706_v18 = vadd.f32 1e-06, %v1704_v17 }
 0x9b8   :  { %v1703_v32 = vpop.xlane.xlu1 %1702 }
 0x9b9   :  { %4171 = vrsqrt.f32 %v1706_v18  ;;  %v1705_v19 = vmul.f32 0.0078125, %v1703_v32 }
 0x9bb   :  { %v1707_v48 = vadd.f32 1e-06, %v1705_v19 }
 0x9bd   :  { %4173 = vrsqrt.f32 %v1707_v48 }
 0x9c6   :  { %v4172_v20 = vpop.eup %4171 }
 0x9c7   :  { %v1710_v21 = vmul.f32 %v4172_v20, %v4778_v63 }
 0x9c9   :  { %v1718_v25 = vmul.f32 %v3455_v23, %v1710_v21 }
 0x9ca   :  { %v4174_v22 = vpop.eup %4173 }
 0x9cb   :  { %v1711_v24 = vmul.f32 %v4174_v22, %v4783_v4 }
 0x9cd   :  { %v1719_v26 = vmul.f32 %v3455_v23, %v1711_v24 }
 0x9cf   :  { %v1720_v27 = vpack.c.bf16 %v1719_v26, %v1718_v25 }
 0x9d1   :  { %3864 = vmatmul.mubr.bf16.vlgmr.msra.gmra.mxu1 %v1720_v27 }
 0x9d2   :  { %3869 = vmatprep.mubr.msk.bf16.mxu1 %vm4217_vm0, %v4216_v3 }
 0x9f3   :  { %v1962_v30 = vpop.f32.mrf.mxu0 }
 0x9f5   :  { %v1964_v31 = vpop.f32.mrf.mxu0 }
 0x9f7   :  { %v1966_v33 = vpop.f32.mrf.mxu0 }
 0x9f8   :  { %v4842_v34 = vpack.c.bf16 %v1966_v33, %v1962_v30 }
 0x9f9   :  { %v1968_v38 = vpop.f32.mrf.mxu0 }
 0x9fa   :  { %2097 = vrot.lane.b32.xlu1 %v4842_v34, %s4219_s6  ;;  %v1993_v36 = vsel %vm656_vm10, %v4842_v34, 0  ;;  %v4851_v28 = vpack.c.bf16 %v1968_v38, %v1964_v31 }
 0x9fb   :  { %3868 = vmatpush3.bf16.xpose.msra.mxu1 %v1993_v36  ;;  %v1972_v19 = vpop.f32.mrf.mxu0 }
 0x9fc   :  { %3873 = vmatprep.subr.bf16.mxu1 %v4216_v3 }
 0x9fd   :  { %v4902_v48 = vpop.f32.mrf.mxu0 }
 0x9ff   :  { %v1976_v20 = vpop.f32.mrf.mxu0 }
 0xa00   :  { %v2442_v21 = vpack.c.bf16 %v1976_v20, %v1972_v19 }
 0xa02   :  { %v2447_v53 = vsel %vm656_vm10, %v2442_v21, 0 }
 0xa6c   :  { %v2098_v45 = vpop.permute.xlu1 %2097 }
 0xa6d   :  { %v2103_v7 = vsel %vm656_vm10, %v2098_v45, 0 }
 0xa91   :  { %v1819_v42 = vpop.f32.mrf.mxu1 }
 0xa92   :  { %v4849_v44 = vpack.c.bf16 %v1819_v42, %v1819_v42 }
 0xa93   :  { %v3865_v47 = vpop.f32.mrf.mxu1 }
 0xa94   :  { %3870 = vmatmul.mubr.msk.bf16.vlgmr.msra.gmra.mxu1 %vm656_vm10, %v4849_v44 }
 0xa95   :  { %3874 = vmatpush3.bf16.msra.mxu1 %v4851_v28  ;;  %v4856_v29 = vpop.f32.mrf.mxu1  ;;  %3875 = vmatprep.mubr.msk.bf16.mxu1 %vm4217_vm0, %v4216_v3 }
 0xa96   :  { %3879 = vmatprep.subr.bf16.mxu1 %v4216_v3  ;;  %v2441_v30 = vpack.c.bf16 %v4856_v29, %v4856_v29 }
 0xa97   :  { %v3866_v51 = vpop.f32.mrf.mxu1 }
 0xb54   :  { %v2029_v52 = vpop.f32.mrf.mxu1 }
 0xb55   :  { %v2030_v57 = vadd.f32 %v2029_v52, %v4870_v37 }
 0xb56   :  { %v3871_v58 = vpop.f32.mrf.mxu1 }
 0xb57   :  { %v2036_v59 = vsel %vm2035_vm4, %v2030_v57, -inf }
 0xb58   :  { %2037 = vmax.xlane.f32.xlu0 %v2036_v59  ;;  %v2032_v60 = vpop.f32.mrf.mxu1 }
 0xb5a   :  { %v3872_v61 = vpop.f32.mrf.mxu1 }
 0xbe1   :  { %v2038_v62 = vpop.xlane.xlu0 %2037 }
 0xbe2   :  { %v2039_v1 = vsub.f32 %v2030_v57, %v2038_v62 }
 0xbe4   :  { %v2040_v41 = vmul.f32 1.442695, %v2039_v1 }
 0xbe6   :  { %4175 = vpow2.f32 %v2040_v41 }
 0xbf3   :  { %v4176_v2 = vpop.eup %4175 }
 0xbf4   :  { %v2042_v40 = vsel %vm2035_vm4, %v4176_v2, 0.0 }
 0xbf5   :  { %2043 = vadd.xlane.f32.xlu0 %v2042_v40 }
 0xc0b   :  { %2094 = vrot.lane.b32.xlu0 %v4849_v44, %s4219_s6 }
 0xc7e   :  { %v2044_v5 = vpop.xlane.xlu0 %2043 }
 0xc7f   :  { %4177 = vrcp.f32 %v2044_v5 }
 0xc82   :  { %v2095_v8 = vpop.permute.xlu0 %2094 }
 0xc8c   :  { %v4178_v6 = vpop.eup %4177 }
 0xc8d   :  { %v2046_v35 = vmul.f32 %v4178_v6, %v4176_v2 }
 0xc8f   :  { %v2047_v50 = vpack.c.bf16 %v2046_v35, %v2046_v35 }
 0xc91   :  { %3876 = vmatmul.mubr.msk.bf16.vlgmr.msra.gmra.mxu1 %vm2035_vm4, %v2047_v50 }
 0xc92   :  { %3880 = vmatpush3.bf16.xpose.msra.mxu1 %v2103_v7  ;;  %3881 = vmatprep.mubr.msk.bf16.mxu1 %vm4217_vm0, %v4216_v3  ;;  %v2438_v7 = vrot.slane %v4865_v54, %v1122_v46 }
 0xc93   :  { %3885 = vmatprep.subr.bf16.mxu1 %v4216_v3 }
 0xc94   :  { %v2439_v10 = vsub.f32 1.0, %v2438_v7 }
 0xc99   :  { %3882 = vmatmul.mubr.msk.bf16.vlgmr.msra.gmra.mxu1 %vm656_vm10, %v2095_v8 }
 0xc9a   :  { %3887 = vmatprep.mubr.msk.bf16.mxu1 %vm4217_vm0, %v4216_v3 }
 0xd51   :  { %v2086_v11 = vpop.f32.mrf.mxu1 }
 0xd52   :  { %2092 = vst.msk [vmem:[#allocation2] sm:$0xff] %vm656_vm10, %v2086_v11 }
 0xd53   :  { %v3877_v12 = vpop.f32.mrf.mxu1 }
 0xd55   :  { %v2089_v49 = vpop.f32.mrf.mxu1 }
 0xd57   :  { %v3878_v13 = vpop.f32.mrf.mxu1 }
 0xd58   :  { %v2440_v13 = vmul.f32 -1e+09, %v2439_v10 }
 0xd59   :  { %v2139_v14 = vpop.f32.mrf.mxu1 }
 0xd5a   :  { %v2140_v15 = vadd.f32 %v2139_v14, %v4870_v37 }
 0xd5b   :  { %v3883_v16 = vpop.f32.mrf.mxu1 }
 0xd5c   :  { %v2145_v17 = vsel %vm2035_vm4, %v2140_v15, -inf }
 0xd5d   :  { %2146 = vmax.xlane.f32.xlu1 %v2145_v17  ;;  %v2142_v18 = vpop.f32.mrf.mxu1 }
 0xd5f   :  { %v3884_v32 = vpop.f32.mrf.mxu1 }
 0xd6e   :  { %2158 = vrot.lane.b32.xlu1 %v4851_v28, %s4219_s6 }
 0xd72   :  { %2209 = vrot.lane.b32.xlu1 %v4849_v44, %s4221_s18 }
 0xd76   :  { %2324 = vrot.lane.b32.xlu1 %v4842_v34, %s4220_s17 }
 0xd7a   :  { %2550 = vrot.lane.b32.xlu1 %v2442_v21, %s4219_s6 }
 0xd7e   :  { %2664 = vrot.lane.b32.xlu1 %v2442_v21, %s4221_s18 }
 0xd82   :  { %2777 = vrot.lane.b32.xlu1 %v2442_v21, %s4220_s17 }
 0xde6   :  { %v2147_v22 = vpop.xlane.xlu1 %2146 }
 0xde7   :  { %v2148_v23 = vsub.f32 %v2140_v15, %v2147_v22 }
 0xde9   :  { %v2149_v24 = vmul.f32 1.442695, %v2148_v23 }
 0xdea   :  { %v2159_v25 = vpop.permute.xlu1 %2158 }
 0xdeb   :  { %4179 = vpow2.f32 %v2149_v24  ;;  %3886 = vmatpush3.bf16.msra.mxu1 %v2159_v25 }
 0xdec   :  { %3891 = vmatprep.subr.bf16.mxu1 %v4216_v3 }
 0xdee   :  { %v2210_v47 = vpop.permute.xlu1 %2209 }
 0xdf8   :  { %v4180_v26 = vpop.eup %4179 }
 0xdf9   :  { %v2151_v27 = vsel %vm2035_vm4, %v4180_v26, 0.0 }
 0xdfa   :  { %2152 = vadd.xlane.f32.xlu0 %v2151_v27 }
 0xe10   :  { %2211 = vrot.lane.b32.xlu0 %v4842_v34, %s4221_s18 }
 0xe14   :  { %2322 = vrot.lane.b32.xlu0 %v4849_v44, %s4220_s17  ;;  %v2325_v44 = vpop.permute.xlu1 %2324 }
 0xe15   :  { %v2330_v29 = vsel %vm656_vm10, %v2325_v44, 0 }
 0xe18   :  { %2547 = vrot.lane.b32.xlu0 %v2441_v30, %s4219_s6  ;;  %v2551_v55 = vpop.permute.xlu1 %2550 }
 0xe19   :  { %v2556_v56 = vsel %vm656_vm10, %v2551_v55, 0 }
 0xe1c   :  { %2662 = vrot.lane.b32.xlu0 %v2441_v30, %s4221_s18  ;;  %v2665_v52 = vpop.permute.xlu1 %2664 }
 0xe1d   :  { %v2670_v57 = vsel %vm656_vm10, %v2665_v52, 0 }
 0xe20   :  { %2775 = vrot.lane.b32.xlu0 %v2441_v30, %s4220_s17  ;;  %v2778_v59 = vpop.permute.xlu1 %2777 }
 0xe21   :  { %v2783_v60 = vsel %vm656_vm10, %v2778_v59, 0 }
 0xe83   :  { %v2153_v31 = vpop.xlane.xlu0 %2152 }
 0xe84   :  { %4181 = vrcp.f32 %v2153_v31 }
 0xe87   :  { %v2212_v38 = vpop.permute.xlu0 %2211 }
 0xe88   :  { %v2217_v34 = vsel %vm656_vm10, %v2212_v38, 0 }
 0xe8b   :  { %v2323_v51 = vpop.permute.xlu0 %2322 }
 0xe8f   :  { %v2548_v58 = vpop.permute.xlu0 %2547 }
 0xe91   :  { %v4182_v33 = vpop.eup %4181 }
 0xe92   :  { %v2155_v36 = vmul.f32 %v4182_v33, %v4180_v26 }
 0xe93   :  { %v2663_v61 = vpop.permute.xlu0 %2662 }
 0xe94   :  { %v2156_v42 = vpack.c.bf16 %v2155_v36, %v2155_v36 }
 0xe96   :  { %3888 = vmatmul.mubr.msk.bf16.vlgmr.msra.gmra.mxu1 %vm2035_vm4, %v2156_v42 }
 0xe97   :  { %3892 = vmatpush3.bf16.xpose.msra.mxu1 %v2217_v34  ;;  %3893 = vmatprep.mubr.msk.bf16.mxu1 %vm4217_vm0, %v4216_v3  ;;  %v2776_v62 = vpop.permute.xlu0 %2775 }
 0xe98   :  { %3903 = vmatprep.subr.bf16.mxu1 %v4216_v3 }
 0xe9e   :  { %3894 = vmatmul.mubr.msk.bf16.vlgmr.msra.gmra.mxu1 %vm656_vm10, %v2210_v47 }
 0xe9f   :  { %3904 = vmatpush3.bf16.xpose.msra.mxu1 %v2330_v29  ;;  %3905 = vmatprep.mubr.msk.bf16.mxu1 %vm4217_vm0, %v4216_v3 }
 0xea0   :  { %3915 = vmatprep.subr.bf16.mxu1 %v4216_v3 }
 0xea6   :  { %3906 = vmatmul.mubr.msk.bf16.vlgmr.msra.gmra.mxu1 %vm656_vm10, %v2323_v51 }
 0xea7   :  { %3916 = vmatpush3.bf16.xpose.msra.mxu1 %v2447_v53  ;;  %3917 = vmatprep.mubr.msk.bf16.mxu1 %vm4217_vm0, %v4216_v3 }
 0xea8   :  { %3927 = vmatprep.subr.bf16.mxu1 %v4216_v3 }
 0xeae   :  { %3918 = vmatmul.mubr.msk.bf16.vlgmr.msra.gmra.mxu1 %vm656_vm10, %v2441_v30 }
 0xeaf   :  { %3928 = vmatpush3.bf16.xpose.msra.mxu1 %v2556_v56  ;;  %3929 = vmatprep.mubr.msk.bf16.mxu1 %vm4217_vm0, %v4216_v3 }
 0xeb0   :  { %3939 = vmatprep.subr.bf16.mxu1 %v4216_v3 }
 0xeb6   :  { %3930 = vmatmul.mubr.msk.bf16.vlgmr.msra.gmra.mxu1 %vm656_vm10, %v2548_v58 }
 0xeb7   :  { %3940 = vmatpush3.bf16.xpose.msra.mxu1 %v2670_v57  ;;  %3941 = vmatprep.mubr.msk.bf16.mxu1 %vm4217_vm0, %v4216_v3 }
 0xeb8   :  { %3951 = vmatprep.subr.bf16.mxu1 %v4216_v3 }
 0xebe   :  { %3942 = vmatmul.mubr.msk.bf16.vlgmr.msra.gmra.mxu1 %vm656_vm10, %v2663_v61 }
 0xebf   :  { %3952 = vmatpush3.bf16.xpose.msra.mxu1 %v2783_v60  ;;  %3953 = vmatprep.mubr.msk.bf16.mxu1 %vm4217_vm0, %v4216_v3 }
 0xec0   :  { %3963 = vmatprep.subr.bf16.mxu1 %v4216_v3 }
 0xec6   :  { %3954 = vmatmul.mubr.msk.bf16.vlgmr.msra.gmra.mxu1 %vm656_vm10, %v2776_v62 }
 0xec7   :  { %3979 = vmatprep.mubr.msk.bf16.mxu1 %vm4217_vm0, %v4216_v3 }
 0xf56   :  { %v4951_v1 = vpop.f32.mrf.mxu1 }
 0xf58   :  { %v3889_v41 = vpop.f32.mrf.mxu1 }
 0xf5a   :  { %v2201_v2 = vpop.f32.mrf.mxu1 }
 0xf5c   :  { %v3890_v40 = vpop.f32.mrf.mxu1 }
 0xf5e   :  { %v2253_v5 = vpop.f32.mrf.mxu1 }
 0xf5f   :  { %v2254_v6 = vadd.f32 %v2253_v5, %v4870_v37 }
 0xf60   :  { %v3895_v35 = vpop.f32.mrf.mxu1 }
 0xf61   :  { %v2259_v45 = vsel %vm2035_vm4, %v2254_v6, -inf }
 0xf62   :  { %v2256_v50 = vpop.f32.mrf.mxu1  ;;  %2260 = vmax.xlane.f32.xlu1 %v2259_v45 }
 0xf64   :  { %v3896_v8 = vpop.f32.mrf.mxu1 }
 0xf66   :  { %v2366_v9 = vpop.f32.mrf.mxu1 }
 0xf67   :  { %v2367_v43 = vadd.f32 %v2366_v9, %v4870_v37 }
 0xf68   :  { %v3907_v11 = vpop.f32.mrf.mxu1 }
 0xf69   :  { %v2372_v12 = vsel %vm2035_vm4, %v2367_v43, -inf }
 0xf6a   :  { %2373 = vmax.xlane.f32.xlu0 %v2372_v12  ;;  %v2369_v49 = vpop.f32.mrf.mxu1  ;;  %v1978_v12 = vpop.f32.mrf.mxu0 }
 0xf6b   :  { %v2501_v49 = vpack.c.bf16 %v1978_v12, %v4902_v48 }
 0xf6c   :  { %v3908_v14 = vpop.f32.mrf.mxu1 }
 0xf6e   :  { %v2483_v15 = vpop.f32.mrf.mxu1 }
 0xf6f   :  { %v2484_v16 = vadd.f32 %v2483_v15, %v2440_v13 }
 0xf70   :  { %v3919_v17 = vpop.f32.mrf.mxu1 }
 0xf71   :  { %v2489_v18 = vsel %vm2035_vm4, %v2484_v16, -inf }
 0xf72   :  { %2490 = vmax.xlane.f32.xlu0 %v2489_v18  ;;  %v2486_v39 = vpop.f32.mrf.mxu1 }
 0xf74   :  { %v3920_v46 = vpop.f32.mrf.mxu1 }
 0xf76   :  { %v2592_v54 = vpop.f32.mrf.mxu1 }
 0xf77   :  { %v2593_v32 = vadd.f32 %v2592_v54, %v2440_v13 }
 0xf78   :  { %v3931_v19 = vpop.f32.mrf.mxu1 }
 0xf79   :  { %v2598_v37 = vsel %vm2035_vm4, %v2593_v32, -inf }
 0xf7a   :  { %2599 = vmax.xlane.f32.xlu1 %v2598_v37  ;;  %v2595_v20 = vpop.f32.mrf.mxu1 }
 0xf7c   :  { %v3932_v21 = vpop.f32.mrf.mxu1 }
 0xf7e   :  { %v2706_v22 = vpop.f32.mrf.mxu1 }
 0xf7f   :  { %v2707_v23 = vadd.f32 %v2706_v22, %v2440_v13 }
 0xf80   :  { %v3943_v24 = vpop.f32.mrf.mxu1 }
 0xf81   :  { %v2712_v25 = vsel %vm2035_vm4, %v2707_v23, -inf }
 0xf82   :  { %2713 = vmax.xlane.f32.xlu0 %v2712_v25  ;;  %v2709_v26 = vpop.f32.mrf.mxu1 }
 0xf84   :  { %v3944_v27 = vpop.f32.mrf.mxu1 }
 0xf86   :  { %v2819_v30 = vpop.f32.mrf.mxu1 }
 0xf87   :  { %v2820_v31 = vadd.f32 %v2819_v30, %v2440_v13 }
 0xf88   :  { %v3955_v33 = vpop.f32.mrf.mxu1 }
 0xf89   :  { %v2825_v36 = vsel %vm2035_vm4, %v2820_v31, -inf }
 0xf8a   :  { %2826 = vmax.xlane.f32.xlu1 %v2825_v36  ;;  %v2822_v38 = vpop.f32.mrf.mxu1 }
 0xf8c   :  { %v3956_v42 = vpop.f32.mrf.mxu1 }
 0xfeb   :  { %v2261_v47 = vpop.xlane.xlu1 %2260 }
 0xfec   :  { %v2262_v34 = vsub.f32 %v2254_v6, %v2261_v47 }
 0xfee   :  { %v2263_v44 = vmul.f32 1.442695, %v2262_v34 }
 0xff0   :  { %4183 = vpow2.f32 %v2263_v44  ;;  %v4087_v44 = vld [vmem:[%s5186_s11 + $0x38] sm:$0xff]  }
 0xff1   :  { %3964 = vmatpush3.bf16.msra.mxu1 %v4087_v44  ;;  %v4119_v44 = vld [vmem:[%s5188_s14 + $0x78] sm:$0xff]  }
 0xff2   :  { %3965 = vmatprep.subr.bf16.mxu1 %v4216_v3 }
 0xff3   :  { %v2374_v29 = vpop.xlane.xlu0 %2373 }
 0xff4   :  { %v2375_v51 = vsub.f32 %v2367_v43, %v2374_v29  ;;  %v4088_v29 = vld [vmem:[%s5186_s11 + $0x30] sm:$0xff]  }
 0xff5   :  { %3966 = vmatpush3.bf16.msra.mxu1 %v4088_v29  ;;  %v4120_v29 = vld [vmem:[%s5188_s14 + $0x38] sm:$0xff]  }
 0xff6   :  { %v2376_v53 = vmul.f32 1.442695, %v2375_v51  ;;  %3967 = vmatprep.subr.bf16.mxu1 %v4216_v3 }
 0xff8   :  { %4185 = vpow2.f32 %v2376_v53 }
 0xffb   :  { %v2491_v55 = vpop.xlane.xlu0 %2490 }
 0xffc   :  { %v2492_v56 = vsub.f32 %v2484_v16, %v2491_v55 }
 0xffd   :  { %v4184_v52 = vpop.eup %4183 }
 0xffe   :  { %v2493_v57 = vmul.f32 1.442695, %v2492_v56  ;;  %v2265_v58 = vsel %vm2035_vm4, %v4184_v52, 0.0 }
 0xfff   :  { %2266 = vadd.xlane.f32.xlu0 %v2265_v58 }
0x1000   :  { %4187 = vpow2.f32 %v2493_v57 }
0x1003   :  { %v2600_v41 = vpop.xlane.xlu1 %2599 }
0x1004   :  { %v2601_v2 = vsub.f32 %v2593_v32, %v2600_v41  ;;  %v4089_v41 = vld [vmem:[%s5186_s11 + $0x28] sm:$0xff]  }
0x1005   :  { %v4186_v59 = vpop.eup %4185  ;;  %3968 = vmatpush3.bf16.msra.mxu1 %v4089_v41 }
0x1006   :  { %v2378_v60 = vsel %vm2035_vm4, %v4186_v59, 0.0  ;;  %v2602_v5 = vmul.f32 1.442695, %v2601_v2  ;;  %v4090_v2 = vld [vmem:[%s5186_s11 + $0x20] sm:$0xff]   ;;  %3969 = vmatprep.subr.bf16.mxu1 %v4216_v3 }
0x1007   :  { %2379 = vadd.xlane.f32.xlu1 %v2378_v60 }
0x1008   :  { %4189 = vpow2.f32 %v2602_v5 }
0x1009   :  { %3970 = vmatpush3.bf16.msra.mxu1 %v4090_v2 }
0x100a   :  { %3971 = vmatprep.subr.bf16.mxu1 %v4216_v3 }
0x100b   :  { %v2714_v40 = vpop.xlane.xlu0 %2713 }
0x100c   :  { %v2715_v6 = vsub.f32 %v2707_v23, %v2714_v40  ;;  %v4091_v40 = vld [vmem:[%s5186_s11 + $0x18] sm:$0xff]  }
0x100d   :  { %v4188_v61 = vpop.eup %4187  ;;  %3972 = vmatpush3.bf16.msra.mxu1 %v4091_v40 }
0x100e   :  { %v2495_v62 = vsel %vm2035_vm4, %v4188_v61, 0.0  ;;  %v2716_v45 = vmul.f32 1.442695, %v2715_v6  ;;  %3973 = vmatprep.subr.bf16.mxu1 %v4216_v3  ;;  %v4092_v6 = vld [vmem:[%s5186_s11 + $0x10] sm:$0xff]  }
0x100f   :  { %2496 = vadd.xlane.f32.xlu0 %v2495_v62 }
0x1010   :  { %4191 = vpow2.f32 %v2716_v45 }
0x1011   :  { %3974 = vmatpush3.bf16.msra.mxu1 %v4092_v6 }
0x1012   :  { %3975 = vmatprep.subr.bf16.mxu1 %v4216_v3 }
0x1013   :  { %v2827_v35 = vpop.xlane.xlu1 %2826 }
0x1014   :  { %v2828_v50 = vsub.f32 %v2820_v31, %v2827_v35 }
0x1015   :  { %v4190_v8 = vpop.eup %4189 }
0x1016   :  { %v2829_v7 = vmul.f32 1.442695, %v2828_v50  ;;  %v2604_v9 = vsel %vm2035_vm4, %v4190_v8, 0.0  ;;  %v4093_v50 = vld [vmem:[%s5186_s11 + $0x8] sm:$0xff]  }
0x1017   :  { %3976 = vmatpush3.bf16.msra.mxu1 %v4093_v50 }
0x1018   :  { %2384 = vrot.lane.b32.xlu1 %v4851_v28, %s4220_s17  ;;  %4193 = vpow2.f32 %v2829_v7  ;;  %3977 = vmatprep.subr.bf16.mxu1 %v4216_v3 }
0x101d   :  { %v4972_v43 = vpop.eup %4191 }
0x101e   :  { %v2718_v10 = vsel %vm2035_vm4, %v4972_v43, 0.0 }
0x1025   :  { %2271 = vrot.lane.b32.xlu0 %v4851_v28, %s4221_s18  ;;  %v4976_v11 = vpop.eup %4193 }
0x1026   :  { %v2831_v28 = vsel %vm2035_vm4, %v4976_v11, 0.0 }
0x103c   :  { %2605 = vadd.xlane.f32.xlu1 %v2604_v9 }
0x1040   :  { %2719 = vadd.xlane.f32.xlu1 %v2718_v10 }
0x1044   :  { %2832 = vadd.xlane.f32.xlu0 %v2831_v28 }
0x1051   :  { %2611 = vrot.lane.b32.xlu1 %v2501_v49, %s4219_s6 }
0x1055   :  { %2724 = vrot.lane.b32.xlu1 %v2501_v49, %s4221_s18 }
0x1059   :  { %2837 = vrot.lane.b32.xlu1 %v2501_v49, %s4220_s17 }
0x105d   :  { %2205 = vrot.lane.b32.xlu1 %v4951_v1, %s4220_s17 }
0x1088   :  { %v2267_v13 = vpop.xlane.xlu0 %2266 }
0x1089   :  { %4195 = vrcp.f32 %v2267_v13 }
0x1090   :  { %v2380_v14 = vpop.xlane.xlu1 %2379 }
0x1091   :  { %4197 = vrcp.f32 %v2380_v14 }
0x1094   :  { %v2385_v46 = vpop.permute.xlu1 %2384 }
0x1096   :  { %v4196_v15 = vpop.eup %4195 }
0x1097   :  { %v2269_v17 = vmul.f32 %v4196_v15, %v4184_v52 }
0x1098   :  { %v2497_v16 = vpop.xlane.xlu0 %2496 }
0x1099   :  { %4199 = vrcp.f32 %v2497_v16  ;;  %v2270_v48 = vpack.c.bf16 %v2269_v17, %v2269_v17 }
0x109c   :  { %v2272_v18 = vpop.permute.xlu0 %2271 }
0x109d   :  { %3898 = vmatpush3.bf16.msra.mxu0 %v2272_v18 }
0x109e   :  { %3909 = vmatprep.subr.bf16.mxu0 %v4216_v3  ;;  %v4198_v39 = vpop.eup %4197 }
0x109f   :  { %v2382_v1 = vmul.f32 %v4198_v39, %v4186_v59 }
0x10a0   :  { %3900 = vmatmul.mubr.msk.bf16.vlgmr.msra.gmra.mxu0 %vm2035_vm4, %v2270_v48 }
0x10a1   :  { %3910 = vmatpush3.bf16.msra.mxu0 %v2385_v46  ;;  %3911 = vmatprep.mubr.msk.bf16.mxu0 %vm4217_vm0, %v4216_v3  ;;  %v2383_v54 = vpack.c.bf16 %v2382_v1, %v2382_v1  ;;  %v4095_v46 = vld [vmem:[%s5187_s13 + $0x70] ss:$8 sps:$4 sm:$0xff]   ;;  %v4097_v1 = vld [vmem:[%s5187_s13 + $0x74] ss:$8 sps:$4 sm:$0xff]  }
0x10a2   :  { %3921 = vmatprep.subr.bf16.mxu0 %v4216_v3 }
0x10a6   :  { %v4200_v32 = vpop.eup %4199 }
0x10a7   :  { %v2499_v19 = vmul.f32 %v4200_v32, %v4188_v61 }
0x10a8   :  { %3912 = vmatmul.mubr.msk.bf16.vlgmr.msra.gmra.mxu0 %vm2035_vm4, %v2383_v54 }
0x10a9   :  { %3922 = vmatpush3.bf16.msra.mxu0 %v2501_v49  ;;  %3923 = vmatprep.mubr.msk.bf16.mxu0 %vm4217_vm0, %v4216_v3  ;;  %v2500_v37 = vpack.c.bf16 %v2499_v19, %v2499_v19 }
0x10aa   :  { %3933 = vmatprep.subr.bf16.mxu0 %v4216_v3 }
0x10b0   :  { %3924 = vmatmul.mubr.msk.bf16.vlgmr.msra.gmra.mxu0 %vm2035_vm4, %v2500_v37 }
0x10b1   :  { %3935 = vmatprep.mubr.msk.bf16.mxu0 %vm4217_vm0, %v4216_v3 }
0x10c5   :  { %v2606_v20 = vpop.xlane.xlu1 %2605 }
0x10c6   :  { %4201 = vrcp.f32 %v2606_v20 }
0x10c9   :  { %v2720_v21 = vpop.xlane.xlu1 %2719 }
0x10ca   :  { %4203 = vrcp.f32 %v2720_v21 }
0x10cd   :  { %v2612_v22 = vpop.permute.xlu1 %2611  ;;  %v2833_v23 = vpop.xlane.xlu0 %2832 }
0x10ce   :  { %3934 = vmatpush3.bf16.msra.mxu0 %v2612_v22  ;;  %4205 = vrcp.f32 %v2833_v23 }
0x10cf   :  { %3945 = vmatprep.subr.bf16.mxu0 %v4216_v3 }
0x10d1   :  { %v2725_v24 = vpop.permute.xlu1 %2724 }
0x10d3   :  { %v4202_v25 = vpop.eup %4201 }
0x10d4   :  { %v2608_v26 = vmul.f32 %v4202_v25, %v4190_v8  ;;  %v4094_v8 = vld [vmem:[%s5186_s11] sm:$0xff]   ;;  %v4101_v25 = vld [vmem:[%s5187_s13 + $0x50] ss:$8 sps:$4 sm:$0xff]  }
0x10d5   :  { %v2838_v27 = vpop.permute.xlu1 %2837  ;;  %3978 = vmatpush3.bf16.msra.mxu1 %v4094_v8 }
0x10d6   :  { %v2609_v30 = vpack.c.bf16 %v2608_v26, %v2608_v26  ;;  %v4106_v26 = vld [vmem:[%s5187_s13 + $0x44] ss:$8 sps:$4 sm:$0xff]   ;;  %3669 = vmatprep.subr.bf16.mxu1 %v4119_v44 }
0x10d7   :  { %v4204_v31 = vpop.eup %4203 }
0x10d8   :  { %3936 = vmatmul.mubr.msk.bf16.vlgmr.msra.gmra.mxu0 %vm2035_vm4, %v2609_v30  ;;  %v2722_v36 = vmul.f32 %v4204_v31, %v4972_v43  ;;  %v4109_v30 = vld [vmem:[%s5187_s13 + $0x34] ss:$8 sps:$4 sm:$0xff]   ;;  %v4107_v31 = vld [vmem:[%s5187_s13 + $0x30] ss:$8 sps:$4 sm:$0xff]  }
0x10d9   :  { %3946 = vmatpush3.bf16.msra.mxu0 %v2725_v24  ;;  %v2206_v33 = vpop.permute.xlu1 %2205  ;;  %3947 = vmatprep.mubr.msk.bf16.mxu0 %vm4217_vm0, %v4216_v3  ;;  %v4100_v24 = vld [vmem:[%s5187_s13 + $0x64] ss:$8 sps:$4 sm:$0xff]  }
0x10da   :  { %2208 = vst.msk [vmem:[#allocation2] sm:$0xff] %vm884_vm15, %v2206_v33  ;;  %3957 = vmatprep.subr.bf16.mxu0 %v4216_v3  ;;  %v2723_v38 = vpack.c.bf16 %v2722_v36, %v2722_v36  ;;  %v4112_v33 = vld [vmem:[%s5187_s13 + $0x24] ss:$8 sps:$4 sm:$0xff]   ;;  %v4110_v36 = vld [vmem:[%s5187_s13 + $0x20] ss:$8 sps:$4 sm:$0xff]  }
0x10db   :  { %v4206_v42 = vpop.eup %4205 }
0x10dc   :  { %v2835_v47 = vmul.f32 %v4206_v42, %v4976_v11  ;;  %v4113_v42 = vld [vmem:[%s5187_s13 + $0x10] ss:$8 sps:$4 sm:$0xff]  }
0x10de   :  { %v2836_v34 = vpack.c.bf16 %v2835_v47, %v2835_v47  ;;  %v4118_v47 = vld [vmem:[%s5187_s13 + $0x4] ss:$8 sps:$4 sm:$0xff]  }
0x10e0   :  { %3948 = vmatmul.mubr.msk.bf16.vlgmr.msra.gmra.mxu0 %vm2035_vm4, %v2723_v38  ;;  %v4115_v38 = vld [vmem:[%s5187_s13 + $0x14] ss:$8 sps:$4 sm:$0xff]  }
0x10e1   :  { %3958 = vmatpush3.bf16.msra.mxu0 %v2838_v27  ;;  %3959 = vmatprep.mubr.msk.bf16.mxu0 %vm4217_vm0, %v4216_v3  ;;  %v4104_v27 = vld [vmem:[%s5187_s13 + $0x40] ss:$8 sps:$4 sm:$0xff]  }
0x10e2   :  { %3118 = vmatprep.subr.bf16.mxu0 %v4097_v1 }
0x10e8   :  { %3960 = vmatmul.mubr.msk.bf16.vlgmr.msra.gmra.mxu0 %vm2035_vm4, %v2836_v34  ;;  %v4116_v34 = vld [vmem:[%s5187_s13] ss:$8 sps:$4 sm:$0xff]  }
0x10e9   :  { %3150 = vmatprep.mubr.bf16.mxu0 %v4215_v0  ;;  %3119 = vmatpush1.bf16.msra.mxu0 %v4095_v46 }
0x10ea   :  { %3120 = vmatprep.subr.bf16.mxu0 %v4100_v24 }
0x1160   :  { %v2311_v51 = vpop.f32.mrf.mxu0 }
0x1161   :  { %2318 = vrot.lane.b32.xlu1 %v2311_v51, %s4221_s18  ;;  %v4121_v51 = vld [vmem:[%s5188_s14 + $0x70] sm:$0xff]  }
0x1162   :  { %v3901_v53 = vpop.f32.mrf.mxu0 }
0x1163   :  { %v4122_v53 = vld [vmem:[%s5188_s14 + $0x30] sm:$0xff]  }
0x1164   :  { %v2314_v55 = vpop.f32.mrf.mxu0 }
0x1165   :  { %v4123_v55 = vld [vmem:[%s5188_s14 + $0x68] sm:$0xff]  }
0x1166   :  { %v3902_v0 = vpop.f32.mrf.mxu0 }
0x1167   :  { %v4124_v0 = vld [vmem:[%s5188_s14 + $0x28] sm:$0xff]  }
0x1168   :  { %v2424_v56 = vpop.f32.mrf.mxu0 }
0x116a   :  { %v3913_v52 = vpop.f32.mrf.mxu0 }
0x116b   :  { %v4126_v52 = vld [vmem:[%s5188_s14 + $0x20] sm:$0xff]  }
0x116c   :  { %v2427_v57 = vpop.f32.mrf.mxu0 }
0x116d   :  { %v4127_v57 = vld [vmem:[%s5188_s14 + $0x58] sm:$0xff]  }
0x116e   :  { %v3914_v58 = vpop.f32.mrf.mxu0 }
0x116f   :  { %v4128_v58 = vld [vmem:[%s5188_s14 + $0x18] sm:$0xff]  }
0x1170   :  { %v2539_v59 = vpop.f32.mrf.mxu0 }
0x1171   :  { %2545 = vst.msk [vmem:[#allocation2 + $0x8] sm:$0xff] %vm656_vm10, %v2539_v59 }
0x1172   :  { %v3925_v60 = vpop.f32.mrf.mxu0 }
0x1174   :  { %v2542_v61 = vpop.f32.mrf.mxu0 }
0x1176   :  { %v3926_v62 = vpop.f32.mrf.mxu0 }
0x1198   :  { %v2651_v5 = vpop.f32.mrf.mxu0 }
0x1199   :  { %2658 = vrot.lane.b32.xlu1 %v2651_v5, %s4220_s17 }
0x119a   :  { %v3937_v35 = vpop.f32.mrf.mxu0 }
0x119b   :  { %v3504_v35 = vld [vmem:[%s5189_s12] ss:$0 sm:$0xff] }
0x119c   :  { %v2654_v45 = vpop.f32.mrf.mxu0 }
0x119e   :  { %v3938_v7 = vpop.f32.mrf.mxu0 }
0x11a0   :  { %v2764_v9 = vpop.f32.mrf.mxu0 }
0x11a1   :  { %2771 = vrot.lane.b32.xlu1 %v2764_v9, %s4221_s18  ;;  %v4129_v9 = vld [vmem:[%s5188_s14 + $0x50] sm:$0xff]  }
0x11a2   :  { %v3949_v43 = vpop.f32.mrf.mxu0 }
0x11a3   :  { %v4130_v43 = vld [vmem:[%s5188_s14 + $0x10] sm:$0xff]  }
0x11a4   :  { %v2767_v10 = vpop.f32.mrf.mxu0 }
0x11a5   :  { %2431 = vrot.lane.b32.xlu1 %v2424_v56, %s4219_s6  ;;  %v4125_v56 = vld [vmem:[%s5188_s14 + $0x60] sm:$0xff]   ;;  %v4131_v10 = vld [vmem:[%s5188_s14 + $0x48] sm:$0xff]  }
0x11a6   :  { %v3950_v11 = vpop.f32.mrf.mxu0 }
0x11a7   :  { %v4132_v11 = vld [vmem:[%s5188_s14 + $0x8] sm:$0xff]  }
0x11a8   :  { %v2877_v28 = vpop.f32.mrf.mxu0 }
0x11a9   :  { %2884 = vrot.lane.b32.xlu0 %v2877_v28, %s4219_s6  ;;  %v4133_v28 = vld [vmem:[%s5188_s14 + $0x40] sm:$0xff]  }
0x11aa   :  { %v3961_v12 = vpop.f32.mrf.mxu0 }
0x11ab   :  { %v4134_v12 = vld [vmem:[%s5188_s14] sm:$0xff]  }
0x11ac   :  { %v2880_v49 = vpop.f32.mrf.mxu0 }
0x11ae   :  { %v3962_v13 = vpop.f32.mrf.mxu0 }
0x11d3   :  { %v2319_v14 = vpop.permute.xlu1 %2318 }
0x11d4   :  { %2321 = vst.msk [vmem:[#allocation2] sm:$0xff] %vm1001_vm1, %v2319_v14 }
0x120b   :  { %v2659_v15 = vpop.permute.xlu1 %2658 }
0x120c   :  { %2661 = vst.msk [vmem:[#allocation2 + $0x8] sm:$0xff] %vm884_vm15, %v2659_v15 }
0x1213   :  { %v2772_v3 = vpop.permute.xlu1 %2771 }
0x1214   :  { %2774 = vst.msk [vmem:[#allocation2 + $0x8] sm:$0xff] %vm1001_vm1, %v2772_v3 }
0x1217   :  { %v2432_v16 = vpop.permute.xlu1 %2431 }
0x1218   :  { %2434 = vst.msk [vmem:[#allocation2] sm:$0xff] %vm1118_vm2, %v2432_v16 }
0x121b   :  { %v2885_v17 = vpop.permute.xlu0 %2884 }
0x121c   :  { %2887 = vst.msk [vmem:[#allocation2 + $0x8] sm:$0xff] %vm1118_vm2, %v2885_v17 }
0x121f   :  { %v2888_v18 = vld [vmem:[#allocation2] sm:$0xff] }
0x1223   :  { %v2889_v48 = vld [vmem:[#allocation2 + $0x8] sm:$0xff] }
0x1224   :  { %v2890_v39 = vpack.c.bf16 %v2889_v48, %v2888_v18 }
0x1226   :  { %3980 = vmatmul.mubr.bf16.vlgmr.msra.gmra.mxu1 %v2890_v39 }
0x1227   :  { %3670 = vmatpush3.bf16.msra.mxu1 %v4120_v29 }
0x1228   :  { %3671 = vmatprep.subr.bf16.mxu1 %v4121_v51 }
0x122b   :  { %3672 = vmatpush3.bf16.msra.mxu1 %v4122_v53 }
0x122c   :  { %3673 = vmatprep.subr.bf16.mxu1 %v4123_v55 }
0x122f   :  { %3674 = vmatpush3.bf16.msra.mxu1 %v4124_v0 }
0x1230   :  { %3675 = vmatprep.subr.bf16.mxu1 %v4125_v56 }
0x1233   :  { %3676 = vmatpush3.bf16.msra.mxu1 %v4126_v52 }
0x1234   :  { %3677 = vmatprep.subr.bf16.mxu1 %v4127_v57 }
0x1237   :  { %3678 = vmatpush3.bf16.msra.mxu1 %v4128_v58 }
0x1238   :  { %3679 = vmatprep.subr.bf16.mxu1 %v4129_v9 }
0x123b   :  { %3680 = vmatpush3.bf16.msra.mxu1 %v4130_v43 }
0x123c   :  { %3681 = vmatprep.subr.bf16.mxu1 %v4131_v10 }
0x123f   :  { %3682 = vmatpush3.bf16.msra.mxu1 %v4132_v11 }
0x1240   :  { %3683 = vmatprep.subr.bf16.mxu1 %v4133_v28 }
0x1243   :  { %3684 = vmatpush3.bf16.msra.mxu1 %v4134_v12 }
0x12e6   :  { %v2989_v54 = vpop.f32.mrf.mxu1 }
0x12e7   :  { %v5060_v32 = vadd.f32 %v2989_v54, %v4778_v63  ;;  %v4098_v63 = vld [vmem:[%s5187_s13 + $0x60] ss:$8 sps:$4 sm:$0xff]  }
0x12e8   :  { %v3981_v19 = vpop.f32.mrf.mxu1  ;;  %3121 = vmatpush1.bf16.msra.mxu0 %v4098_v63 }
0x12e9   :  { %v2999_v37 = vmul.f32 %v5060_v32, %v5060_v32 }
0x12ea   :  { %v2992_v20 = vpop.f32.mrf.mxu1 }
0x12eb   :  { %v5065_v21 = vadd.f32 %v2992_v20, %v4783_v4  ;;  %3001 = vadd.xlane.f32.xlu1 %v2999_v37  ;;  %v4103_v4 = vld [vmem:[%s5187_s13 + $0x54] ss:$8 sps:$4 sm:$0xff]  }
0x12ec   :  { %v3982_v22 = vpop.f32.mrf.mxu1  ;;  %3122 = vmatprep.subr.bf16.mxu0 %v4103_v4 }
0x12ed   :  { %v3000_v23 = vmul.f32 %v5065_v21, %v5065_v21  ;;  %3123 = vmatpush1.bf16.msra.mxu0 %v4101_v25 }
0x12ee   :  { %3124 = vmatprep.subr.bf16.mxu0 %v4106_v26 }
0x12ef   :  { %3003 = vadd.xlane.f32.xlu0 %v3000_v23 }
0x12f1   :  { %3125 = vmatpush1.bf16.msra.mxu0 %v4104_v27 }
0x12f2   :  { %3126 = vmatprep.subr.bf16.mxu0 %v4109_v30 }
0x12f5   :  { %3127 = vmatpush1.bf16.msra.mxu0 %v4107_v31 }
0x12f6   :  { %3128 = vmatprep.subr.bf16.mxu0 %v4112_v33 }
0x12f9   :  { %3129 = vmatpush1.bf16.msra.mxu0 %v4110_v36 }
0x12fa   :  { %3130 = vmatprep.subr.bf16.mxu0 %v4115_v38 }
0x12fd   :  { %3131 = vmatpush1.bf16.msra.mxu0 %v4113_v42 }
0x12fe   :  { %3132 = vmatprep.subr.bf16.mxu0 %v4118_v47 }
0x1301   :  { %3133 = vmatpush1.bf16.msra.mxu0 %v4116_v34 }
0x1374   :  { %v3002_v59 = vpop.xlane.xlu1 %3001 }
0x1375   :  { %v3005_v60 = vmul.f32 0.0078125, %v3002_v59 }
0x1377   :  { %v3007_v61 = vadd.f32 1e-06, %v3005_v60 }
0x1378   :  { %v3004_v62 = vpop.xlane.xlu0 %3003 }
0x1379   :  { %4207 = vrsqrt.f32 %v3007_v61  ;;  %v3006_v41 = vmul.f32 0.0078125, %v3004_v62 }
0x137b   :  { %v3008_v2 = vadd.f32 1e-06, %v3006_v41 }
0x137d   :  { %4209 = vrsqrt.f32 %v3008_v2 }
0x1386   :  { %v4208_v40 = vpop.eup %4207 }
0x1387   :  { %v3011_v5 = vmul.f32 %v4208_v40, %v5060_v32 }
0x1389   :  { %v3019_v50 = vmul.f32 %v3504_v35, %v3011_v5 }
0x138a   :  { %v4210_v6 = vpop.eup %4209 }
0x138b   :  { %v3012_v45 = vmul.f32 %v4210_v6, %v5065_v21 }
0x138d   :  { %v3020_v7 = vmul.f32 %v3504_v35, %v3012_v45 }
0x138f   :  { %v3021_v8 = vpack.c.bf16 %v3020_v7, %v3019_v50 }
0x1391   :  { %3151 = vmatmul.mubr.bf16.vlgmr.msra.gmra.mxu0 %v3021_v8 }
0x1451   :  { %v3152_v49 = vpop.f32.mrf.mxu0 }
0x1452   :  { %v3161_v18 = vmax.f32 %v3152_v49, 0.0 }
0x1453   :  { %v3154_v13 = vpop.f32.mrf.mxu0 }
0x1454   :  { %v3162_v16 = vmax.f32 %v3154_v13, 0.0 }
0x1455   :  { %v3156_v14 = vpop.f32.mrf.mxu0 }
0x1456   :  { %v3163_v15 = vmax.f32 %v3156_v14, 0.0 }
0x1457   :  { %v3158_v3 = vpop.f32.mrf.mxu0 }
0x1458   :  { %v3164_v17 = vmax.f32 %v3158_v3, 0.0  ;;  %v3165_v39 = vpack.c.bf16 %v3163_v15, %v3161_v18 }
0x145a   :  { %v3166_v48 = vpack.c.bf16 %v3164_v17, %v3162_v16 }
0x145c   :  { %3327 = vmatprep.mubr.bf16.mxu1 %v3166_v48 }
0x145d   :  { %3328 = vmatmul.mubr.bf16.vlgmr.msra.gmra.mxu1 %v3165_v39 }
0x151d   :  { %v3685_v46 = vpop.f32.mrf.mxu1 }
0x151f   :  { %v3686_v1 = vpop.f32.mrf.mxu1 }
0x1520   :  { %v3687_v54 = vadd.f32 %v3686_v1, %v3685_v46 }
0x1521   :  { %v3688_v19 = vpop.f32.mrf.mxu1 }
0x1522   :  { %v3336_v37 = vadd.f32 %v3687_v54, %v5060_v32  ;;  %v3537_v32 = vld [vmem:[%s5190_s15] ss:$0 sm:$0xff] }
0x1523   :  { %v3689_v20 = vpop.f32.mrf.mxu1 }
0x1524   :  { %v3690_v22 = vadd.f32 %v3689_v20, %v3688_v19  ;;  %v3339_v23 = vmul.f32 %v3336_v37, %v3336_v37 }
0x1526   :  { %v3337_v24 = vadd.f32 %v3690_v22, %v5065_v21  ;;  %3341 = vadd.xlane.f32.xlu1 %v3339_v23 }
0x1528   :  { %v3340_v63 = vmul.f32 %v3337_v24, %v3337_v24 }
0x152a   :  { %3343 = vadd.xlane.f32.xlu1 %v3340_v63 }
0x15af   :  { %v3342_v4 = vpop.xlane.xlu1 %3341 }
0x15b0   :  { %v3345_v25 = vmul.f32 0.0078125, %v3342_v4 }
0x15b2   :  { %v3347_v26 = vadd.f32 1e-06, %v3345_v25 }
0x15b3   :  { %v3344_v27 = vpop.xlane.xlu1 %3343 }
0x15b4   :  { %4211 = vrsqrt.f32 %v3347_v26  ;;  %v3346_v30 = vmul.f32 0.0078125, %v3344_v27 }
0x15b6   :  { %v3348_v31 = vadd.f32 1e-06, %v3346_v30 }
0x15b8   :  { %4213 = vrsqrt.f32 %v3348_v31 }
0x15c1   :  { %v4212_v33 = vpop.eup %4211 }
0x15c2   :  { %v3351_v36 = vmul.f32 %v4212_v33, %v3336_v37 }
0x15c4   :  { %v3359_v38 = vmul.f32 %v3537_v32, %v3351_v36 }
0x15c5   :  { %v4214_v42 = vpop.eup %4213 }
0x15c6   :  { %3361 = vst [vmem:[%s5191_s16] sm:$0xff] %v3359_v38  ;;  %v3352_v21 = vmul.f32 %v4214_v42, %v3337_v24 }
0x15c8   :  { %v3360_v47 = vmul.f32 %v3537_v32, %v3352_v21 }
0x15ca   :  { %3362 = vst [vmem:[%s5191_s16 + $0x8] sm:$0xff] %v3360_v47 }

</bundles_post_ra>
